<compile_context>
chip_gen: v7x
topology: tpu7x:2x2x1
jax: 0.10.0
libtpu: 0.0.40
codegen_flags: <defaults>
</compile_context>

<pallas_src>
import numpy as np

import jax
import jax.numpy as jnp
from jax import lax
from jax.experimental import pallas as pl
from jax.experimental.pallas import tpu as pltpu


# ----------------------------------------------------------------------------
# Host-side constant-matrix builders (packed layout: rows = H, lanes = W*C).
# ----------------------------------------------------------------------------
def _pad_h_mat(H):
    """(H+2, H): zero-pad one row top/bottom."""
    m = np.zeros((H + 2, H), np.float32)
    m[1:H + 1, :] = np.eye(H, dtype=np.float32)
    return m


def _pad_w_mat(W, C):
    """(W*C, (W+2)*C): zero-pad one pixel left/right in packed lanes."""
    m = np.zeros((W * C, (W + 2) * C), np.float32)
    for w in range(W):
        m[w * C:(w + 1) * C, (w + 1) * C:(w + 2) * C] = np.eye(C, dtype=np.float32)
    return m


def _pool_h_mat(H):
    """(H//2, H): average pairs of rows."""
    m = np.zeros((H // 2, H), np.float32)
    for h in range(H // 2):
        m[h, 2 * h] = 0.5
        m[h, 2 * h + 1] = 0.5
    return m


def _pool_w_mat(W, C):
    """(W*C, (W//2)*C): average pairs of pixel lane-groups."""
    m = np.zeros((W * C, (W // 2) * C), np.float32)
    for w in range(W // 2):
        for j in range(2):
            m[(2 * w + j) * C:(2 * w + j + 1) * C, w * C:(w + 1) * C] += (
                0.5 * np.eye(C, dtype=np.float32))
    return m


def _up_h_mat(H):
    """(2H+2, H): nearest x2 row upsample + 1-row zero pad top/bottom."""
    m = np.zeros((2 * H + 2, H), np.float32)
    for h in range(H):
        m[1 + 2 * h, h] = 1.0
        m[2 + 2 * h, h] = 1.0
    return m


def _up_w_mat(W, C):
    """(W*C, (2W+2)*C): nearest x2 pixel upsample + 1-pixel zero pad in lanes."""
    m = np.zeros((W * C, (2 * W + 2) * C), np.float32)
    for w in range(W):
        for j in range(2):
            m[w * C:(w + 1) * C, (1 + 2 * w + j) * C:(2 + 2 * w + j) * C] = (
                np.eye(C, dtype=np.float32))
    return m


def _conv_slab(weight, W):
    """(Cout, Cin, 3, 3) -> (3, (W+2)*Cin, W*Cout) banded matrices.

    Conv output Y (H, W*Cout) = sum_kh Xp[kh:kh+H, :] @ M[kh], with Xp the
    padded packed input (H+2, (W+2)*Cin).
    """
    Cout, Cin, KH, KW = weight.shape
    M = np.zeros((KH, (W + 2) * Cin, W * Cout), np.float32)
    for kh in range(KH):
        for w in range(W):
            for kw in range(KW):
                M[kh, (w + kw) * Cin:(w + kw + 1) * Cin,
                  w * Cout:(w + 1) * Cout] = weight[:, :, kh, kw].T
    return M


def _fold_bn(p, eps=1e-5):
    """Fold inference-mode BatchNorm into conv weight/bias."""
    w = np.asarray(p["w"], np.float32)
    b = np.asarray(p["b"], np.float32)
    gamma = np.asarray(p["bn"]["gamma"], np.float32)
    beta = np.asarray(p["bn"]["beta"], np.float32)
    mean = np.asarray(p["bn"]["mean"], np.float32)
    var = np.asarray(p["bn"]["var"], np.float32)
    s = gamma / np.sqrt(var + eps)
    return w * s[:, None, None, None], (b - mean) * s + beta


def _hourglass_channels(block_expansion, in_features, num_blocks, max_features):
    enc_in, enc_out = [], []
    for i in range(num_blocks):
        enc_in.append(in_features if i == 0
                      else min(max_features, block_expansion * (2 ** i)))
        enc_out.append(min(max_features, block_expansion * (2 ** (i + 1))))
    dec_in, dec_out = [], []
    for i in reversed(range(num_blocks)):
        dec_in.append((1 if i == num_blocks - 1 else 2)
                      * min(max_features, block_expansion * (2 ** (i + 1))))
        dec_out.append(min(max_features, block_expansion * (2 ** i)))
    return enc_in, enc_out, dec_in, dec_out


def _build_operands(params, enc_in, enc_out, dec_out, S, T, num_blocks):
    """Fold pad / pool / upsample / BN into per-conv (L, RM, bias) operands."""
    ops = []
    # --- encoder (DownBlock2d) ---
    for k in range(num_blocks):
        w_eff, b_eff = _fold_bn(params["down"][k])
        Sk, Cin, Cout = S[k], enc_in[k], enc_out[k]
        M = _conv_slab(w_eff, Sk)
        if k == 0:
            Lfull = _pad_h_mat(Sk)
            Rfull = _pad_w_mat(Sk, Cin)
        else:
            Sp, Cp = S[k - 1], enc_out[k - 1]
            Lfull = _pad_h_mat(Sk) @ _pool_h_mat(Sp)
            Rfull = _pool_w_mat(Sp, Cp) @ _pad_w_mat(Sk, Cin)
        L = np.stack([Lfull[kh:kh + Sk] for kh in range(3)])
        RM = np.stack([Rfull @ M[kh] for kh in range(3)])
        B = np.tile(b_eff, Sk)[None, :]
        Ph = _pool_h_mat(Sk)
        Pw = _pool_w_mat(Sk, Cout)
        ops += [L, RM, B, Ph, Pw]
    # --- decoder (UpBlock2d) ---
    for j in range(num_blocks):
        w_eff, b_eff = _fold_bn(params["up"][j])
        Tj, Cout = T[j], dec_out[j]
        B = np.tile(b_eff, Tj)[None, :]
        if j == 0:
            m = num_blocks - 1
            Sm, Cm = S[m], enc_out[m]
            M = _conv_slab(w_eff, Tj)
            Lfull = _up_h_mat(Sm // 2) @ _pool_h_mat(Sm)
            Rfull = _pool_w_mat(Sm, Cm) @ _up_w_mat(Sm // 2, Cm)
            L = np.stack([Lfull[kh:kh + Tj] for kh in range(3)])
            RM = np.stack([Rfull @ M[kh] for kh in range(3)])
            ops += [L, RM, B]
        else:
            Ca = dec_out[j - 1]                 # channels from previous up out
            m = num_blocks - 1 - j
            Sm, Cb = S[m], enc_out[m]           # skip = pooled encoder y_m
            MA = _conv_slab(w_eff[:, :Ca], Tj)
            MB = _conv_slab(w_eff[:, Ca:], Tj)
            LAf = _up_h_mat(T[j - 1])
            RAf = _up_w_mat(T[j - 1], Ca)
            LBf = _up_h_mat(Sm // 2) @ _pool_h_mat(Sm)
            RBf = _pool_w_mat(Sm, Cb) @ _up_w_mat(Sm // 2, Cb)
            LA = np.stack([LAf[kh:kh + Tj] for kh in range(3)])
            RMA = np.stack([RAf @ MA[kh] for kh in range(3)])
            LB = np.stack([LBf[kh:kh + Tj] for kh in range(3)])
            RMB = np.stack([RBf @ MB[kh] for kh in range(3)])
            ops += [LA, RMA, LB, RMB, B]
    return [jnp.asarray(o, jnp.float32) for o in ops]


# ----------------------------------------------------------------------------
# Pallas kernel: whole hourglass for one batch element, all in VMEM.
# ----------------------------------------------------------------------------
def _make_hourglass_kernel(num_blocks):
    def kernel(*refs):
        i = 0
        x_ref = refs[i]; i += 1
        down = []
        for _ in range(num_blocks):
            down.append(refs[i:i + 5]); i += 5
        up = [refs[i:i + 3]]; i += 3
        for _ in range(num_blocks - 1):
            up.append(refs[i:i + 5]); i += 5
        d_refs = refs[i:i + num_blocks]; i += num_blocks
        u_ref = refs[i]

        def mm(a, b):
            return jnp.dot(a, b, preferred_element_type=jnp.float32)

        def fused_conv(branches, b_ref):
            # conv (+ folded pad/pool/upsample) + folded-BN bias + ReLU
            acc = None
            for t, l_ref, rm_ref in branches:
                for kh in range(3):
                    v = mm(mm(l_ref[kh], t), rm_ref[kh])
                    acc = v if acc is None else acc + v
            return jnp.maximum(acc + b_ref[...], 0.0)

        # Encoder: keep pre-pool activations y_k; pooled outputs are the feats.
        ys = []
        t = x_ref[...]
        for k in range(num_blocks):
            L, RM, B, Ph, Pw = down[k]
            y = fused_conv([(t, L, RM)], B)
            ys.append(y)
            d_refs[k][...] = mm(mm(Ph[...], y), Pw[...])
            t = y

        # Decoder: first up-block consumes pooled(y_last) (fold in L/RM);
        # later blocks consume [prev up out, pooled skip] via split weights.
        L0, RM0, B0 = up[0]
        u = fused_conv([(ys[-1], L0, RM0)], B0)
        for j in range(1, num_blocks):
            LA, RMA, LB, RMB, B = up[j]
            u = fused_conv([(u, LA, RMA),
                            (ys[num_blocks - 1 - j], LB, RMB)], B)
        u_ref[...] = u

    return kernel


def _const_spec(shape):
    nd = len(shape)
    return pl.BlockSpec(shape, lambda n, _nd=nd: (0,) * _nd)


# ----------------------------------------------------------------------------
# Module wrapper: NCHW in / (feats, result) out, like the PyTorch module.
# ----------------------------------------------------------------------------
def hourglass_w_emb_forward(x_nchw, params, *, block_expansion, in_features,
                            num_blocks, max_features):
    N, Cin, H, W = x_nchw.shape
    enc_in, enc_out, _, dec_out = _hourglass_channels(
        block_expansion, in_features, num_blocks, max_features)
    S = [H // (2 ** k) for k in range(num_blocks)]           # encoder conv res
    T = [S[num_blocks - 1 - j] for j in range(num_blocks)]   # decoder conv res

    # Host-side packing of folded weights (cheap; would be cached in practice).
    ops = _build_operands(params, enc_in, enc_out, dec_out, S, T, num_blocks)

    # Lane-packed activation layout: (N, H, W*C).
    x_packed = jnp.transpose(x_nchw, (0, 2, 3, 1)).reshape(N, H, W * Cin)

    in_specs = [pl.BlockSpec((None, H, W * Cin), lambda n: (n, 0, 0))]
    in_specs += [_const_spec(tuple(o.shape)) for o in ops]

    out_shapes, out_specs, d_meta = [], [], []
    for k in range(num_blocks):
        hs, cs = S[k] // 2, enc_out[k]
        d_meta.append((hs, hs, cs))
        out_shapes.append(jax.ShapeDtypeStruct((N, hs, hs * cs), jnp.float32))
        out_specs.append(pl.BlockSpec((None, hs, hs * cs), lambda n: (n, 0, 0)))
    tu, cu = T[-1], dec_out[-1]
    out_shapes.append(jax.ShapeDtypeStruct((N, tu, tu * cu), jnp.float32))
    out_specs.append(pl.BlockSpec((None, tu, tu * cu), lambda n: (n, 0, 0)))

    outs = pl.pallas_call(
        _make_hourglass_kernel(num_blocks),
        grid=(N,),
        in_specs=in_specs,
        out_specs=out_specs,
        out_shape=out_shapes,
        compiler_params=pltpu.CompilerParams(
            dimension_semantics=("parallel",),
            vmem_limit_bytes=32 * 1024 * 1024,
        ),
    )(x_packed, *ops)

    d_packed, u_packed = outs[:num_blocks], outs[num_blocks]

    def unpack(p, hh, ww, cc):
        return jnp.transpose(p.reshape(N, hh, ww, cc), (0, 3, 1, 2))

    d = [unpack(d_packed[k], *d_meta[k]) for k in range(num_blocks)]
    u = unpack(u_packed, tu, tu, cu)

    result = jnp.concatenate([u, x_nchw], axis=1)
    feats = [d[num_blocks - 1 - i] for i in range(num_blocks)] + [x_nchw]
    return feats, result


# ----------------------------------------------------------------------------
# Pure-JAX/XLA reference (mirrors the PyTorch graph in NCHW) for validation.
# ----------------------------------------------------------------------------
def _reference_hourglass(x, params, num_blocks, eps=1e-5):
    dn = ("NCHW", "OIHW", "NCHW")

    def conv_bn_relu(inp, p):
        y = lax.conv_general_dilated(inp, p["w"], (1, 1), ((1, 1), (1, 1)),
                                     dimension_numbers=dn,
                                     precision=lax.Precision.HIGHEST)
        y = y + p["b"][None, :, None, None]
        bn = p["bn"]
        s = bn["gamma"] / jnp.sqrt(bn["var"] + eps)
        y = ((y - bn["mean"][None, :, None, None]) * s[None, :, None, None]
             + bn["beta"][None, :, None, None])
        return jnp.maximum(y, 0.0)

    def down(inp, p):
        y = conv_bn_relu(inp, p)
        n, c, h, w = y.shape
        return y.reshape(n, c, h // 2, 2, w // 2, 2).mean(axis=(3, 5))

    def up(inp, p):
        y = jnp.repeat(jnp.repeat(inp, 2, axis=2), 2, axis=3)
        return conv_bn_relu(y, p)

    embs = [x]
    for k in range(num_blocks):
        embs.append(down(embs[-1], params["down"][k]))
    feats = []
    out = embs.pop()
    feats.append(out)
    for j in range(num_blocks):
        out = up(out, params["up"][j])
        skip = embs.pop()
        feats.append(skip)
        out = jnp.concatenate([out, skip], axis=1)
    return feats, out


def _make_params(key, block_expansion, in_features, num_blocks, max_features):
    enc_in, enc_out, dec_in, dec_out = _hourglass_channels(
        block_expansion, in_features, num_blocks, max_features)
    cins, couts = enc_in + dec_in, enc_out + dec_out
    keys = jax.random.split(key, 6 * len(cins))
    blocks = []
    for idx, (ci, co) in enumerate(zip(cins, couts)):
        ks = keys[6 * idx:6 * idx + 6]
        blocks.append({
            "w": 0.1 * jax.random.normal(ks[0], (co, ci, 3, 3), jnp.float32),
            "b": 0.05 * jax.random.normal(ks[1], (co,), jnp.float32),
            "bn": {
                "gamma": 1.0 + 0.1 * jax.random.normal(ks[2], (co,), jnp.float32),
                "beta": 0.05 * jax.random.normal(ks[3], (co,), jnp.float32),
                "mean": 0.1 * jax.random.normal(ks[4], (co,), jnp.float32),
                "var": 0.5 + 0.5 * jax.random.uniform(ks[5], (co,), jnp.float32),
            },
        })
    return {"down": blocks[:num_blocks], "up": blocks[num_blocks:]}


if __name__ == "__main__":
    BLOCK_EXPANSION, IN_FEATURES, NUM_BLOCKS, MAX_FEATURES = 4, 4, 3, 256
    N, H, W = 2, 16, 16

    key = jax.random.PRNGKey(0)
    k_x, k_p = jax.random.split(key)
    x = jax.random.normal(k_x, (N, IN_FEATURES, H, W), jnp.float32)
    params = _make_params(k_p, BLOCK_EXPANSION, IN_FEATURES, NUM_BLOCKS,
                          MAX_FEATURES)

    feats, result = hourglass_w_emb_forward(
        x, params, block_expansion=BLOCK_EXPANSION, in_features=IN_FEATURES,
        num_blocks=NUM_BLOCKS, max_features=MAX_FEATURES)
    jax.block_until_ready(result)

    ref_feats, ref_result = _reference_hourglass(x, params, NUM_BLOCKS)
    jax.block_until_ready(ref_result)

    assert result.shape == (N, BLOCK_EXPANSION + IN_FEATURES, H, W), result.shape
    assert len(feats) == NUM_BLOCKS + 1
    for a, b in zip(feats, ref_feats):
        assert a.shape == b.shape, (a.shape, b.shape)
        assert jnp.allclose(a, b, rtol=1e-2, atol=1e-2), float(
            jnp.max(jnp.abs(a - b)))
    assert jnp.allclose(result, ref_result, rtol=1e-2, atol=1e-2), float(
        jnp.max(jnp.abs(result - ref_result)))

    print("KERNEL_OK")
</pallas_src>

<mosaic_0001>
module attributes {stable_mosaic.version = 11 : i64} {
  func.func @kernel(%arg0: i32, %arg1: memref<1x16x64xf32, #tpu.memory_space<vmem>>, %arg2: memref<3x16x16xf32, #tpu.memory_space<vmem>>, %arg3: memref<3x64x128xf32, #tpu.memory_space<vmem>>, %arg4: memref<1x128xf32, #tpu.memory_space<vmem>>, %arg5: memref<8x16xf32, #tpu.memory_space<vmem>>, %arg6: memref<128x64xf32, #tpu.memory_space<vmem>>, %arg7: memref<3x8x16xf32, #tpu.memory_space<vmem>>, %arg8: memref<3x128x128xf32, #tpu.memory_space<vmem>>, %arg9: memref<1x128xf32, #tpu.memory_space<vmem>>, %arg10: memref<4x8xf32, #tpu.memory_space<vmem>>, %arg11: memref<128x64xf32, #tpu.memory_space<vmem>>, %arg12: memref<3x4x8xf32, #tpu.memory_space<vmem>>, %arg13: memref<3x128x128xf32, #tpu.memory_space<vmem>>, %arg14: memref<1x128xf32, #tpu.memory_space<vmem>>, %arg15: memref<2x4xf32, #tpu.memory_space<vmem>>, %arg16: memref<128x64xf32, #tpu.memory_space<vmem>>, %arg17: memref<3x4x4xf32, #tpu.memory_space<vmem>>, %arg18: memref<3x128x64xf32, #tpu.memory_space<vmem>>, %arg19: memref<1x64xf32, #tpu.memory_space<vmem>>, %arg20: memref<3x8x4xf32, #tpu.memory_space<vmem>>, %arg21: memref<3x64x64xf32, #tpu.memory_space<vmem>>, %arg22: memref<3x8x8xf32, #tpu.memory_space<vmem>>, %arg23: memref<3x128x64xf32, #tpu.memory_space<vmem>>, %arg24: memref<1x64xf32, #tpu.memory_space<vmem>>, %arg25: memref<3x16x8xf32, #tpu.memory_space<vmem>>, %arg26: memref<3x64x64xf32, #tpu.memory_space<vmem>>, %arg27: memref<3x16x16xf32, #tpu.memory_space<vmem>>, %arg28: memref<3x128x64xf32, #tpu.memory_space<vmem>>, %arg29: memref<1x64xf32, #tpu.memory_space<vmem>>, %arg30: memref<1x8x64xf32, #tpu.memory_space<vmem>>, %arg31: memref<1x4x64xf32, #tpu.memory_space<vmem>>, %arg32: memref<1x2x64xf32, #tpu.memory_space<vmem>>, %arg33: memref<1x16x64xf32, #tpu.memory_space<vmem>>) attributes {dimension_semantics = [#tpu.dimension_semantics<parallel>], iteration_bounds = array<i64: 2>, scalar_prefetch = 0 : i64, scratch_operands = 0 : i64, tpu.core_type = #tpu.core_type<tc>, window_params = [{transform_indices = @transform_0, window_bounds = array<i64: 1, 16, 64>}, {pipeline_mode = #tpu.pipeline_mode<synchronous>, transform_indices = @transform_1, window_bounds = array<i64: 3, 16, 16>}, {pipeline_mode = #tpu.pipeline_mode<synchronous>, transform_indices = @transform_2, window_bounds = array<i64: 3, 64, 128>}, {pipeline_mode = #tpu.pipeline_mode<synchronous>, transform_indices = @transform_3, window_bounds = array<i64: 1, 128>}, {pipeline_mode = #tpu.pipeline_mode<synchronous>, transform_indices = @transform_4, window_bounds = array<i64: 8, 16>}, {pipeline_mode = #tpu.pipeline_mode<synchronous>, transform_indices = @transform_5, window_bounds = array<i64: 128, 64>}, {pipeline_mode = #tpu.pipeline_mode<synchronous>, transform_indices = @transform_6, window_bounds = array<i64: 3, 8, 16>}, {pipeline_mode = #tpu.pipeline_mode<synchronous>, transform_indices = @transform_7, window_bounds = array<i64: 3, 128, 128>}, {pipeline_mode = #tpu.pipeline_mode<synchronous>, transform_indices = @transform_8, window_bounds = array<i64: 1, 128>}, {pipeline_mode = #tpu.pipeline_mode<synchronous>, transform_indices = @transform_9, window_bounds = array<i64: 4, 8>}, {pipeline_mode = #tpu.pipeline_mode<synchronous>, transform_indices = @transform_10, window_bounds = array<i64: 128, 64>}, {pipeline_mode = #tpu.pipeline_mode<synchronous>, transform_indices = @transform_11, window_bounds = array<i64: 3, 4, 8>}, {pipeline_mode = #tpu.pipeline_mode<synchronous>, transform_indices = @transform_12, window_bounds = array<i64: 3, 128, 128>}, {pipeline_mode = #tpu.pipeline_mode<synchronous>, transform_indices = @transform_13, window_bounds = array<i64: 1, 128>}, {pipeline_mode = #tpu.pipeline_mode<synchronous>, transform_indices = @transform_14, window_bounds = array<i64: 2, 4>}, {pipeline_mode = #tpu.pipeline_mode<synchronous>, transform_indices = @transform_15, window_bounds = array<i64: 128, 64>}, {pipeline_mode = #tpu.pipeline_mode<synchronous>, transform_indices = @transform_16, window_bounds = array<i64: 3, 4, 4>}, {pipeline_mode = #tpu.pipeline_mode<synchronous>, transform_indices = @transform_17, window_bounds = array<i64: 3, 128, 64>}, {pipeline_mode = #tpu.pipeline_mode<synchronous>, transform_indices = @transform_18, window_bounds = array<i64: 1, 64>}, {pipeline_mode = #tpu.pipeline_mode<synchronous>, transform_indices = @transform_19, window_bounds = array<i64: 3, 8, 4>}, {pipeline_mode = #tpu.pipeline_mode<synchronous>, transform_indices = @transform_20, window_bounds = array<i64: 3, 64, 64>}, {pipeline_mode = #tpu.pipeline_mode<synchronous>, transform_indices = @transform_21, window_bounds = array<i64: 3, 8, 8>}, {pipeline_mode = #tpu.pipeline_mode<synchronous>, transform_indices = @transform_22, window_bounds = array<i64: 3, 128, 64>}, {pipeline_mode = #tpu.pipeline_mode<synchronous>, transform_indices = @transform_23, window_bounds = array<i64: 1, 64>}, {pipeline_mode = #tpu.pipeline_mode<synchronous>, transform_indices = @transform_24, window_bounds = array<i64: 3, 16, 8>}, {pipeline_mode = #tpu.pipeline_mode<synchronous>, transform_indices = @transform_25, window_bounds = array<i64: 3, 64, 64>}, {pipeline_mode = #tpu.pipeline_mode<synchronous>, transform_indices = @transform_26, window_bounds = array<i64: 3, 16, 16>}, {pipeline_mode = #tpu.pipeline_mode<synchronous>, transform_indices = @transform_27, window_bounds = array<i64: 3, 128, 64>}, {pipeline_mode = #tpu.pipeline_mode<synchronous>, transform_indices = @transform_28, window_bounds = array<i64: 1, 64>}, {transform_indices = @transform_29, window_bounds = array<i64: 1, 8, 64>}, {transform_indices = @transform_30, window_bounds = array<i64: 1, 4, 64>}, {transform_indices = @transform_31, window_bounds = array<i64: 1, 2, 64>}, {transform_indices = @transform_32, window_bounds = array<i64: 1, 16, 64>}]} {
    %c0 = arith.constant 0 : index
    %c0_0 = arith.constant 0 : index
    %c0_1 = arith.constant 0 : index
    %0 = vector.load %arg1[%c0, %c0_0, %c0_1] : memref<1x16x64xf32, #tpu.memory_space<vmem>>, vector<1x16x64xf32>
    %1 = vector.shape_cast %0 : vector<1x16x64xf32> to vector<16x64xf32>
    %c0_2 = arith.constant 0 : index
    %c0_3 = arith.constant 0 : index
    %c0_4 = arith.constant 0 : index
    %2 = vector.load %arg2[%c0_2, %c0_3, %c0_4] : memref<3x16x16xf32, #tpu.memory_space<vmem>>, vector<1x16x16xf32>
    %3 = vector.shape_cast %2 : vector<1x16x16xf32> to vector<16x16xf32>
    %cst = arith.constant dense<0.000000e+00> : vector<16x64xf32>
    %4 = tpu.matmul %3, %1, %cst {dimension_numbers = #tpu.dot_dimension_numbers<[1], [0], [0], [1], [0, 0, 1, 1], [], []>} : vector<16x16xf32>, vector<16x64xf32>, vector<16x64xf32> -> vector<16x64xf32>
    %c0_5 = arith.constant 0 : index
    %c0_6 = arith.constant 0 : index
    %c0_7 = arith.constant 0 : index
    %5 = vector.load %arg3[%c0_5, %c0_6, %c0_7] : memref<3x64x128xf32, #tpu.memory_space<vmem>>, vector<1x64x128xf32>
    %6 = vector.shape_cast %5 : vector<1x64x128xf32> to vector<64x128xf32>
    %cst_8 = arith.constant dense<0.000000e+00> : vector<16x128xf32>
    %7 = tpu.matmul %4, %6, %cst_8 {dimension_numbers = #tpu.dot_dimension_numbers<[1], [0], [0], [1], [0, 0, 1, 1], [], []>} : vector<16x64xf32>, vector<64x128xf32>, vector<16x128xf32> -> vector<16x128xf32>
    %c1 = arith.constant 1 : index
    %c0_9 = arith.constant 0 : index
    %c0_10 = arith.constant 0 : index
    %8 = vector.load %arg2[%c1, %c0_9, %c0_10] : memref<3x16x16xf32, #tpu.memory_space<vmem>>, vector<1x16x16xf32>
    %9 = vector.shape_cast %8 : vector<1x16x16xf32> to vector<16x16xf32>
    %cst_11 = arith.constant dense<0.000000e+00> : vector<16x64xf32>
    %10 = tpu.matmul %9, %1, %cst_11 {dimension_numbers = #tpu.dot_dimension_numbers<[1], [0], [0], [1], [0, 0, 1, 1], [], []>} : vector<16x16xf32>, vector<16x64xf32>, vector<16x64xf32> -> vector<16x64xf32>
    %c1_12 = arith.constant 1 : index
    %c0_13 = arith.constant 0 : index
    %c0_14 = arith.constant 0 : index
    %11 = vector.load %arg3[%c1_12, %c0_13, %c0_14] : memref<3x64x128xf32, #tpu.memory_space<vmem>>, vector<1x64x128xf32>
    %12 = vector.shape_cast %11 : vector<1x64x128xf32> to vector<64x128xf32>
    %cst_15 = arith.constant dense<0.000000e+00> : vector<16x128xf32>
    %13 = tpu.matmul %10, %12, %cst_15 {dimension_numbers = #tpu.dot_dimension_numbers<[1], [0], [0], [1], [0, 0, 1, 1], [], []>} : vector<16x64xf32>, vector<64x128xf32>, vector<16x128xf32> -> vector<16x128xf32>
    %14 = arith.addf %7, %13 : vector<16x128xf32>
    %c2 = arith.constant 2 : index
    %c0_16 = arith.constant 0 : index
    %c0_17 = arith.constant 0 : index
    %15 = vector.load %arg2[%c2, %c0_16, %c0_17] : memref<3x16x16xf32, #tpu.memory_space<vmem>>, vector<1x16x16xf32>
    %16 = vector.shape_cast %15 : vector<1x16x16xf32> to vector<16x16xf32>
    %cst_18 = arith.constant dense<0.000000e+00> : vector<16x64xf32>
    %17 = tpu.matmul %16, %1, %cst_18 {dimension_numbers = #tpu.dot_dimension_numbers<[1], [0], [0], [1], [0, 0, 1, 1], [], []>} : vector<16x16xf32>, vector<16x64xf32>, vector<16x64xf32> -> vector<16x64xf32>
    %c2_19 = arith.constant 2 : index
    %c0_20 = arith.constant 0 : index
    %c0_21 = arith.constant 0 : index
    %18 = vector.load %arg3[%c2_19, %c0_20, %c0_21] : memref<3x64x128xf32, #tpu.memory_space<vmem>>, vector<1x64x128xf32>
    %19 = vector.shape_cast %18 : vector<1x64x128xf32> to vector<64x128xf32>
    %cst_22 = arith.constant dense<0.000000e+00> : vector<16x128xf32>
    %20 = tpu.matmul %17, %19, %cst_22 {dimension_numbers = #tpu.dot_dimension_numbers<[1], [0], [0], [1], [0, 0, 1, 1], [], []>} : vector<16x64xf32>, vector<64x128xf32>, vector<16x128xf32> -> vector<16x128xf32>
    %21 = arith.addf %14, %20 : vector<16x128xf32>
    %c0_23 = arith.constant 0 : index
    %c0_24 = arith.constant 0 : index
    %22 = vector.load %arg4[%c0_23, %c0_24] : memref<1x128xf32, #tpu.memory_space<vmem>>, vector<1x128xf32>
    %23 = vector.broadcast %22 : vector<1x128xf32> to vector<16x128xf32>
    %24 = arith.addf %21, %23 : vector<16x128xf32>
    %cst_25 = arith.constant 0.000000e+00 : f32
    %25 = vector.broadcast %cst_25 : f32 to vector<16x128xf32>
    %26 = arith.maximumf %24, %25 : vector<16x128xf32>
    %c0_26 = arith.constant 0 : index
    %c0_27 = arith.constant 0 : index
    %27 = vector.load %arg5[%c0_26, %c0_27] : memref<8x16xf32, #tpu.memory_space<vmem>>, vector<8x16xf32>
    %cst_28 = arith.constant dense<0.000000e+00> : vector<8x128xf32>
    %28 = tpu.matmul %27, %26, %cst_28 {dimension_numbers = #tpu.dot_dimension_numbers<[1], [0], [0], [1], [0, 0, 1, 1], [], []>} : vector<8x16xf32>, vector<16x128xf32>, vector<8x128xf32> -> vector<8x128xf32>
    %c0_29 = arith.constant 0 : index
    %c0_30 = arith.constant 0 : index
    %29 = vector.load %arg6[%c0_29, %c0_30] : memref<128x64xf32, #tpu.memory_space<vmem>>, vector<128x64xf32>
    %cst_31 = arith.constant dense<0.000000e+00> : vector<8x64xf32>
    %30 = tpu.matmul %28, %29, %cst_31 {dimension_numbers = #tpu.dot_dimension_numbers<[1], [0], [0], [1], [0, 0, 1, 1], [], []>} : vector<8x128xf32>, vector<128x64xf32>, vector<8x64xf32> -> vector<8x64xf32>
    %c0_32 = arith.constant 0 : index
    %c0_33 = arith.constant 0 : index
    %c0_34 = arith.constant 0 : index
    %31 = vector.load %arg30[%c0_32, %c0_33, %c0_34] : memref<1x8x64xf32, #tpu.memory_space<vmem>>, vector<1x8x64xf32>
    %32 = vector.shape_cast %31 : vector<1x8x64xf32> to vector<8x64xf32>
    %33 = vector.shape_cast %30 : vector<8x64xf32> to vector<1x8x64xf32>
    tpu.vector_store %arg30[%c0_32, %c0_33, %c0_34], %33 {strides = array<i32>} : memref<1x8x64xf32, #tpu.memory_space<vmem>>, vector<1x8x64xf32>,
    %c0_35 = arith.constant 0 : index
    %c0_36 = arith.constant 0 : index
    %c0_37 = arith.constant 0 : index
    %34 = vector.load %arg7[%c0_35, %c0_36, %c0_37] : memref<3x8x16xf32, #tpu.memory_space<vmem>>, vector<1x8x16xf32>
    %35 = vector.shape_cast %34 : vector<1x8x16xf32> to vector<8x16xf32>
    %cst_38 = arith.constant dense<0.000000e+00> : vector<8x128xf32>
    %36 = tpu.matmul %35, %26, %cst_38 {dimension_numbers = #tpu.dot_dimension_numbers<[1], [0], [0], [1], [0, 0, 1, 1], [], []>} : vector<8x16xf32>, vector<16x128xf32>, vector<8x128xf32> -> vector<8x128xf32>
    %c0_39 = arith.constant 0 : index
    %c0_40 = arith.constant 0 : index
    %c0_41 = arith.constant 0 : index
    %37 = vector.load %arg8[%c0_39, %c0_40, %c0_41] : memref<3x128x128xf32, #tpu.memory_space<vmem>>, vector<1x128x128xf32>
    %38 = vector.shape_cast %37 : vector<1x128x128xf32> to vector<128x128xf32>
    %cst_42 = arith.constant dense<0.000000e+00> : vector<8x128xf32>
    %39 = tpu.matmul %36, %38, %cst_42 {dimension_numbers = #tpu.dot_dimension_numbers<[1], [0], [0], [1], [0, 0, 1, 1], [], []>} : vector<8x128xf32>, vector<128x128xf32>, vector<8x128xf32> -> vector<8x128xf32>
    %c1_43 = arith.constant 1 : index
    %c0_44 = arith.constant 0 : index
    %c0_45 = arith.constant 0 : index
    %40 = vector.load %arg7[%c1_43, %c0_44, %c0_45] : memref<3x8x16xf32, #tpu.memory_space<vmem>>, vector<1x8x16xf32>
    %41 = vector.shape_cast %40 : vector<1x8x16xf32> to vector<8x16xf32>
    %cst_46 = arith.constant dense<0.000000e+00> : vector<8x128xf32>
    %42 = tpu.matmul %41, %26, %cst_46 {dimension_numbers = #tpu.dot_dimension_numbers<[1], [0], [0], [1], [0, 0, 1, 1], [], []>} : vector<8x16xf32>, vector<16x128xf32>, vector<8x128xf32> -> vector<8x128xf32>
    %c1_47 = arith.constant 1 : index
    %c0_48 = arith.constant 0 : index
    %c0_49 = arith.constant 0 : index
    %43 = vector.load %arg8[%c1_47, %c0_48, %c0_49] : memref<3x128x128xf32, #tpu.memory_space<vmem>>, vector<1x128x128xf32>
    %44 = vector.shape_cast %43 : vector<1x128x128xf32> to vector<128x128xf32>
    %cst_50 = arith.constant dense<0.000000e+00> : vector<8x128xf32>
    %45 = tpu.matmul %42, %44, %cst_50 {dimension_numbers = #tpu.dot_dimension_numbers<[1], [0], [0], [1], [0, 0, 1, 1], [], []>} : vector<8x128xf32>, vector<128x128xf32>, vector<8x128xf32> -> vector<8x128xf32>
    %46 = arith.addf %39, %45 : vector<8x128xf32>
    %c2_51 = arith.constant 2 : index
    %c0_52 = arith.constant 0 : index
    %c0_53 = arith.constant 0 : index
    %47 = vector.load %arg7[%c2_51, %c0_52, %c0_53] : memref<3x8x16xf32, #tpu.memory_space<vmem>>, vector<1x8x16xf32>
    %48 = vector.shape_cast %47 : vector<1x8x16xf32> to vector<8x16xf32>
    %cst_54 = arith.constant dense<0.000000e+00> : vector<8x128xf32>
    %49 = tpu.matmul %48, %26, %cst_54 {dimension_numbers = #tpu.dot_dimension_numbers<[1], [0], [0], [1], [0, 0, 1, 1], [], []>} : vector<8x16xf32>, vector<16x128xf32>, vector<8x128xf32> -> vector<8x128xf32>
    %c2_55 = arith.constant 2 : index
    %c0_56 = arith.constant 0 : index
    %c0_57 = arith.constant 0 : index
    %50 = vector.load %arg8[%c2_55, %c0_56, %c0_57] : memref<3x128x128xf32, #tpu.memory_space<vmem>>, vector<1x128x128xf32>
    %51 = vector.shape_cast %50 : vector<1x128x128xf32> to vector<128x128xf32>
    %cst_58 = arith.constant dense<0.000000e+00> : vector<8x128xf32>
    %52 = tpu.matmul %49, %51, %cst_58 {dimension_numbers = #tpu.dot_dimension_numbers<[1], [0], [0], [1], [0, 0, 1, 1], [], []>} : vector<8x128xf32>, vector<128x128xf32>, vector<8x128xf32> -> vector<8x128xf32>
    %53 = arith.addf %46, %52 : vector<8x128xf32>
    %c0_59 = arith.constant 0 : index
    %c0_60 = arith.constant 0 : index
    %54 = vector.load %arg9[%c0_59, %c0_60] : memref<1x128xf32, #tpu.memory_space<vmem>>, vector<1x128xf32>
    %55 = vector.broadcast %54 : vector<1x128xf32> to vector<8x128xf32>
    %56 = arith.addf %53, %55 : vector<8x128xf32>
    %cst_61 = arith.constant 0.000000e+00 : f32
    %57 = vector.broadcast %cst_61 : f32 to vector<8x128xf32>
    %58 = arith.maximumf %56, %57 : vector<8x128xf32>
    %c0_62 = arith.constant 0 : index
    %c0_63 = arith.constant 0 : index
    %59 = vector.load %arg10[%c0_62, %c0_63] : memref<4x8xf32, #tpu.memory_space<vmem>>, vector<4x8xf32>
    %cst_64 = arith.constant dense<0.000000e+00> : vector<4x128xf32>
    %60 = tpu.matmul %59, %58, %cst_64 {dimension_numbers = #tpu.dot_dimension_numbers<[1], [0], [0], [1], [0, 0, 1, 1], [], []>} : vector<4x8xf32>, vector<8x128xf32>, vector<4x128xf32> -> vector<4x128xf32>
    %c0_65 = arith.constant 0 : index
    %c0_66 = arith.constant 0 : index
    %61 = vector.load %arg11[%c0_65, %c0_66] : memref<128x64xf32, #tpu.memory_space<vmem>>, vector<128x64xf32>
    %cst_67 = arith.constant dense<0.000000e+00> : vector<4x64xf32>
    %62 = tpu.matmul %60, %61, %cst_67 {dimension_numbers = #tpu.dot_dimension_numbers<[1], [0], [0], [1], [0, 0, 1, 1], [], []>} : vector<4x128xf32>, vector<128x64xf32>, vector<4x64xf32> -> vector<4x64xf32>
    %c0_68 = arith.constant 0 : index
    %c0_69 = arith.constant 0 : index
    %c0_70 = arith.constant 0 : index
    %63 = vector.load %arg31[%c0_68, %c0_69, %c0_70] : memref<1x4x64xf32, #tpu.memory_space<vmem>>, vector<1x4x64xf32>
    %64 = vector.shape_cast %63 : vector<1x4x64xf32> to vector<4x64xf32>
    %65 = vector.shape_cast %62 : vector<4x64xf32> to vector<1x4x64xf32>
    tpu.vector_store %arg31[%c0_68, %c0_69, %c0_70], %65 {strides = array<i32>} : memref<1x4x64xf32, #tpu.memory_space<vmem>>, vector<1x4x64xf32>,
    %c0_71 = arith.constant 0 : index
    %c0_72 = arith.constant 0 : index
    %c0_73 = arith.constant 0 : index
    %66 = vector.load %arg12[%c0_71, %c0_72, %c0_73] : memref<3x4x8xf32, #tpu.memory_space<vmem>>, vector<1x4x8xf32>
    %67 = vector.shape_cast %66 : vector<1x4x8xf32> to vector<4x8xf32>
    %cst_74 = arith.constant dense<0.000000e+00> : vector<4x128xf32>
    %68 = tpu.matmul %67, %58, %cst_74 {dimension_numbers = #tpu.dot_dimension_numbers<[1], [0], [0], [1], [0, 0, 1, 1], [], []>} : vector<4x8xf32>, vector<8x128xf32>, vector<4x128xf32> -> vector<4x128xf32>
    %c0_75 = arith.constant 0 : index
    %c0_76 = arith.constant 0 : index
    %c0_77 = arith.constant 0 : index
    %69 = vector.load %arg13[%c0_75, %c0_76, %c0_77] : memref<3x128x128xf32, #tpu.memory_space<vmem>>, vector<1x128x128xf32>
    %70 = vector.shape_cast %69 : vector<1x128x128xf32> to vector<128x128xf32>
    %cst_78 = arith.constant dense<0.000000e+00> : vector<4x128xf32>
    %71 = tpu.matmul %68, %70, %cst_78 {dimension_numbers = #tpu.dot_dimension_numbers<[1], [0], [0], [1], [0, 0, 1, 1], [], []>} : vector<4x128xf32>, vector<128x128xf32>, vector<4x128xf32> -> vector<4x128xf32>
    %c1_79 = arith.constant 1 : index
    %c0_80 = arith.constant 0 : index
    %c0_81 = arith.constant 0 : index
    %72 = vector.load %arg12[%c1_79, %c0_80, %c0_81] : memref<3x4x8xf32, #tpu.memory_space<vmem>>, vector<1x4x8xf32>
    %73 = vector.shape_cast %72 : vector<1x4x8xf32> to vector<4x8xf32>
    %cst_82 = arith.constant dense<0.000000e+00> : vector<4x128xf32>
    %74 = tpu.matmul %73, %58, %cst_82 {dimension_numbers = #tpu.dot_dimension_numbers<[1], [0], [0], [1], [0, 0, 1, 1], [], []>} : vector<4x8xf32>, vector<8x128xf32>, vector<4x128xf32> -> vector<4x128xf32>
    %c1_83 = arith.constant 1 : index
    %c0_84 = arith.constant 0 : index
    %c0_85 = arith.constant 0 : index
    %75 = vector.load %arg13[%c1_83, %c0_84, %c0_85] : memref<3x128x128xf32, #tpu.memory_space<vmem>>, vector<1x128x128xf32>
    %76 = vector.shape_cast %75 : vector<1x128x128xf32> to vector<128x128xf32>
    %cst_86 = arith.constant dense<0.000000e+00> : vector<4x128xf32>
    %77 = tpu.matmul %74, %76, %cst_86 {dimension_numbers = #tpu.dot_dimension_numbers<[1], [0], [0], [1], [0, 0, 1, 1], [], []>} : vector<4x128xf32>, vector<128x128xf32>, vector<4x128xf32> -> vector<4x128xf32>
    %78 = arith.addf %71, %77 : vector<4x128xf32>
    %c2_87 = arith.constant 2 : index
    %c0_88 = arith.constant 0 : index
    %c0_89 = arith.constant 0 : index
    %79 = vector.load %arg12[%c2_87, %c0_88, %c0_89] : memref<3x4x8xf32, #tpu.memory_space<vmem>>, vector<1x4x8xf32>
    %80 = vector.shape_cast %79 : vector<1x4x8xf32> to vector<4x8xf32>
    %cst_90 = arith.constant dense<0.000000e+00> : vector<4x128xf32>
    %81 = tpu.matmul %80, %58, %cst_90 {dimension_numbers = #tpu.dot_dimension_numbers<[1], [0], [0], [1], [0, 0, 1, 1], [], []>} : vector<4x8xf32>, vector<8x128xf32>, vector<4x128xf32> -> vector<4x128xf32>
    %c2_91 = arith.constant 2 : index
    %c0_92 = arith.constant 0 : index
    %c0_93 = arith.constant 0 : index
    %82 = vector.load %arg13[%c2_91, %c0_92, %c0_93] : memref<3x128x128xf32, #tpu.memory_space<vmem>>, vector<1x128x128xf32>
    %83 = vector.shape_cast %82 : vector<1x128x128xf32> to vector<128x128xf32>
    %cst_94 = arith.constant dense<0.000000e+00> : vector<4x128xf32>
    %84 = tpu.matmul %81, %83, %cst_94 {dimension_numbers = #tpu.dot_dimension_numbers<[1], [0], [0], [1], [0, 0, 1, 1], [], []>} : vector<4x128xf32>, vector<128x128xf32>, vector<4x128xf32> -> vector<4x128xf32>
    %85 = arith.addf %78, %84 : vector<4x128xf32>
    %c0_95 = arith.constant 0 : index
    %c0_96 = arith.constant 0 : index
    %86 = vector.load %arg14[%c0_95, %c0_96] : memref<1x128xf32, #tpu.memory_space<vmem>>, vector<1x128xf32>
    %87 = vector.broadcast %86 : vector<1x128xf32> to vector<4x128xf32>
    %88 = arith.addf %85, %87 : vector<4x128xf32>
    %cst_97 = arith.constant 0.000000e+00 : f32
    %89 = vector.broadcast %cst_97 : f32 to vector<4x128xf32>
    %90 = arith.maximumf %88, %89 : vector<4x128xf32>
    %c0_98 = arith.constant 0 : index
    %c0_99 = arith.constant 0 : index
    %91 = vector.load %arg15[%c0_98, %c0_99] : memref<2x4xf32, #tpu.memory_space<vmem>>, vector<2x4xf32>
    %cst_100 = arith.constant dense<0.000000e+00> : vector<2x128xf32>
    %92 = tpu.matmul %91, %90, %cst_100 {dimension_numbers = #tpu.dot_dimension_numbers<[1], [0], [0], [1], [0, 0, 1, 1], [], []>} : vector<2x4xf32>, vector<4x128xf32>, vector<2x128xf32> -> vector<2x128xf32>
    %c0_101 = arith.constant 0 : index
    %c0_102 = arith.constant 0 : index
    %93 = vector.load %arg16[%c0_101, %c0_102] : memref<128x64xf32, #tpu.memory_space<vmem>>, vector<128x64xf32>
    %cst_103 = arith.constant dense<0.000000e+00> : vector<2x64xf32>
    %94 = tpu.matmul %92, %93, %cst_103 {dimension_numbers = #tpu.dot_dimension_numbers<[1], [0], [0], [1], [0, 0, 1, 1], [], []>} : vector<2x128xf32>, vector<128x64xf32>, vector<2x64xf32> -> vector<2x64xf32>
    %c0_104 = arith.constant 0 : index
    %c0_105 = arith.constant 0 : index
    %c0_106 = arith.constant 0 : index
    %95 = vector.load %arg32[%c0_104, %c0_105, %c0_106] : memref<1x2x64xf32, #tpu.memory_space<vmem>>, vector<1x2x64xf32>
    %96 = vector.shape_cast %95 : vector<1x2x64xf32> to vector<2x64xf32>
    %97 = vector.shape_cast %94 : vector<2x64xf32> to vector<1x2x64xf32>
    tpu.vector_store %arg32[%c0_104, %c0_105, %c0_106], %97 {strides = array<i32>} : memref<1x2x64xf32, #tpu.memory_space<vmem>>, vector<1x2x64xf32>,
    %c0_107 = arith.constant 0 : index
    %c0_108 = arith.constant 0 : index
    %c0_109 = arith.constant 0 : index
    %98 = vector.load %arg17[%c0_107, %c0_108, %c0_109] : memref<3x4x4xf32, #tpu.memory_space<vmem>>, vector<1x4x4xf32>
    %99 = vector.shape_cast %98 : vector<1x4x4xf32> to vector<4x4xf32>
    %cst_110 = arith.constant dense<0.000000e+00> : vector<4x128xf32>
    %100 = tpu.matmul %99, %90, %cst_110 {dimension_numbers = #tpu.dot_dimension_numbers<[1], [0], [0], [1], [0, 0, 1, 1], [], []>} : vector<4x4xf32>, vector<4x128xf32>, vector<4x128xf32> -> vector<4x128xf32>
    %c0_111 = arith.constant 0 : index
    %c0_112 = arith.constant 0 : index
    %c0_113 = arith.constant 0 : index
    %101 = vector.load %arg18[%c0_111, %c0_112, %c0_113] : memref<3x128x64xf32, #tpu.memory_space<vmem>>, vector<1x128x64xf32>
    %102 = vector.shape_cast %101 : vector<1x128x64xf32> to vector<128x64xf32>
    %cst_114 = arith.constant dense<0.000000e+00> : vector<4x64xf32>
    %103 = tpu.matmul %100, %102, %cst_114 {dimension_numbers = #tpu.dot_dimension_numbers<[1], [0], [0], [1], [0, 0, 1, 1], [], []>} : vector<4x128xf32>, vector<128x64xf32>, vector<4x64xf32> -> vector<4x64xf32>
    %c1_115 = arith.constant 1 : index
    %c0_116 = arith.constant 0 : index
    %c0_117 = arith.constant 0 : index
    %104 = vector.load %arg17[%c1_115, %c0_116, %c0_117] : memref<3x4x4xf32, #tpu.memory_space<vmem>>, vector<1x4x4xf32>
    %105 = vector.shape_cast %104 : vector<1x4x4xf32> to vector<4x4xf32>
    %cst_118 = arith.constant dense<0.000000e+00> : vector<4x128xf32>
    %106 = tpu.matmul %105, %90, %cst_118 {dimension_numbers = #tpu.dot_dimension_numbers<[1], [0], [0], [1], [0, 0, 1, 1], [], []>} : vector<4x4xf32>, vector<4x128xf32>, vector<4x128xf32> -> vector<4x128xf32>
    %c1_119 = arith.constant 1 : index
    %c0_120 = arith.constant 0 : index
    %c0_121 = arith.constant 0 : index
    %107 = vector.load %arg18[%c1_119, %c0_120, %c0_121] : memref<3x128x64xf32, #tpu.memory_space<vmem>>, vector<1x128x64xf32>
    %108 = vector.shape_cast %107 : vector<1x128x64xf32> to vector<128x64xf32>
    %cst_122 = arith.constant dense<0.000000e+00> : vector<4x64xf32>
    %109 = tpu.matmul %106, %108, %cst_122 {dimension_numbers = #tpu.dot_dimension_numbers<[1], [0], [0], [1], [0, 0, 1, 1], [], []>} : vector<4x128xf32>, vector<128x64xf32>, vector<4x64xf32> -> vector<4x64xf32>
    %110 = arith.addf %103, %109 : vector<4x64xf32>
    %c2_123 = arith.constant 2 : index
    %c0_124 = arith.constant 0 : index
    %c0_125 = arith.constant 0 : index
    %111 = vector.load %arg17[%c2_123, %c0_124, %c0_125] : memref<3x4x4xf32, #tpu.memory_space<vmem>>, vector<1x4x4xf32>
    %112 = vector.shape_cast %111 : vector<1x4x4xf32> to vector<4x4xf32>
    %cst_126 = arith.constant dense<0.000000e+00> : vector<4x128xf32>
    %113 = tpu.matmul %112, %90, %cst_126 {dimension_numbers = #tpu.dot_dimension_numbers<[1], [0], [0], [1], [0, 0, 1, 1], [], []>} : vector<4x4xf32>, vector<4x128xf32>, vector<4x128xf32> -> vector<4x128xf32>
    %c2_127 = arith.constant 2 : index
    %c0_128 = arith.constant 0 : index
    %c0_129 = arith.constant 0 : index
    %114 = vector.load %arg18[%c2_127, %c0_128, %c0_129] : memref<3x128x64xf32, #tpu.memory_space<vmem>>, vector<1x128x64xf32>
    %115 = vector.shape_cast %114 : vector<1x128x64xf32> to vector<128x64xf32>
    %cst_130 = arith.constant dense<0.000000e+00> : vector<4x64xf32>
    %116 = tpu.matmul %113, %115, %cst_130 {dimension_numbers = #tpu.dot_dimension_numbers<[1], [0], [0], [1], [0, 0, 1, 1], [], []>} : vector<4x128xf32>, vector<128x64xf32>, vector<4x64xf32> -> vector<4x64xf32>
    %117 = arith.addf %110, %116 : vector<4x64xf32>
    %c0_131 = arith.constant 0 : index
    %c0_132 = arith.constant 0 : index
    %118 = vector.load %arg19[%c0_131, %c0_132] : memref<1x64xf32, #tpu.memory_space<vmem>>, vector<1x64xf32>
    %119 = vector.broadcast %118 : vector<1x64xf32> to vector<4x64xf32>
    %120 = arith.addf %117, %119 : vector<4x64xf32>
    %cst_133 = arith.constant 0.000000e+00 : f32
    %121 = vector.broadcast %cst_133 : f32 to vector<4x64xf32>
    %122 = arith.maximumf %120, %121 : vector<4x64xf32>
    %c0_134 = arith.constant 0 : index
    %c0_135 = arith.constant 0 : index
    %c0_136 = arith.constant 0 : index
    %123 = vector.load %arg20[%c0_134, %c0_135, %c0_136] : memref<3x8x4xf32, #tpu.memory_space<vmem>>, vector<1x8x4xf32>
    %124 = vector.shape_cast %123 : vector<1x8x4xf32> to vector<8x4xf32>
    %cst_137 = arith.constant dense<0.000000e+00> : vector<8x64xf32>
    %125 = tpu.matmul %124, %122, %cst_137 {dimension_numbers = #tpu.dot_dimension_numbers<[1], [0], [0], [1], [0, 0, 1, 1], [], []>} : vector<8x4xf32>, vector<4x64xf32>, vector<8x64xf32> -> vector<8x64xf32>
    %c0_138 = arith.constant 0 : index
    %c0_139 = arith.constant 0 : index
    %c0_140 = arith.constant 0 : index
    %126 = vector.load %arg21[%c0_138, %c0_139, %c0_140] : memref<3x64x64xf32, #tpu.memory_space<vmem>>, vector<1x64x64xf32>
    %127 = vector.shape_cast %126 : vector<1x64x64xf32> to vector<64x64xf32>
    %cst_141 = arith.constant dense<0.000000e+00> : vector<8x64xf32>
    %128 = tpu.matmul %125, %127, %cst_141 {dimension_numbers = #tpu.dot_dimension_numbers<[1], [0], [0], [1], [0, 0, 1, 1], [], []>} : vector<8x64xf32>, vector<64x64xf32>, vector<8x64xf32> -> vector<8x64xf32>
    %c1_142 = arith.constant 1 : index
    %c0_143 = arith.constant 0 : index
    %c0_144 = arith.constant 0 : index
    %129 = vector.load %arg20[%c1_142, %c0_143, %c0_144] : memref<3x8x4xf32, #tpu.memory_space<vmem>>, vector<1x8x4xf32>
    %130 = vector.shape_cast %129 : vector<1x8x4xf32> to vector<8x4xf32>
    %cst_145 = arith.constant dense<0.000000e+00> : vector<8x64xf32>
    %131 = tpu.matmul %130, %122, %cst_145 {dimension_numbers = #tpu.dot_dimension_numbers<[1], [0], [0], [1], [0, 0, 1, 1], [], []>} : vector<8x4xf32>, vector<4x64xf32>, vector<8x64xf32> -> vector<8x64xf32>
    %c1_146 = arith.constant 1 : index
    %c0_147 = arith.constant 0 : index
    %c0_148 = arith.constant 0 : index
    %132 = vector.load %arg21[%c1_146, %c0_147, %c0_148] : memref<3x64x64xf32, #tpu.memory_space<vmem>>, vector<1x64x64xf32>
    %133 = vector.shape_cast %132 : vector<1x64x64xf32> to vector<64x64xf32>
    %cst_149 = arith.constant dense<0.000000e+00> : vector<8x64xf32>
    %134 = tpu.matmul %131, %133, %cst_149 {dimension_numbers = #tpu.dot_dimension_numbers<[1], [0], [0], [1], [0, 0, 1, 1], [], []>} : vector<8x64xf32>, vector<64x64xf32>, vector<8x64xf32> -> vector<8x64xf32>
    %135 = arith.addf %128, %134 : vector<8x64xf32>
    %c2_150 = arith.constant 2 : index
    %c0_151 = arith.constant 0 : index
    %c0_152 = arith.constant 0 : index
    %136 = vector.load %arg20[%c2_150, %c0_151, %c0_152] : memref<3x8x4xf32, #tpu.memory_space<vmem>>, vector<1x8x4xf32>
    %137 = vector.shape_cast %136 : vector<1x8x4xf32> to vector<8x4xf32>
    %cst_153 = arith.constant dense<0.000000e+00> : vector<8x64xf32>
    %138 = tpu.matmul %137, %122, %cst_153 {dimension_numbers = #tpu.dot_dimension_numbers<[1], [0], [0], [1], [0, 0, 1, 1], [], []>} : vector<8x4xf32>, vector<4x64xf32>, vector<8x64xf32> -> vector<8x64xf32>
    %c2_154 = arith.constant 2 : index
    %c0_155 = arith.constant 0 : index
    %c0_156 = arith.constant 0 : index
    %139 = vector.load %arg21[%c2_154, %c0_155, %c0_156] : memref<3x64x64xf32, #tpu.memory_space<vmem>>, vector<1x64x64xf32>
    %140 = vector.shape_cast %139 : vector<1x64x64xf32> to vector<64x64xf32>
    %cst_157 = arith.constant dense<0.000000e+00> : vector<8x64xf32>
    %141 = tpu.matmul %138, %140, %cst_157 {dimension_numbers = #tpu.dot_dimension_numbers<[1], [0], [0], [1], [0, 0, 1, 1], [], []>} : vector<8x64xf32>, vector<64x64xf32>, vector<8x64xf32> -> vector<8x64xf32>
    %142 = arith.addf %135, %141 : vector<8x64xf32>
    %c0_158 = arith.constant 0 : index
    %c0_159 = arith.constant 0 : index
    %c0_160 = arith.constant 0 : index
    %143 = vector.load %arg22[%c0_158, %c0_159, %c0_160] : memref<3x8x8xf32, #tpu.memory_space<vmem>>, vector<1x8x8xf32>
    %144 = vector.shape_cast %143 : vector<1x8x8xf32> to vector<8x8xf32>
    %cst_161 = arith.constant dense<0.000000e+00> : vector<8x128xf32>
    %145 = tpu.matmul %144, %58, %cst_161 {dimension_numbers = #tpu.dot_dimension_numbers<[1], [0], [0], [1], [0, 0, 1, 1], [], []>} : vector<8x8xf32>, vector<8x128xf32>, vector<8x128xf32> -> vector<8x128xf32>
    %c0_162 = arith.constant 0 : index
    %c0_163 = arith.constant 0 : index
    %c0_164 = arith.constant 0 : index
    %146 = vector.load %arg23[%c0_162, %c0_163, %c0_164] : memref<3x128x64xf32, #tpu.memory_space<vmem>>, vector<1x128x64xf32>
    %147 = vector.shape_cast %146 : vector<1x128x64xf32> to vector<128x64xf32>
    %cst_165 = arith.constant dense<0.000000e+00> : vector<8x64xf32>
    %148 = tpu.matmul %145, %147, %cst_165 {dimension_numbers = #tpu.dot_dimension_numbers<[1], [0], [0], [1], [0, 0, 1, 1], [], []>} : vector<8x128xf32>, vector<128x64xf32>, vector<8x64xf32> -> vector<8x64xf32>
    %149 = arith.addf %142, %148 : vector<8x64xf32>
    %c1_166 = arith.constant 1 : index
    %c0_167 = arith.constant 0 : index
    %c0_168 = arith.constant 0 : index
    %150 = vector.load %arg22[%c1_166, %c0_167, %c0_168] : memref<3x8x8xf32, #tpu.memory_space<vmem>>, vector<1x8x8xf32>
    %151 = vector.shape_cast %150 : vector<1x8x8xf32> to vector<8x8xf32>
    %cst_169 = arith.constant dense<0.000000e+00> : vector<8x128xf32>
    %152 = tpu.matmul %151, %58, %cst_169 {dimension_numbers = #tpu.dot_dimension_numbers<[1], [0], [0], [1], [0, 0, 1, 1], [], []>} : vector<8x8xf32>, vector<8x128xf32>, vector<8x128xf32> -> vector<8x128xf32>
    %c1_170 = arith.constant 1 : index
    %c0_171 = arith.constant 0 : index
    %c0_172 = arith.constant 0 : index
    %153 = vector.load %arg23[%c1_170, %c0_171, %c0_172] : memref<3x128x64xf32, #tpu.memory_space<vmem>>, vector<1x128x64xf32>
    %154 = vector.shape_cast %153 : vector<1x128x64xf32> to vector<128x64xf32>
    %cst_173 = arith.constant dense<0.000000e+00> : vector<8x64xf32>
    %155 = tpu.matmul %152, %154, %cst_173 {dimension_numbers = #tpu.dot_dimension_numbers<[1], [0], [0], [1], [0, 0, 1, 1], [], []>} : vector<8x128xf32>, vector<128x64xf32>, vector<8x64xf32> -> vector<8x64xf32>
    %156 = arith.addf %149, %155 : vector<8x64xf32>
    %c2_174 = arith.constant 2 : index
    %c0_175 = arith.constant 0 : index
    %c0_176 = arith.constant 0 : index
    %157 = vector.load %arg22[%c2_174, %c0_175, %c0_176] : memref<3x8x8xf32, #tpu.memory_space<vmem>>, vector<1x8x8xf32>
    %158 = vector.shape_cast %157 : vector<1x8x8xf32> to vector<8x8xf32>
    %cst_177 = arith.constant dense<0.000000e+00> : vector<8x128xf32>
    %159 = tpu.matmul %158, %58, %cst_177 {dimension_numbers = #tpu.dot_dimension_numbers<[1], [0], [0], [1], [0, 0, 1, 1], [], []>} : vector<8x8xf32>, vector<8x128xf32>, vector<8x128xf32> -> vector<8x128xf32>
    %c2_178 = arith.constant 2 : index
    %c0_179 = arith.constant 0 : index
    %c0_180 = arith.constant 0 : index
    %160 = vector.load %arg23[%c2_178, %c0_179, %c0_180] : memref<3x128x64xf32, #tpu.memory_space<vmem>>, vector<1x128x64xf32>
    %161 = vector.shape_cast %160 : vector<1x128x64xf32> to vector<128x64xf32>
    %cst_181 = arith.constant dense<0.000000e+00> : vector<8x64xf32>
    %162 = tpu.matmul %159, %161, %cst_181 {dimension_numbers = #tpu.dot_dimension_numbers<[1], [0], [0], [1], [0, 0, 1, 1], [], []>} : vector<8x128xf32>, vector<128x64xf32>, vector<8x64xf32> -> vector<8x64xf32>
    %163 = arith.addf %156, %162 : vector<8x64xf32>
    %c0_182 = arith.constant 0 : index
    %c0_183 = arith.constant 0 : index
    %164 = vector.load %arg24[%c0_182, %c0_183] : memref<1x64xf32, #tpu.memory_space<vmem>>, vector<1x64xf32>
    %165 = vector.broadcast %164 : vector<1x64xf32> to vector<8x64xf32>
    %166 = arith.addf %163, %165 : vector<8x64xf32>
    %cst_184 = arith.constant 0.000000e+00 : f32
    %167 = vector.broadcast %cst_184 : f32 to vector<8x64xf32>
    %168 = arith.maximumf %166, %167 : vector<8x64xf32>
    %c0_185 = arith.constant 0 : index
    %c0_186 = arith.constant 0 : index
    %c0_187 = arith.constant 0 : index
    %169 = vector.load %arg25[%c0_185, %c0_186, %c0_187] : memref<3x16x8xf32, #tpu.memory_space<vmem>>, vector<1x16x8xf32>
    %170 = vector.shape_cast %169 : vector<1x16x8xf32> to vector<16x8xf32>
    %cst_188 = arith.constant dense<0.000000e+00> : vector<16x64xf32>
    %171 = tpu.matmul %170, %168, %cst_188 {dimension_numbers = #tpu.dot_dimension_numbers<[1], [0], [0], [1], [0, 0, 1, 1], [], []>} : vector<16x8xf32>, vector<8x64xf32>, vector<16x64xf32> -> vector<16x64xf32>
    %c0_189 = arith.constant 0 : index
    %c0_190 = arith.constant 0 : index
    %c0_191 = arith.constant 0 : index
    %172 = vector.load %arg26[%c0_189, %c0_190, %c0_191] : memref<3x64x64xf32, #tpu.memory_space<vmem>>, vector<1x64x64xf32>
    %173 = vector.shape_cast %172 : vector<1x64x64xf32> to vector<64x64xf32>
    %cst_192 = arith.constant dense<0.000000e+00> : vector<16x64xf32>
    %174 = tpu.matmul %171, %173, %cst_192 {dimension_numbers = #tpu.dot_dimension_numbers<[1], [0], [0], [1], [0, 0, 1, 1], [], []>} : vector<16x64xf32>, vector<64x64xf32>, vector<16x64xf32> -> vector<16x64xf32>
    %c1_193 = arith.constant 1 : index
    %c0_194 = arith.constant 0 : index
    %c0_195 = arith.constant 0 : index
    %175 = vector.load %arg25[%c1_193, %c0_194, %c0_195] : memref<3x16x8xf32, #tpu.memory_space<vmem>>, vector<1x16x8xf32>
    %176 = vector.shape_cast %175 : vector<1x16x8xf32> to vector<16x8xf32>
    %cst_196 = arith.constant dense<0.000000e+00> : vector<16x64xf32>
    %177 = tpu.matmul %176, %168, %cst_196 {dimension_numbers = #tpu.dot_dimension_numbers<[1], [0], [0], [1], [0, 0, 1, 1], [], []>} : vector<16x8xf32>, vector<8x64xf32>, vector<16x64xf32> -> vector<16x64xf32>
    %c1_197 = arith.constant 1 : index
    %c0_198 = arith.constant 0 : index
    %c0_199 = arith.constant 0 : index
    %178 = vector.load %arg26[%c1_197, %c0_198, %c0_199] : memref<3x64x64xf32, #tpu.memory_space<vmem>>, vector<1x64x64xf32>
    %179 = vector.shape_cast %178 : vector<1x64x64xf32> to vector<64x64xf32>
    %cst_200 = arith.constant dense<0.000000e+00> : vector<16x64xf32>
    %180 = tpu.matmul %177, %179, %cst_200 {dimension_numbers = #tpu.dot_dimension_numbers<[1], [0], [0], [1], [0, 0, 1, 1], [], []>} : vector<16x64xf32>, vector<64x64xf32>, vector<16x64xf32> -> vector<16x64xf32>
    %181 = arith.addf %174, %180 : vector<16x64xf32>
    %c2_201 = arith.constant 2 : index
    %c0_202 = arith.constant 0 : index
    %c0_203 = arith.constant 0 : index
    %182 = vector.load %arg25[%c2_201, %c0_202, %c0_203] : memref<3x16x8xf32, #tpu.memory_space<vmem>>, vector<1x16x8xf32>
    %183 = vector.shape_cast %182 : vector<1x16x8xf32> to vector<16x8xf32>
    %cst_204 = arith.constant dense<0.000000e+00> : vector<16x64xf32>
    %184 = tpu.matmul %183, %168, %cst_204 {dimension_numbers = #tpu.dot_dimension_numbers<[1], [0], [0], [1], [0, 0, 1, 1], [], []>} : vector<16x8xf32>, vector<8x64xf32>, vector<16x64xf32> -> vector<16x64xf32>
    %c2_205 = arith.constant 2 : index
    %c0_206 = arith.constant 0 : index
    %c0_207 = arith.constant 0 : index
    %185 = vector.load %arg26[%c2_205, %c0_206, %c0_207] : memref<3x64x64xf32, #tpu.memory_space<vmem>>, vector<1x64x64xf32>
    %186 = vector.shape_cast %185 : vector<1x64x64xf32> to vector<64x64xf32>
    %cst_208 = arith.constant dense<0.000000e+00> : vector<16x64xf32>
    %187 = tpu.matmul %184, %186, %cst_208 {dimension_numbers = #tpu.dot_dimension_numbers<[1], [0], [0], [1], [0, 0, 1, 1], [], []>} : vector<16x64xf32>, vector<64x64xf32>, vector<16x64xf32> -> vector<16x64xf32>
    %188 = arith.addf %181, %187 : vector<16x64xf32>
    %c0_209 = arith.constant 0 : index
    %c0_210 = arith.constant 0 : index
    %c0_211 = arith.constant 0 : index
    %189 = vector.load %arg27[%c0_209, %c0_210, %c0_211] : memref<3x16x16xf32, #tpu.memory_space<vmem>>, vector<1x16x16xf32>
    %190 = vector.shape_cast %189 : vector<1x16x16xf32> to vector<16x16xf32>
    %cst_212 = arith.constant dense<0.000000e+00> : vector<16x128xf32>
    %191 = tpu.matmul %190, %26, %cst_212 {dimension_numbers = #tpu.dot_dimension_numbers<[1], [0], [0], [1], [0, 0, 1, 1], [], []>} : vector<16x16xf32>, vector<16x128xf32>, vector<16x128xf32> -> vector<16x128xf32>
    %c0_213 = arith.constant 0 : index
    %c0_214 = arith.constant 0 : index
    %c0_215 = arith.constant 0 : index
    %192 = vector.load %arg28[%c0_213, %c0_214, %c0_215] : memref<3x128x64xf32, #tpu.memory_space<vmem>>, vector<1x128x64xf32>
    %193 = vector.shape_cast %192 : vector<1x128x64xf32> to vector<128x64xf32>
    %cst_216 = arith.constant dense<0.000000e+00> : vector<16x64xf32>
    %194 = tpu.matmul %191, %193, %cst_216 {dimension_numbers = #tpu.dot_dimension_numbers<[1], [0], [0], [1], [0, 0, 1, 1], [], []>} : vector<16x128xf32>, vector<128x64xf32>, vector<16x64xf32> -> vector<16x64xf32>
    %195 = arith.addf %188, %194 : vector<16x64xf32>
    %c1_217 = arith.constant 1 : index
    %c0_218 = arith.constant 0 : index
    %c0_219 = arith.constant 0 : index
    %196 = vector.load %arg27[%c1_217, %c0_218, %c0_219] : memref<3x16x16xf32, #tpu.memory_space<vmem>>, vector<1x16x16xf32>
    %197 = vector.shape_cast %196 : vector<1x16x16xf32> to vector<16x16xf32>
    %cst_220 = arith.constant dense<0.000000e+00> : vector<16x128xf32>
    %198 = tpu.matmul %197, %26, %cst_220 {dimension_numbers = #tpu.dot_dimension_numbers<[1], [0], [0], [1], [0, 0, 1, 1], [], []>} : vector<16x16xf32>, vector<16x128xf32>, vector<16x128xf32> -> vector<16x128xf32>
    %c1_221 = arith.constant 1 : index
    %c0_222 = arith.constant 0 : index
    %c0_223 = arith.constant 0 : index
    %199 = vector.load %arg28[%c1_221, %c0_222, %c0_223] : memref<3x128x64xf32, #tpu.memory_space<vmem>>, vector<1x128x64xf32>
    %200 = vector.shape_cast %199 : vector<1x128x64xf32> to vector<128x64xf32>
    %cst_224 = arith.constant dense<0.000000e+00> : vector<16x64xf32>
    %201 = tpu.matmul %198, %200, %cst_224 {dimension_numbers = #tpu.dot_dimension_numbers<[1], [0], [0], [1], [0, 0, 1, 1], [], []>} : vector<16x128xf32>, vector<128x64xf32>, vector<16x64xf32> -> vector<16x64xf32>
    %202 = arith.addf %195, %201 : vector<16x64xf32>
    %c2_225 = arith.constant 2 : index
    %c0_226 = arith.constant 0 : index
    %c0_227 = arith.constant 0 : index
    %203 = vector.load %arg27[%c2_225, %c0_226, %c0_227] : memref<3x16x16xf32, #tpu.memory_space<vmem>>, vector<1x16x16xf32>
    %204 = vector.shape_cast %203 : vector<1x16x16xf32> to vector<16x16xf32>
    %cst_228 = arith.constant dense<0.000000e+00> : vector<16x128xf32>
    %205 = tpu.matmul %204, %26, %cst_228 {dimension_numbers = #tpu.dot_dimension_numbers<[1], [0], [0], [1], [0, 0, 1, 1], [], []>} : vector<16x16xf32>, vector<16x128xf32>, vector<16x128xf32> -> vector<16x128xf32>
    %c2_229 = arith.constant 2 : index
    %c0_230 = arith.constant 0 : index
    %c0_231 = arith.constant 0 : index
    %206 = vector.load %arg28[%c2_229, %c0_230, %c0_231] : memref<3x128x64xf32, #tpu.memory_space<vmem>>, vector<1x128x64xf32>
    %207 = vector.shape_cast %206 : vector<1x128x64xf32> to vector<128x64xf32>
    %cst_232 = arith.constant dense<0.000000e+00> : vector<16x64xf32>
    %208 = tpu.matmul %205, %207, %cst_232 {dimension_numbers = #tpu.dot_dimension_numbers<[1], [0], [0], [1], [0, 0, 1, 1], [], []>} : vector<16x128xf32>, vector<128x64xf32>, vector<16x64xf32> -> vector<16x64xf32>
    %209 = arith.addf %202, %208 : vector<16x64xf32>
    %c0_233 = arith.constant 0 : index
    %c0_234 = arith.constant 0 : index
    %210 = vector.load %arg29[%c0_233, %c0_234] : memref<1x64xf32, #tpu.memory_space<vmem>>, vector<1x64xf32>
    %211 = vector.broadcast %210 : vector<1x64xf32> to vector<16x64xf32>
    %212 = arith.addf %209, %211 : vector<16x64xf32>
    %cst_235 = arith.constant 0.000000e+00 : f32
    %213 = vector.broadcast %cst_235 : f32 to vector<16x64xf32>
    %214 = arith.maximumf %212, %213 : vector<16x64xf32>
    %c0_236 = arith.constant 0 : index
    %c0_237 = arith.constant 0 : index
    %c0_238 = arith.constant 0 : index
    %215 = vector.load %arg33[%c0_236, %c0_237, %c0_238] : memref<1x16x64xf32, #tpu.memory_space<vmem>>, vector<1x16x64xf32>
    %216 = vector.shape_cast %215 : vector<1x16x64xf32> to vector<16x64xf32>
    %217 = vector.shape_cast %214 : vector<16x64xf32> to vector<1x16x64xf32>
    tpu.vector_store %arg33[%c0_236, %c0_237, %c0_238], %217 {strides = array<i32>} : memref<1x16x64xf32, #tpu.memory_space<vmem>>, vector<1x16x64xf32>,
    return
  }
  func.func @transform_0(%arg0: i32) -> (i32, i32, i32) {
    %c0_i32 = arith.constant 0 : i32
    %c0_i32_0 = arith.constant 0 : i32
    %c0_i32_1 = arith.constant 0 : i32
    return %arg0, %c0_i32, %c0_i32_0 : i32, i32, i32
  }
  func.func @transform_1(%arg0: i32) -> (i32, i32, i32) {
    %c0_i32 = arith.constant 0 : i32
    %c0_i32_0 = arith.constant 0 : i32
    %c0_i32_1 = arith.constant 0 : i32
    %c0_i32_2 = arith.constant 0 : i32
    return %c0_i32, %c0_i32_0, %c0_i32_1 : i32, i32, i32
  }
  func.func @transform_2(%arg0: i32) -> (i32, i32, i32) {
    %c0_i32 = arith.constant 0 : i32
    %c0_i32_0 = arith.constant 0 : i32
    %c0_i32_1 = arith.constant 0 : i32
    %c0_i32_2 = arith.constant 0 : i32
    return %c0_i32, %c0_i32_0, %c0_i32_1 : i32, i32, i32
  }
  func.func @transform_3(%arg0: i32) -> (i32, i32) {
    %c0_i32 = arith.constant 0 : i32
    %c0_i32_0 = arith.constant 0 : i32
    %c0_i32_1 = arith.constant 0 : i32
    return %c0_i32, %c0_i32_0 : i32, i32
  }
  func.func @transform_4(%arg0: i32) -> (i32, i32) {
    %c0_i32 = arith.constant 0 : i32
    %c0_i32_0 = arith.constant 0 : i32
    %c0_i32_1 = arith.constant 0 : i32
    return %c0_i32, %c0_i32_0 : i32, i32
  }
  func.func @transform_5(%arg0: i32) -> (i32, i32) {
    %c0_i32 = arith.constant 0 : i32
    %c0_i32_0 = arith.constant 0 : i32
    %c0_i32_1 = arith.constant 0 : i32
    return %c0_i32, %c0_i32_0 : i32, i32
  }
  func.func @transform_6(%arg0: i32) -> (i32, i32, i32) {
    %c0_i32 = arith.constant 0 : i32
    %c0_i32_0 = arith.constant 0 : i32
    %c0_i32_1 = arith.constant 0 : i32
    %c0_i32_2 = arith.constant 0 : i32
    return %c0_i32, %c0_i32_0, %c0_i32_1 : i32, i32, i32
  }
  func.func @transform_7(%arg0: i32) -> (i32, i32, i32) {
    %c0_i32 = arith.constant 0 : i32
    %c0_i32_0 = arith.constant 0 : i32
    %c0_i32_1 = arith.constant 0 : i32
    %c0_i32_2 = arith.constant 0 : i32
    return %c0_i32, %c0_i32_0, %c0_i32_1 : i32, i32, i32
  }
  func.func @transform_8(%arg0: i32) -> (i32, i32) {
    %c0_i32 = arith.constant 0 : i32
    %c0_i32_0 = arith.constant 0 : i32
    %c0_i32_1 = arith.constant 0 : i32
    return %c0_i32, %c0_i32_0 : i32, i32
  }
  func.func @transform_9(%arg0: i32) -> (i32, i32) {
    %c0_i32 = arith.constant 0 : i32
    %c0_i32_0 = arith.constant 0 : i32
    %c0_i32_1 = arith.constant 0 : i32
    return %c0_i32, %c0_i32_0 : i32, i32
  }
  func.func @transform_10(%arg0: i32) -> (i32, i32) {
    %c0_i32 = arith.constant 0 : i32
    %c0_i32_0 = arith.constant 0 : i32
    %c0_i32_1 = arith.constant 0 : i32
    return %c0_i32, %c0_i32_0 : i32, i32
  }
  func.func @transform_11(%arg0: i32) -> (i32, i32, i32) {
    %c0_i32 = arith.constant 0 : i32
    %c0_i32_0 = arith.constant 0 : i32
    %c0_i32_1 = arith.constant 0 : i32
    %c0_i32_2 = arith.constant 0 : i32
    return %c0_i32, %c0_i32_0, %c0_i32_1 : i32, i32, i32
  }
  func.func @transform_12(%arg0: i32) -> (i32, i32, i32) {
    %c0_i32 = arith.constant 0 : i32
    %c0_i32_0 = arith.constant 0 : i32
    %c0_i32_1 = arith.constant 0 : i32
    %c0_i32_2 = arith.constant 0 : i32
    return %c0_i32, %c0_i32_0, %c0_i32_1 : i32, i32, i32
  }
  func.func @transform_13(%arg0: i32) -> (i32, i32) {
    %c0_i32 = arith.constant 0 : i32
    %c0_i32_0 = arith.constant 0 : i32
    %c0_i32_1 = arith.constant 0 : i32
    return %c0_i32, %c0_i32_0 : i32, i32
  }
  func.func @transform_14(%arg0: i32) -> (i32, i32) {
    %c0_i32 = arith.constant 0 : i32
    %c0_i32_0 = arith.constant 0 : i32
    %c0_i32_1 = arith.constant 0 : i32
    return %c0_i32, %c0_i32_0 : i32, i32
  }
  func.func @transform_15(%arg0: i32) -> (i32, i32) {
    %c0_i32 = arith.constant 0 : i32
    %c0_i32_0 = arith.constant 0 : i32
    %c0_i32_1 = arith.constant 0 : i32
    return %c0_i32, %c0_i32_0 : i32, i32
  }
  func.func @transform_16(%arg0: i32) -> (i32, i32, i32) {
    %c0_i32 = arith.constant 0 : i32
    %c0_i32_0 = arith.constant 0 : i32
    %c0_i32_1 = arith.constant 0 : i32
    %c0_i32_2 = arith.constant 0 : i32
    return %c0_i32, %c0_i32_0, %c0_i32_1 : i32, i32, i32
  }
  func.func @transform_17(%arg0: i32) -> (i32, i32, i32) {
    %c0_i32 = arith.constant 0 : i32
    %c0_i32_0 = arith.constant 0 : i32
    %c0_i32_1 = arith.constant 0 : i32
    %c0_i32_2 = arith.constant 0 : i32
    return %c0_i32, %c0_i32_0, %c0_i32_1 : i32, i32, i32
  }
  func.func @transform_18(%arg0: i32) -> (i32, i32) {
    %c0_i32 = arith.constant 0 : i32
    %c0_i32_0 = arith.constant 0 : i32
    %c0_i32_1 = arith.constant 0 : i32
    return %c0_i32, %c0_i32_0 : i32, i32
  }
  func.func @transform_19(%arg0: i32) -> (i32, i32, i32) {
    %c0_i32 = arith.constant 0 : i32
    %c0_i32_0 = arith.constant 0 : i32
    %c0_i32_1 = arith.constant 0 : i32
    %c0_i32_2 = arith.constant 0 : i32
    return %c0_i32, %c0_i32_0, %c0_i32_1 : i32, i32, i32
  }
  func.func @transform_20(%arg0: i32) -> (i32, i32, i32) {
    %c0_i32 = arith.constant 0 : i32
    %c0_i32_0 = arith.constant 0 : i32
    %c0_i32_1 = arith.constant 0 : i32
    %c0_i32_2 = arith.constant 0 : i32
    return %c0_i32, %c0_i32_0, %c0_i32_1 : i32, i32, i32
  }
  func.func @transform_21(%arg0: i32) -> (i32, i32, i32) {
    %c0_i32 = arith.constant 0 : i32
    %c0_i32_0 = arith.constant 0 : i32
    %c0_i32_1 = arith.constant 0 : i32
    %c0_i32_2 = arith.constant 0 : i32
    return %c0_i32, %c0_i32_0, %c0_i32_1 : i32, i32, i32
  }
  func.func @transform_22(%arg0: i32) -> (i32, i32, i32) {
    %c0_i32 = arith.constant 0 : i32
    %c0_i32_0 = arith.constant 0 : i32
    %c0_i32_1 = arith.constant 0 : i32
    %c0_i32_2 = arith.constant 0 : i32
    return %c0_i32, %c0_i32_0, %c0_i32_1 : i32, i32, i32
  }
  func.func @transform_23(%arg0: i32) -> (i32, i32) {
    %c0_i32 = arith.constant 0 : i32
    %c0_i32_0 = arith.constant 0 : i32
    %c0_i32_1 = arith.constant 0 : i32
    return %c0_i32, %c0_i32_0 : i32, i32
  }
  func.func @transform_24(%arg0: i32) -> (i32, i32, i32) {
    %c0_i32 = arith.constant 0 : i32
    %c0_i32_0 = arith.constant 0 : i32
    %c0_i32_1 = arith.constant 0 : i32
    %c0_i32_2 = arith.constant 0 : i32
    return %c0_i32, %c0_i32_0, %c0_i32_1 : i32, i32, i32
  }
  func.func @transform_25(%arg0: i32) -> (i32, i32, i32) {
    %c0_i32 = arith.constant 0 : i32
    %c0_i32_0 = arith.constant 0 : i32
    %c0_i32_1 = arith.constant 0 : i32
    %c0_i32_2 = arith.constant 0 : i32
    return %c0_i32, %c0_i32_0, %c0_i32_1 : i32, i32, i32
  }
  func.func @transform_26(%arg0: i32) -> (i32, i32, i32) {
    %c0_i32 = arith.constant 0 : i32
    %c0_i32_0 = arith.constant 0 : i32
    %c0_i32_1 = arith.constant 0 : i32
    %c0_i32_2 = arith.constant 0 : i32
    return %c0_i32, %c0_i32_0, %c0_i32_1 : i32, i32, i32
  }
  func.func @transform_27(%arg0: i32) -> (i32, i32, i32) {
    %c0_i32 = arith.constant 0 : i32
    %c0_i32_0 = arith.constant 0 : i32
    %c0_i32_1 = arith.constant 0 : i32
    %c0_i32_2 = arith.constant 0 : i32
    return %c0_i32, %c0_i32_0, %c0_i32_1 : i32, i32, i32
  }
  func.func @transform_28(%arg0: i32) -> (i32, i32) {
    %c0_i32 = arith.constant 0 : i32
    %c0_i32_0 = arith.constant 0 : i32
    %c0_i32_1 = arith.constant 0 : i32
    return %c0_i32, %c0_i32_0 : i32, i32
  }
  func.func @transform_29(%arg0: i32) -> (i32, i32, i32) {
    %c0_i32 = arith.constant 0 : i32
    %c0_i32_0 = arith.constant 0 : i32
    %c0_i32_1 = arith.constant 0 : i32
    return %arg0, %c0_i32, %c0_i32_0 : i32, i32, i32
  }
  func.func @transform_30(%arg0: i32) -> (i32, i32, i32) {
    %c0_i32 = arith.constant 0 : i32
    %c0_i32_0 = arith.constant 0 : i32
    %c0_i32_1 = arith.constant 0 : i32
    return %arg0, %c0_i32, %c0_i32_0 : i32, i32, i32
  }
  func.func @transform_31(%arg0: i32) -> (i32, i32, i32) {
    %c0_i32 = arith.constant 0 : i32
    %c0_i32_0 = arith.constant 0 : i32
    %c0_i32_1 = arith.constant 0 : i32
    return %arg0, %c0_i32, %c0_i32_0 : i32, i32, i32
  }
  func.func @transform_32(%arg0: i32) -> (i32, i32, i32) {
    %c0_i32 = arith.constant 0 : i32
    %c0_i32_0 = arith.constant 0 : i32
    %c0_i32_1 = arith.constant 0 : i32
    return %arg0, %c0_i32, %c0_i32_0 : i32, i32, i32
  }
}

</mosaic_0001>

<bundles_post_ra>
// kernel: tpu_custom_call.1
= control target key start
LH: loop header
LB: loop body
LE: loop exit
PB: predicated region body
PF: predicated region fallthrough
CT: control target
= control target key end

     0   :  { %s8441_s6 = smov 1   ;;  %s8442_s10 = smov 2   ;;  %s9560_s0 = inlined_call_operand.smem [shape: u32[33], index: -1, kind: input, shape index: {}] }
   0x1   :  { %s8490_s5 = sld [smem:[%s9560_s0]]   ;;  %s8443_s14 = smov 3  }
   0x2   :  { %s8495_s9 = sld [smem:[%s9560_s0 + %s8441_s6]]   ;;  %s8444_s18 = smov 4  }
   0x3   :  { %s8500_s13 = sld [smem:[%s9560_s0 + %s8442_s10]]   ;;  %s8445_s22 = smov 5  }
   0x4   :  { %s8505_s17 = sld [smem:[%s9560_s0 + %s8443_s14]]   ;;  %s8446_s26 = smov 6  }
   0x5   :  { %s8510_s21 = sld [smem:[%s9560_s0 + %s8444_s18]]   ;;  %s8447_s30 = smov 7  }
   0x6   :  { %s8515_s25 = sld [smem:[%s9560_s0 + %s8445_s22]]   ;;  %s8448_s4 = smov 8  }
   0x7   :  { %9588 = sst [smem:[#allocation12_spill]] %s8490_s5  ;;  %s8449_s10 = smov 9  }
   0x8   :  { %9589 = sst [smem:[#allocation13_spill]] %s8495_s9  ;;  %s8450_s15 = smov 10  }
   0x9   :  { %9590 = sst [smem:[#allocation14_spill]] %s8500_s13  ;;  %s8451_s20 = smov 11  }
   0xa   :  { %9591 = sst [smem:[#allocation15_spill]] %s8505_s17  ;;  %s8453_s1 = smov 13  }
   0xb   :  { %9592 = sst [smem:[#allocation16_spill]] %s8510_s21  ;;  %s8454_s7 = smov 14  }
   0xc   :  { %s8520_s29 = sld [smem:[%s9560_s0 + %s8446_s26]]   ;;  %s8452_s26 = smov 12  }
   0xd   :  { %s8525_s3 = sld [smem:[%s9560_s0 + %s8447_s30]]   ;;  %s8456_s22 = smov 16  }
   0xe   :  { %s8530_s8 = sld [smem:[%s9560_s0 + %s8448_s4]]   ;;  %s8457_s28 = smov 17  }
   0xf   :  { %s8535_s14 = sld [smem:[%s9560_s0 + %s8449_s10]]  }
  0x10   :  { %s8540_s19 = sld [smem:[%s9560_s0 + %s8450_s15]]   ;;  %s8455_s15 = smov 15  }
  0x11   :  { %s8545_s24 = sld [smem:[%s9560_s0 + %s8451_s20]]  }
  0x12   :  { %s8550_s30 = sld [smem:[%s9560_s0 + %s8452_s26]]  }
  0x13   :  { %9593 = sst [smem:[#allocation17_spill]] %s8525_s3 }
  0x14   :  { %9594 = sst [smem:[#allocation18_spill]] %s8530_s8 }
  0x15   :  { %9595 = sst [smem:[#allocation19_spill]] %s8535_s14 }
  0x16   :  { %9596 = sst [smem:[#allocation20_spill]] %s8540_s19 }
  0x17   :  { %s8555_s6 = sld [smem:[%s9560_s0 + %s8453_s1]]  }
  0x18   :  { %s8560_s12 = sld [smem:[%s9560_s0 + %s8454_s7]]   ;;  %s8458_s7 = smov 18  }
  0x19   :  { %s8565_s20 = sld [smem:[%s9560_s0 + %s8455_s15]]   ;;  %s8459_s15 = smov 19  }
  0x1a   :  { %s8570_s27 = sld [smem:[%s9560_s0 + %s8456_s22]]   ;;  %s8460_s22 = smov 20  }
  0x1b   :  { %s8575_s4 = sld [smem:[%s9560_s0 + %s8457_s28]]   ;;  %s8461_s28 = smov 21  }
  0x1d   :  { %9597 = sst [smem:[#allocation21_spill]] %s8555_s6 }
  0x1e   :  { %9598 = sst [smem:[#allocation22_spill]] %s8560_s12 }
  0x1f   :  { %9599 = sst [smem:[#allocation23_spill]] %s8565_s20 }
  0x20   :  { %9600 = sst [smem:[#allocation24_spill]] %s8570_s27 }
  0x21   :  { %9601 = sst [smem:[#allocation25_spill]] %s8575_s4 }
  0x22   :  { %s8580_s12 = sld [smem:[%s9560_s0 + %s8458_s7]]   ;;  %s8462_s7 = smov 22  }
  0x23   :  { %s8585_s20 = sld [smem:[%s9560_s0 + %s8459_s15]]   ;;  %s8463_s15 = smov 23  }
  0x24   :  { %s8590_s27 = sld [smem:[%s9560_s0 + %s8460_s22]]   ;;  %s8464_s22 = smov 24  }
  0x25   :  { %s8595_s4 = sld [smem:[%s9560_s0 + %s8461_s28]]   ;;  %s8465_s28 = smov 25  }
  0x28   :  { %9602 = sst [smem:[#allocation26_spill]] %s8580_s12 }
  0x29   :  { %9603 = sst [smem:[#allocation27_spill]] %s8585_s20 }
  0x2a   :  { %9604 = sst [smem:[#allocation28_spill]] %s8590_s27 }
  0x2b   :  { %9605 = sst [smem:[#allocation29_spill]] %s8595_s4 }
  0x2c   :  { %s8600_s12 = sld [smem:[%s9560_s0 + %s8462_s7]]   ;;  %s8466_s7 = smov 26  }
  0x2d   :  { %s8605_s20 = sld [smem:[%s9560_s0 + %s8463_s15]]   ;;  %s8467_s15 = smov 27  }
  0x2e   :  { %s8610_s27 = sld [smem:[%s9560_s0 + %s8464_s22]]   ;;  %s8468_s22 = smov 28  }
  0x2f   :  { %s8615_s4 = sld [smem:[%s9560_s0 + %s8465_s28]]   ;;  %s8469_s28 = smov 29  }
  0x32   :  { %9606 = sst [smem:[#allocation30_spill]] %s8600_s12 }
  0x33   :  { %9607 = sst [smem:[#allocation31_spill]] %s8605_s20 }
  0x34   :  { %9608 = sst [smem:[#allocation32_spill]] %s8610_s27 }
  0x35   :  { %9609 = sst [smem:[#allocation33_spill]] %s8615_s4 }
  0x36   :  { %s8620_s12 = sld [smem:[%s9560_s0 + %s8466_s7]]   ;;  %s8470_s7 = smov 30  }
  0x37   :  { %s8625_s20 = sld [smem:[%s9560_s0 + %s8467_s15]]   ;;  %s8471_s15 = smov 31  }
  0x38   :  { %s8630_s27 = sld [smem:[%s9560_s0 + %s8468_s22]]   ;;  %s8472_s22 = smov 32  }
  0x39   :  { %s8635_s4 = sld [smem:[%s9560_s0 + %s8469_s28]]  }
  0x3c   :  { %9610 = sst [smem:[#allocation34_spill]] %s8620_s12 }
  0x3d   :  { %9611 = sst [smem:[#allocation35_spill]] %s8625_s20 }
  0x3e   :  { %9612 = sst [smem:[#allocation36_spill]] %s8630_s27 }
  0x3f   :  { %s8640_s12 = sld [smem:[%s9560_s0 + %s8470_s7]]  }
  0x40   :  { %s8645_s20 = sld [smem:[%s9560_s0 + %s8471_s15]]  }
  0x41   :  { %s8650_s27 = sld [smem:[%s9560_s0 + %s8472_s22]]  }
  0x42   :  { %71 = vsyncpa [#allocation3], 0 }
  0x43   :  { %73 = vsyncpa [#allocation3 + $0x1], 0 }
  0x44   :  { %74 = vsyncpa [#allocation5], 0 }
  0x45   :  { %76 = vsyncpa [#allocation5 + $0x1], 0 }
  0x46   :  { %77 = vsyncpa [#allocation8], 0 }
  0x47   :  { %79 = vsyncpa [#allocation8 + $0x1], 0  ;;  %s8652_s28 = smov 0   ;;  %s8654_s1 = smov 0  }
  0x48   :  { %s8656_s2 = smov 0   ;;  %s8658_s7 = smov 0  }
  0x49 LB: > { %s9613_s19 = sld [smem:[#allocation20_spill]]  ;;  %s9614_s13 = sld [smem:[#allocation14_spill]]  ;;  %s8439_s7 = sphi %s8658_s7, %s9645_s7   ;;  %s8435_s2 = sphi %s8656_s2, %s9644_s2   ;;  %s8431_s1 = sphi %s8654_s1, %s9643_s1   ;;  %s8427_s28 = sphi %s8652_s28, %s9642_s28  }
  0x4a   : > { %s9615_s9 = sld [smem:[#allocation13_spill]]  ;;  %s9616_s3 = sld [smem:[#allocation17_spill]] }
  0x4b   : > { %s8673_s0 = sadd.s32 4294967295, %s8439_s7   ;;  %s9572_s10 = sadd.s32 4294967294, %s8439_s7  }
  0x4c   : > { %s8677_s11 = sadd.s32 1, %s8439_s7   ;;  %s706_s15 = sadd.s32 1, %s8435_s2 }
  0x4d   : > { %s703_s16 = ssub.s32 %s8439_s7, %s8677_s11  ;;  %p716_p0 = scmp.ne.s32.totalorder %s8435_s2, %s8431_s1 }
  0x4e   : > { %p704_p1 = scmp.eq.s32.totalorder %s703_s16, 0  ;;  %p717_p2 = scmp.eq.s32.totalorder %s8673_s0, 1 }
  0x4f   : > { %p722_p3 = scmp.ne.s32.totalorder %s8431_s1, %s8427_s28  ;;  %p723_p4 = scmp.eq.s32.totalorder %s9572_s10, 1 }
  0x50   : > { %s8690_s18 = scalar_select %p704_p1, %s8435_s2, %s706_s15  }
  0x51   : > { %p8692_p5 = por %p717_p2, %p716_p0  ;;  %p8696_p6 = por %p723_p4, %p722_p3 }
  0x52   : > { %p5817_p7 = scmp.ge.s32.totalorder %s8439_s7, 1  ;;  %p911_p8 = scmp.lt.s32.totalorder %s8439_s7, 3 }
  0x53   : > { %s9618_s23 = scalar_select %p8696_p6, 1, 0 }
  0x54   : > { %p912_p9 = pnand %p5817_p7, %p911_p8 }
  0x55   : > { %s9619_s5 = sld [smem:[#allocation12_spill]] (!%p912_p9)  ;;  %p1008_p10 = scmp.lt.s32.totalorder (!%p912_p9), %s8673_s0, 1  ;;  %v1015_v0 = vld [vmem:[%s9615_s9] sm:$0xff] (!%p912_p9)  ;;  %vm1017_vm0 = vcmask (!%p912_p9), 130048   ;;  %v5831_v6 = vld [vmem:[%s9614_s13 + $0x48] sm:$0xff] (!%p912_p9)  ;;  %v5826_v9 = vld [vmem:[%s9615_s9 + $0x10] sm:$0xff] (!%p912_p9) }
  0x56   : > { %915 = sbr.rel (%p912_p9) target bundleno = 4091 (0xffb), region = 136  ;;  %6604 = vmatprep.mubr.msk.f32.mxu0 (!%p912_p9), %vm1017_vm0, %v1015_v0  ;;  %v5842_v1 = vld [vmem:[%s9615_s9 + $0x20] sm:$0xff] (!%p912_p9)  ;;  %v1016_v7 = vld [vmem:[%s9615_s9 + $0x8] sm:$0xff] (!%p912_p9)  ;;  %v5832_v11 = vld [vmem:[%s9614_s13 + $0x50] sm:$0xff] (!%p912_p9)  ;;  %vm1200_vm1 = vcmask (!%p912_p9), 523264   ;;  %v8473_v51 = vmov (!%p912_p9), 0.0|0.0  }
  0x57   : > { %6656 = vmatprep.mubr.msk.f32.mxu1 (!%p912_p9), %vm1017_vm0, %v5842_v1  ;;  %v5830_v5 = vld [vmem:[%s9614_s13 + $0x40] sm:$0xff] (!%p912_p9)  ;;  %v5843_v8 = vld [vmem:[%s9615_s9 + $0x28] sm:$0xff] (!%p912_p9)  ;;  %v5833_v12 = vld [vmem:[%s9614_s13 + $0x58] sm:$0xff] (!%p912_p9)  ;;  %vm8474_vm2 = vmmov (!%p912_p9), 0   ;;  %v8475_v52 = vmov (!%p912_p9), 0.0   ;;  %s9620_s17 = sld [smem:[#allocation15_spill]] (!%p912_p9) }
  0x58   : > { %v7564_v10 = vpack.c.bf16 (!%p912_p9), %v5831_v6, %v5830_v5  ;;  %v5827_v13 = vld [vmem:[%s9615_s9 + $0x18] sm:$0xff] (!%p912_p9)  ;;  %v7568_v14 = vpack.c.bf16 (!%p912_p9), %v5833_v12, %v5832_v11  ;;  %v5834_v15 = vld [vmem:[%s9614_s13 + $0x60] sm:$0xff] (!%p912_p9)  ;;  %v5835_v16 = vld [vmem:[%s9614_s13 + $0x68] sm:$0xff] (!%p912_p9)  ;;  %s9621_s21 = sld [smem:[#allocation16_spill]] (!%p912_p9)  ;;  %s9622_s8 = sld [smem:[#allocation18_spill]] (!%p912_p9)  ;;  %vm2206_vm3 = vcmask (!%p912_p9), 64512  }
  0x59   : > { %v7572_v17 = vpack.c.bf16 (!%p912_p9), %v5835_v16, %v5834_v15  ;;  %v5836_v18 = vld [vmem:[%s9614_s13 + $0x70] sm:$0xff] (!%p912_p9)  ;;  %v5837_v19 = vld [vmem:[%s9614_s13 + $0x78] sm:$0xff] (!%p912_p9)  ;;  %v1099_v21 = vld [vmem:[%s9614_s13] sm:$0xff] (!%p912_p9)  ;;  %s9623_s14 = sld [smem:[#allocation19_spill]] (!%p912_p9)  ;;  %s9624_s6 = sld [smem:[#allocation21_spill]] (!%p912_p9)  ;;  %vm2366_vm4 = vcmask (!%p912_p9), 519168  }
  0x5a   : > { %v7576_v20 = vpack.c.bf16 (!%p912_p9), %v5837_v19, %v5836_v18  ;;  %v1100_v22 = vld [vmem:[%s9614_s13 + $0x8] sm:$0xff] (!%p912_p9)  ;;  %v1101_v28 = vld [vmem:[%s9614_s13 + $0x10] sm:$0xff] (!%p912_p9)  ;;  %v1102_v29 = vld [vmem:[%s9614_s13 + $0x18] sm:$0xff] (!%p912_p9)  ;;  %vm2867_vm5 = vcmask (!%p912_p9), 1043456   ;;  %vm2863_vm6 = vcmask (!%p912_p9), 31744   ;;  %vm3027_vm7 = vcmask (!%p912_p9), 517120  }
  0x5b   : > { %v7580_v23 = vpack.c.bf16 (!%p912_p9), %v1100_v22, %v1099_v21  ;;  %v7584_v32 = vpack.c.bf16 (!%p912_p9), %v1102_v29, %v1101_v28  ;;  %v1103_v33 = vld [vmem:[%s9614_s13 + $0x20] sm:$0xff] (!%p912_p9)  ;;  %v1104_v34 = vld [vmem:[%s9614_s13 + $0x28] sm:$0xff] (!%p912_p9)  ;;  %v1105_v36 = vld [vmem:[%s9614_s13 + $0x30] sm:$0xff] (!%p912_p9)  ;;  %s9631_s9 = sld [smem:[#allocation28_spill]] (!%p912_p9) }
  0x5c   : > { %v7588_v35 = vpack.c.bf16 (!%p912_p9), %v1104_v34, %v1103_v33  ;;  %v1106_v37 = vld [vmem:[%s9614_s13 + $0x38] sm:$0xff] (!%p912_p9)  ;;  %v5846_v39 = vld [vmem:[%s9614_s13 + $0x80] sm:$0xff] (!%p912_p9)  ;;  %v5847_v40 = vld [vmem:[%s9614_s13 + $0x88] sm:$0xff] (!%p912_p9) }
  0x5d   : > { %s1009_s26 = scalar_select %p1008_p10, %s8673_s0, 1  ;;  %v7592_v38 = vpack.c.bf16 %v1106_v37, %v1105_v36  ;;  %v7600_v41 = vpack.c.bf16 %v5847_v40, %v5846_v39  ;;  %v5848_v42 = vld [vmem:[%s9614_s13 + $0x90] sm:$0xff]  ;;  %v5849_v43 = vld [vmem:[%s9614_s13 + $0x98] sm:$0xff]  ;;  %v5850_v45 = vld [vmem:[%s9614_s13 + $0xa0] sm:$0xff] }
  0x5e   : > { %v7604_v44 = vpack.c.bf16 %v5849_v43, %v5848_v42  ;;  %v5851_v46 = vld [vmem:[%s9614_s13 + $0xa8] sm:$0xff]  ;;  %v5852_v48 = vld [vmem:[%s9614_s13 + $0xb0] sm:$0xff]  ;;  %v5853_v49 = vld [vmem:[%s9614_s13 + $0xb8] sm:$0xff] }
  0x5f   : > { %s6129_s15 = sshll.u32 %s1009_s26, 4  ;;  %v7608_v47 = vpack.c.bf16 %v5851_v46, %v5850_v45  ;;  %v7612_v50 = vpack.c.bf16 %v5853_v49, %v5852_v48  ;;  %v1624_v53 = vld [vmem:[%s8515_s25] sm:$0xff]  ;;  %v1625_v54 = vld [vmem:[%s8515_s25 + $0x8] sm:$0xff]  ;;  %v1626_v55 = vld [vmem:[%s8515_s25 + $0x10] sm:$0xff]  ;;  %s8883_s26 = sand.u32 1, %s8431_s1  }
  0x60   : > { %s1012_s16 = scalar_lea.vmem %s9619_s5, %s6129_s15  ;;  %v7620_v56 = vpack.c.bf16 %v1625_v54, %v1624_v53  ;;  %v1627_v57 = vld [vmem:[%s8515_s25 + $0x18] sm:$0xff]  ;;  %v1628_v59 = vld [vmem:[%s8515_s25 + $0x20] sm:$0xff]  ;;  %v1629_v60 = vld [vmem:[%s8515_s25 + $0x28] sm:$0xff]  ;;  %s5818_s15 = sshll.u32 %s8883_s26, 3 }
  0x61   : > { %v1013_v2 = vld [vmem:[%s1012_s16] sm:$0xff]  ;;  %v1014_v3 = vld [vmem:[%s1012_s16 + $0x8] sm:$0xff]  ;;  %v7623_v58 = vpack.c.bf16 %v1627_v57, %v1626_v55  ;;  %v7626_v61 = vpack.c.bf16 %v1629_v60, %v1628_v59  ;;  %v1630_v62 = vld [vmem:[%s8515_s25 + $0x30] sm:$0xff]  ;;  %s8886_s16 = scalar_lea.vmem [#allocation2], %s5818_s15  ;;  %s5819_s15 = sshll.u32 %s8883_s26, 2 }
  0x62   : > { %v7556_v4 = vpack.c.bf16 %v1014_v3, %v1013_v2  ;;  %v1631_v63 = vld [vmem:[%s8515_s25 + $0x38] sm:$0xff]  ;;  %v1632_v1 = vld [vmem:[%s8515_s25 + $0x40] sm:$0xff]  ;;  %v1633_v2 = vld [vmem:[%s8515_s25 + $0x48] sm:$0xff]  ;;  %s9022_s10 = scalar_lea.vmem [#allocation4], %s5819_s15  ;;  %s9626_s5 = sld [smem:[#allocation22_spill]] }
  0x63   : > { %v7629_v0 = vpack.c.bf16 %v1631_v63, %v1630_v62  ;;  %v7632_v3 = vpack.c.bf16 %v1633_v2, %v1632_v1  ;;  %v1635_v5 = vld [vmem:[%s8515_s25 + $0x58] sm:$0xff]  ;;  %v1550_v21 = vld [vmem:[%s9621_s21] sm:$0xff]  ;;  %v1791_v33 = vld [vmem:[%s9616_s3 + $0x30] sm:$0xff]  ;;  %s9628_s15 = sld [smem:[#allocation25_spill]]  ;;  %s5601_s13 = sshll.u32 %s9022_s10, 4  ;;  %s5602_s13 = int_to_ptr.vmem [resolvable:$true] %s5601_s13 }
  0x64   : > { %7557 = vmatprep.subr.bf16.mxu0 %v7556_v4  ;;  %7597 = vmatprep.subr.bf16.mxu1 %v7556_v4  ;;  %v1639_v11 = vld [vmem:[%s8515_s25 + $0x78] sm:$0xff]  ;;  %v1711_v22 = vld [vmem:[%s8520_s29] sm:$0xff]  ;;  %v1794_v37 = vld [vmem:[%s9616_s3 + $0x48] sm:$0xff] }
  0x65   : > { %7559 = vmatpush3.bf16.msra.mxu0 %v7556_v4  ;;  %7599 = vmatpush3.bf16.msra.mxu1 %v7556_v4  ;;  %v1788_v28 = vld [vmem:[%s9616_s3 + $0x18] sm:$0xff]  ;;  %v1793_v36 = vld [vmem:[%s9616_s3 + $0x40] sm:$0xff]  ;;  %v1795_v39 = vld [vmem:[%s9616_s3 + $0x50] sm:$0xff] }
  0x66   : > { %7561 = vmatprep.subr.bf16.mxu0 %v7556_v4  ;;  %7616 = vmatprep.subr.bf16.mxu1 %v8473_v51  ;;  %v1792_v34 = vld [vmem:[%s9616_s3 + $0x38] sm:$0xff]  ;;  %v1797_v42 = vld [vmem:[%s9616_s3 + $0x60] sm:$0xff]  ;;  %v1798_v43 = vld [vmem:[%s9616_s3 + $0x68] sm:$0xff] }
  0x67   : > { %v1796_v40 = vld [vmem:[%s9616_s3 + $0x58] sm:$0xff]  ;;  %v1799_v45 = vld [vmem:[%s9616_s3 + $0x70] sm:$0xff]  ;;  %v5861_v48 = vld [vmem:[%s9616_s3 + $0x80] sm:$0xff] }
  0x68   : > { %6605 = vmatmul.mubr.msk.f32.vlgmr.msra.gmra.mrb[0].mxu0 %vm1017_vm0, %v1016_v7  ;;  %6657 = vmatmul.mubr.msk.f32.vlgmr.msra.gmra.mrb[0].mxu1 %vm1017_vm0, %v5843_v8  ;;  %v1636_v7 = vld [vmem:[%s8515_s25 + $0x60] sm:$0xff]  ;;  %v1637_v8 = vld [vmem:[%s8515_s25 + $0x68] sm:$0xff]  ;;  %v1800_v46 = vld [vmem:[%s9616_s3 + $0x78] sm:$0xff] }
  0x69   : > { %7563 = vmatpush3.bf16.msra.mxu0 %v7556_v4  ;;  %6611 = vmatprep.mubr.msk.f32.mxu0 %vm1017_vm0, %v5826_v9  ;;  %v1634_v4 = vld [vmem:[%s8515_s25 + $0x50] sm:$0xff]  ;;  %v7638_v9 = vpack.c.bf16 %v1637_v8, %v1636_v7  ;;  %v5862_v49 = vld [vmem:[%s9616_s3 + $0x88] sm:$0xff]  ;;  %v5864_v54 = vld [vmem:[%s9616_s3 + $0x98] sm:$0xff] }
  0x6a   : > { %7565 = vmatprep.subr.bf16.mxu0 %v7564_v10  ;;  %6682 = vmatprep.mubr.msk.f32.mxu1 %vm8474_vm2, %v8475_v52  ;;  %v7635_v6 = vpack.c.bf16 %v1635_v5, %v1634_v4  ;;  %v5863_v53 = vld [vmem:[%s9616_s3 + $0x90] sm:$0xff]  ;;  %v5866_v59 = vld [vmem:[%s9616_s3 + $0xa8] sm:$0xff]  ;;  %v5869_v4 = vld [vmem:[%s9616_s3 + $0xc0] sm:$0xff] }
  0x6b   : > { %v7653_v57 = vpack.c.bf16 %v5864_v54, %v5863_v53  ;;  %v5867_v63 = vld [vmem:[%s9616_s3 + $0xb0] sm:$0xff]  ;;  %v5870_v5 = vld [vmem:[%s9616_s3 + $0xc8] sm:$0xff]  ;;  %v5872_v8 = vld [vmem:[%s9616_s3 + $0xd8] sm:$0xff] }
  0x6c   : > { %6612 = vmatmul.mubr.msk.f32.vlgmr.msra.gmra.mrb[2].mxu0 %vm1017_vm0, %v5827_v13  ;;  %v5856_v13 = vld [vmem:[%s9620_s17] ss:$0 sm:$0xff]  ;;  %v5871_v7 = vld [vmem:[%s9616_s3 + $0xd0] sm:$0xff]  ;;  %s8476_s17 = smov [#allocation4]  }
  0x6d   : > { %7567 = vmatpush3.bf16.msra.mxu0 %v7564_v10  ;;  %v1638_v10 = vld [vmem:[%s8515_s25 + $0x70] sm:$0xff]  ;;  %v5895_v54 = vld [vmem:[%s9622_s8] ss:$0 sm:$0xff]  ;;  %s9627_s8 = sld [smem:[#allocation24_spill]] }
  0x6e   : > { %7569 = vmatprep.subr.bf16.mxu0 %v7568_v14  ;;  %v7641_v12 = vpack.c.bf16 %v1639_v11, %v1638_v10  ;;  %v5873_v10 = vld [vmem:[%s9616_s3 + $0xe0] sm:$0xff]  ;;  %v5874_v11 = vld [vmem:[%s9616_s3 + $0xe8] sm:$0xff] }
  0x71   : > { %7571 = vmatpush3.bf16.msra.mxu0 %v7568_v14 }
  0x72   : > { %7573 = vmatprep.subr.bf16.mxu0 %v7572_v17 }
  0x75   : > { %7575 = vmatpush3.bf16.msra.mxu0 %v7572_v17 }
  0x76   : > { %7577 = vmatprep.subr.bf16.mxu0 %v7576_v20 }
  0x79   : > { %7579 = vmatpush3.bf16.msra.mxu0 %v7576_v20 }
  0x7a   : > { %7581 = vmatprep.subr.bf16.mxu0 %v7580_v23 }
 0x13b   : > { %v6606_v24 = vpop.f32.mrb[0].mxu0  ;;  %v6658_v25 = vpop.f32.mrb[0].mxu1 }
 0x13c   : > { %v1090_v26 = vpop.f32.mrb[1].mxu0  ;;  %v1438_v27 = vpop.f32.mrb[1].mxu1 }
 0x13f   : > { %v6613_v30 = vpop.f32.mrb[2].mxu0 }
 0x140   : > { %v1182_v31 = vpop.f32.mrb[3].mxu0 }
 0x141   : > { %6630 = vmatprep.mubr.msk.f32.mxu0 %vm1200_vm1, %v1182_v31  ;;  %v1790_v31 = vld [vmem:[%s9616_s3 + $0x28] sm:$0xff] }
 0x142   : > { %6631 = vmatmul.mubr.msk.f32.vlgmr.msra.gmra.mrb[4].mxu0 %vm1200_vm1, %v6613_v30  ;;  %v1789_v30 = vld [vmem:[%s9616_s3 + $0x20] sm:$0xff] }
 0x143   : > { %7583 = vmatpush3.bf16.msra.mxu0 %v7580_v23  ;;  %6649 = vmatprep.mubr.msk.f32.mxu0 %vm1200_vm1, %v1090_v26  ;;  %v1785_v23 = vld [vmem:[%s9616_s3] sm:$0xff] }
 0x144   : > { %7585 = vmatprep.subr.bf16.mxu0 %v7584_v32 }
 0x147   : > { %7587 = vmatpush3.bf16.msra.mxu0 %v7584_v32  ;;  %v7680_v32 = vpack.c.bf16 %v1790_v31, %v1789_v30  ;;  %v5887_v30 = vld [vmem:[%s9616_s3 + $0x140] sm:$0xff]  ;;  %v5888_v31 = vld [vmem:[%s9616_s3 + $0x148] sm:$0xff] }
 0x148   : > { %7589 = vmatprep.subr.bf16.mxu0 %v7588_v35 }
 0x14b   : > { %7591 = vmatpush3.bf16.msra.mxu0 %v7588_v35  ;;  %v7683_v35 = vpack.c.bf16 %v1792_v34, %v1791_v33  ;;  %v5889_v33 = vld [vmem:[%s9616_s3 + $0x150] sm:$0xff]  ;;  %v5890_v34 = vld [vmem:[%s9616_s3 + $0x158] sm:$0xff] }
 0x14c   : > { %7593 = vmatprep.subr.bf16.mxu0 %v7592_v38 }
 0x14f   : > { %7595 = vmatpush3.bf16.msra.mxu0 %v7592_v38  ;;  %v7686_v38 = vpack.c.bf16 %v1794_v37, %v1793_v36  ;;  %v5891_v36 = vld [vmem:[%s9616_s3 + $0x160] sm:$0xff]  ;;  %v5892_v37 = vld [vmem:[%s9616_s3 + $0x168] sm:$0xff] }
 0x150   : > { %7601 = vmatprep.subr.bf16.mxu0 %v7600_v41 }
 0x152   : > { %6650 = vmatmul.mubr.msk.f32.vlgmr.msra.gmra.mrb[4].mxu0 %vm1200_vm1, %v6606_v24  ;;  %v1786_v24 = vld [vmem:[%s9616_s3 + $0x8] sm:$0xff] }
 0x153   : > { %7603 = vmatpush3.bf16.msra.mxu0 %v7600_v41  ;;  %6675 = vmatprep.mubr.msk.f32.mxu0 %vm1200_vm1, %v1438_v27  ;;  %v7674_v26 = vpack.c.bf16 %v1786_v24, %v1785_v23  ;;  %v1787_v27 = vld [vmem:[%s9616_s3 + $0x10] sm:$0xff]  ;;  %v7689_v41 = vpack.c.bf16 %v1796_v40, %v1795_v39  ;;  %v5883_v24 = vld [vmem:[%s9616_s3 + $0x120] sm:$0xff]  ;;  %v5894_v40 = vld [vmem:[%s9616_s3 + $0x178] sm:$0xff] }
 0x154   : > { %7605 = vmatprep.subr.bf16.mxu0 %v7604_v44  ;;  %v7677_v29 = vpack.c.bf16 %v1788_v28, %v1787_v27  ;;  %v5885_v27 = vld [vmem:[%s9616_s3 + $0x130] sm:$0xff]  ;;  %v5886_v28 = vld [vmem:[%s9616_s3 + $0x138] sm:$0xff] }
 0x155   : > { %v5893_v39 = vld [vmem:[%s9616_s3 + $0x170] sm:$0xff] }
 0x157   : > { %7607 = vmatpush3.bf16.msra.mxu0 %v7604_v44  ;;  %v7692_v44 = vpack.c.bf16 %v1798_v43, %v1797_v42 }
 0x158   : > { %7609 = vmatprep.subr.bf16.mxu0 %v7608_v47 }
 0x15b   : > { %7611 = vmatpush3.bf16.msra.mxu0 %v7608_v47  ;;  %v7695_v47 = vpack.c.bf16 %v1800_v46, %v1799_v45 }
 0x15c   : > { %7613 = vmatprep.subr.bf16.mxu0 %v7612_v50 }
 0x15f   : > { %7615 = vmatpush3.bf16.msra.mxu0 %v7612_v50  ;;  %v7650_v50 = vpack.c.bf16 %v5862_v49, %v5861_v48 }
 0x160   : > { %7619 = vmatprep.subr.bf16.mxu0 %v8473_v51 }
 0x162   : > { %6676 = vmatmul.mubr.msk.f32.vlgmr.msra.gmra.mrb[4].mxu0 %vm1200_vm1, %v6658_v25  ;;  %v5859_v25 = vld [vmem:[%s8520_s29 + $0x8] sm:$0xff] }
 0x163   : > { %6717 = vmatprep.mubr.msk.f32.mxu0 %vm8474_vm2, %v8475_v52  ;;  %7621 = vmatpush3.bf16.msra.mxu0 %v7620_v56 }
 0x164   : > { %7622 = vmatprep.subr.bf16.mxu0 %v8473_v51 }
 0x167   : > { %7624 = vmatpush3.bf16.msra.mxu0 %v7623_v58  ;;  %v5865_v58 = vld [vmem:[%s9616_s3 + $0xa0] sm:$0xff] }
 0x168   : > { %7625 = vmatprep.subr.bf16.mxu0 %v8473_v51  ;;  %v7656_v62 = vpack.c.bf16 %v5866_v59, %v5865_v58  ;;  %v2280_v58 = vld [vmem:[%s9613_s19] sm:$0xff]  ;;  %v2281_v59 = vld [vmem:[%s9613_s19 + $0x8] sm:$0xff] }
 0x16b   : > { %7627 = vmatpush3.bf16.msra.mxu0 %v7626_v61 }
 0x16c   : > { %7628 = vmatprep.subr.bf16.mxu0 %v8473_v51 }
 0x16f   : > { %7630 = vmatpush3.bf16.msra.mxu0 %v7629_v0  ;;  %v5868_v0 = vld [vmem:[%s9616_s3 + $0xb8] sm:$0xff] }
 0x170   : > { %7631 = vmatprep.subr.bf16.mxu0 %v8473_v51 }
 0x173   : > { %7633 = vmatpush3.bf16.msra.mxu0 %v7632_v3  ;;  %v7659_v3 = vpack.c.bf16 %v5868_v0, %v5867_v63  ;;  %v7725_v63 = vpack.c.bf16 %v2281_v59, %v2280_v58  ;;  %v2442_v0 = vld [vmem:[%s8550_s30] sm:$0xff] }
 0x174   : > { %7634 = vmatprep.subr.bf16.mxu0 %v8473_v51  ;;  %v5904_v59 = vld [vmem:[%s8550_s30 + $0xa0] sm:$0xff] }
 0x177   : > { %7636 = vmatpush3.bf16.msra.mxu0 %v7635_v6  ;;  %v7662_v6 = vpack.c.bf16 %v5870_v5, %v5869_v4  ;;  %v5898_v4 = vld [vmem:[%s8545_s24 + $0x4] sm:$0xf] }
 0x178   : > { %7637 = vmatprep.subr.bf16.mxu0 %v8473_v51 }
 0x17b   : > { %7639 = vmatpush3.bf16.msra.mxu0 %v7638_v9  ;;  %v7665_v9 = vpack.c.bf16 %v5872_v8, %v5871_v7  ;;  %v2284_v7 = vld [vmem:[%s9613_s19 + $0x20] sm:$0xff]  ;;  %v2285_v8 = vld [vmem:[%s9613_s19 + $0x28] sm:$0xff] }
 0x17c   : > { %7640 = vmatprep.subr.bf16.mxu0 %v8473_v51 }
 0x17f   : > { %7642 = vmatpush3.bf16.msra.mxu0 %v7641_v12  ;;  %v7668_v12 = vpack.c.bf16 %v5874_v11, %v5873_v10  ;;  %v2286_v10 = vld [vmem:[%s9613_s19 + $0x30] sm:$0xff]  ;;  %v2287_v11 = vld [vmem:[%s9613_s19 + $0x38] sm:$0xff] }
 0x180   : > { %7649 = vmatprep.subr.bf16.mxu0 %v8473_v51 }
 0x235   : > { %v6677_v14 = vpop.f32.mrb[4].mxu0 }
 0x236   : > { %v1547_v15 = vadd.f32 %v6677_v14, %v5856_v13  ;;  %v1528_v16 = vpop.f32.mrb[5].mxu0  ;;  %v5876_v14 = vld [vmem:[%s9616_s3 + $0xf8] sm:$0xff] }
 0x237   : > { %v1546_v17 = vadd.f32 %v5856_v13, %v1528_v16  ;;  %v5875_v13 = vld [vmem:[%s9616_s3 + $0xf0] sm:$0xff] }
 0x238   : > { %v1549_v18 = vmax.f32 %v1547_v15, 0.0  ;;  %v7671_v15 = vpack.c.bf16 %v5876_v14, %v5875_v13  ;;  %v5877_v16 = vld [vmem:[%s8520_s29 + $0x10] sm:$0xff]  ;;  %v2288_v13 = vld [vmem:[%s9613_s19 + $0x40] sm:$0xff]  ;;  %v2289_v14 = vld [vmem:[%s9613_s19 + $0x48] sm:$0xff] }
 0x239   : > { %v1548_v19 = vmax.f32 %v1546_v17, 0.0  ;;  %v5879_v17 = vld [vmem:[%s9616_s3 + $0x100] sm:$0xff] }
 0x23b   : > { %v8778_v20 = vpack.c.bf16 %v1549_v18, %v1548_v19  ;;  %v5880_v18 = vld [vmem:[%s9616_s3 + $0x108] sm:$0xff]  ;;  %v5881_v19 = vld [vmem:[%s9616_s3 + $0x110] sm:$0xff] }
 0x23d   : > { %7618 = vmatpush3.bf16.msra.mxu1 %v8778_v20 }
 0x23e   : > { %7643 = vmatprep.subr.bf16.mxu1 %v8473_v51 }
 0x240   : > { %6683 = vmatmul.mubr.msk.f32.vlgmr.msra.gmra.mrb[2].mxu1 %vm1017_vm0, %v1550_v21  ;;  %v7701_v21 = vpack.c.bf16 %v5880_v18, %v5879_v17  ;;  %v2291_v17 = vld [vmem:[%s9613_s19 + $0x58] sm:$0xff] }
 0x241   : > { %7645 = vmatpush3.bf16.msra.mxu1 %v8778_v20  ;;  %6724 = vmatprep.mubr.msk.f32.mxu1 %vm8474_vm2, %v8475_v52 }
 0x242   : > { %7646 = vmatprep.subr.bf16.mxu1 %v8473_v51 }
 0x244   : > { %6725 = vmatmul.mubr.msk.f32.vlgmr.msra.gmra.mrb[4].mxu1 %vm1017_vm0, %v1711_v22  ;;  %v5882_v22 = vld [vmem:[%s9616_s3 + $0x118] sm:$0xff] }
 0x245   : > { %7648 = vmatpush3.bf16.msra.mxu1 %v8778_v20  ;;  %6731 = vmatprep.mubr.msk.f32.mxu1 %vm8474_vm2, %v8475_v52  ;;  %v7704_v23 = vpack.c.bf16 %v5882_v22, %v5881_v19  ;;  %v2292_v19 = vld [vmem:[%s9613_s19 + $0x60] sm:$0xff] }
 0x246   : > { %7673 = vmatprep.subr.bf16.mxu1 %v8473_v51 }
 0x248   : > { %6732 = vmatmul.mubr.msk.f32.vlgmr.msra.gmra.mrb[6].mxu1 %vm1017_vm0, %v5859_v25  ;;  %v5884_v25 = vld [vmem:[%s9616_s3 + $0x128] sm:$0xff]  ;;  %s9625_s3 = sld [smem:[#allocation23_spill]] }
 0x249   : > { %7675 = vmatpush3.bf16.msra.mxu1 %v7674_v26  ;;  %6801 = vmatprep.mubr.msk.f32.mxu1 %vm8474_vm2, %v8475_v52  ;;  %v7707_v26 = vpack.c.bf16 %v5884_v25, %v5883_v24  ;;  %v2295_v24 = vld [vmem:[%s9613_s19 + $0x78] sm:$0xff] }
 0x24a   : > { %7676 = vmatprep.subr.bf16.mxu1 %v8473_v51 }
 0x24d   : > { %7678 = vmatpush3.bf16.msra.mxu1 %v7677_v29  ;;  %v7710_v29 = vpack.c.bf16 %v5886_v28, %v5885_v27  ;;  %v2445_v27 = vld [vmem:[%s8550_s30 + $0x18] sm:$0xff] }
 0x24e   : > { %7679 = vmatprep.subr.bf16.mxu1 %v8473_v51 }
 0x251   : > { %7681 = vmatpush3.bf16.msra.mxu1 %v7680_v32  ;;  %v7713_v32 = vpack.c.bf16 %v5888_v31, %v5887_v30  ;;  %v2447_v30 = vld [vmem:[%s8550_s30 + $0x28] sm:$0xff] }
 0x252   : > { %7682 = vmatprep.subr.bf16.mxu1 %v8473_v51 }
 0x255   : > { %7684 = vmatpush3.bf16.msra.mxu1 %v7683_v35  ;;  %v7716_v35 = vpack.c.bf16 %v5890_v34, %v5889_v33  ;;  %v2449_v33 = vld [vmem:[%s8550_s30 + $0x38] sm:$0xff] }
 0x256   : > { %7685 = vmatprep.subr.bf16.mxu1 %v8473_v51 }
 0x259   : > { %7687 = vmatpush3.bf16.msra.mxu1 %v7686_v38  ;;  %v7719_v38 = vpack.c.bf16 %v5892_v37, %v5891_v36  ;;  %v2451_v36 = vld [vmem:[%s8550_s30 + $0x48] sm:$0xff] }
 0x25a   : > { %7688 = vmatprep.subr.bf16.mxu1 %v8473_v51 }
 0x25d   : > { %7690 = vmatpush3.bf16.msra.mxu1 %v7689_v41  ;;  %v7722_v41 = vpack.c.bf16 %v5894_v40, %v5893_v39  ;;  %v2453_v39 = vld [vmem:[%s8550_s30 + $0x58] sm:$0xff] }
 0x25e   : > { %7691 = vmatprep.subr.bf16.mxu1 %v8473_v51 }
 0x261   : > { %7693 = vmatpush3.bf16.msra.mxu1 %v7692_v44 }
 0x262   : > { %7694 = vmatprep.subr.bf16.mxu1 %v8473_v51 }
 0x265   : > { %7696 = vmatpush3.bf16.msra.mxu1 %v7695_v47 }
 0x266   : > { %7700 = vmatprep.subr.bf16.mxu1 %v8473_v51 }
 0x313   : > { %v1620_v55 = vpop.f32.mrb[2].mxu1 }
 0x314   : > { %v6684_v56 = vpop.f32.mrb[3].mxu1  ;;  %6718 = vmatmul.mubr.f32.vlgmr.msra.gmra.mrb[6].mxu0 %v1620_v55 }
 0x315   : > { %7651 = vmatpush3.bf16.msra.mxu0 %v7650_v50  ;;  %6766 = vmatprep.mubr.msk.f32.mxu0 %vm8474_vm2, %v8475_v52 }
 0x316   : > { %7652 = vmatprep.subr.bf16.mxu0 %v8473_v51 }
 0x317   : > { %v1781_v60 = vpop.f32.mrb[4].mxu1 }
 0x318   : > { %v6726_v61 = vpop.f32.mrb[5].mxu1  ;;  %6802 = vmatmul.mubr.f32.vlgmr.msra.gmra.mrb[8].mxu1 %v1781_v60 }
 0x319   : > { %7654 = vmatpush3.bf16.msra.mxu0 %v7653_v57  ;;  %6843 = vmatprep.mubr.msk.f32.mxu1 %vm8474_vm2, %v8475_v52  ;;  %v2205_v61 = vld [vmem:[%s9623_s14] sm:$0xf] }
 0x31a   : > { %7655 = vmatprep.subr.bf16.mxu0 %v8473_v51  ;;  %7702 = vmatpush3.bf16.msra.mxu1 %v7701_v21  ;;  %v2293_v21 = vld [vmem:[%s9613_s19 + $0x68] sm:$0xff] }
 0x31b   : > { %v1872_v1 = vpop.f32.mrb[6].mxu1  ;;  %7703 = vmatprep.subr.bf16.mxu1 %v8473_v51  ;;  %v7743_v22 = vpack.c.bf16 %v2293_v21, %v2292_v19  ;;  %v5920_v19 = vld [vmem:[%s8550_s30 + $0x110] sm:$0xff] }
 0x31c   : > { %v6733_v2 = vpop.f32.mrb[7].mxu1 }
 0x31d   : > { %7657 = vmatpush3.bf16.msra.mxu0 %v7656_v62  ;;  %v2368_v62 = vld [vmem:[%s8545_s24] sm:$0xf]  ;;  %v2282_v2 = vld [vmem:[%s9613_s19 + $0x10] sm:$0xff] }
 0x31e   : > { %7658 = vmatprep.subr.bf16.mxu0 %v8473_v51  ;;  %7705 = vmatpush3.bf16.msra.mxu1 %v7704_v23  ;;  %v2294_v23 = vld [vmem:[%s9613_s19 + $0x70] sm:$0xff] }
 0x31f   : > { %7706 = vmatprep.subr.bf16.mxu1 %v8473_v51  ;;  %v7746_v25 = vpack.c.bf16 %v2295_v24, %v2294_v23  ;;  %v5922_v24 = vld [vmem:[%s8550_s30 + $0x120] sm:$0xff] }
 0x321   : > { %7660 = vmatpush3.bf16.msra.mxu0 %v7659_v3  ;;  %v2283_v3 = vld [vmem:[%s9613_s19 + $0x18] sm:$0xff] }
 0x322   : > { %7661 = vmatprep.subr.bf16.mxu0 %v8473_v51  ;;  %7708 = vmatpush3.bf16.msra.mxu1 %v7707_v26  ;;  %v2444_v26 = vld [vmem:[%s8550_s30 + $0x10] sm:$0xff] }
 0x323   : > { %7709 = vmatprep.subr.bf16.mxu1 %v8473_v51  ;;  %v7776_v28 = vpack.c.bf16 %v2445_v27, %v2444_v26  ;;  %v5924_v27 = vld [vmem:[%s8550_s30 + $0x130] sm:$0xff] }
 0x325   : > { %7663 = vmatpush3.bf16.msra.mxu0 %v7662_v6  ;;  %v7728_v6 = vpack.c.bf16 %v2283_v3, %v2282_v2  ;;  %v5907_v2 = vld [vmem:[%s8550_s30 + $0xb8] sm:$0xff] }
 0x326   : > { %7664 = vmatprep.subr.bf16.mxu0 %v8473_v51  ;;  %7711 = vmatpush3.bf16.msra.mxu1 %v7710_v29  ;;  %v2446_v29 = vld [vmem:[%s8550_s30 + $0x20] sm:$0xff] }
 0x327   : > { %7712 = vmatprep.subr.bf16.mxu1 %v8473_v51  ;;  %v7779_v31 = vpack.c.bf16 %v2447_v30, %v2446_v29  ;;  %v5926_v30 = vld [vmem:[%s8550_s30 + $0x140] sm:$0xff] }
 0x329   : > { %7666 = vmatpush3.bf16.msra.mxu0 %v7665_v9  ;;  %v7731_v9 = vpack.c.bf16 %v2285_v8, %v2284_v7  ;;  %v5910_v7 = vld [vmem:[%s8550_s30 + $0xd0] sm:$0xff]  ;;  %v5911_v8 = vld [vmem:[%s8550_s30 + $0xd8] sm:$0xff] }
 0x32a   : > { %7667 = vmatprep.subr.bf16.mxu0 %v8473_v51  ;;  %7714 = vmatpush3.bf16.msra.mxu1 %v7713_v32  ;;  %v2448_v32 = vld [vmem:[%s8550_s30 + $0x30] sm:$0xff] }
 0x32b   : > { %7715 = vmatprep.subr.bf16.mxu1 %v8473_v51  ;;  %v7782_v34 = vpack.c.bf16 %v2449_v33, %v2448_v32  ;;  %v5928_v33 = vld [vmem:[%s8550_s30 + $0x150] sm:$0xff] }
 0x32d   : > { %7669 = vmatpush3.bf16.msra.mxu0 %v7668_v12  ;;  %v7734_v12 = vpack.c.bf16 %v2287_v11, %v2286_v10  ;;  %v5912_v10 = vld [vmem:[%s8550_s30 + $0xe0] sm:$0xff]  ;;  %v5913_v11 = vld [vmem:[%s8550_s30 + $0xe8] sm:$0xff] }
 0x32e   : > { %7670 = vmatprep.subr.bf16.mxu0 %v8473_v51  ;;  %7717 = vmatpush3.bf16.msra.mxu1 %v7716_v35  ;;  %v2450_v35 = vld [vmem:[%s8550_s30 + $0x40] sm:$0xff] }
 0x32f   : > { %7718 = vmatprep.subr.bf16.mxu1 %v8473_v51  ;;  %v7785_v37 = vpack.c.bf16 %v2451_v36, %v2450_v35  ;;  %v5930_v36 = vld [vmem:[%s8550_s30 + $0x160] sm:$0xff] }
 0x331   : > { %7672 = vmatpush3.bf16.msra.mxu0 %v7671_v15  ;;  %v7737_v15 = vpack.c.bf16 %v2289_v14, %v2288_v13  ;;  %v5914_v13 = vld [vmem:[%s8550_s30 + $0xf0] sm:$0xff]  ;;  %v5915_v14 = vld [vmem:[%s8550_s30 + $0xf8] sm:$0xff] }
 0x332   : > { %7697 = vmatprep.subr.bf16.mxu0 %v8473_v51  ;;  %7720 = vmatpush3.bf16.msra.mxu1 %v7719_v38  ;;  %v2452_v38 = vld [vmem:[%s8550_s30 + $0x50] sm:$0xff] }
 0x333   : > { %7721 = vmatprep.subr.bf16.mxu1 %v8473_v51  ;;  %v7788_v40 = vpack.c.bf16 %v2453_v39, %v2452_v38  ;;  %v5932_v39 = vld [vmem:[%s8550_s30 + $0x170] sm:$0xff] }
 0x334   : > { %6767 = vmatmul.mubr.f32.vlgmr.msra.gmra.mrb[8].mxu0 %v1872_v1  ;;  %v2443_v1 = vld [vmem:[%s8550_s30 + $0x8] sm:$0xff] }
 0x335   : > { %7699 = vmatpush3.bf16.msra.mxu0 %v8778_v20  ;;  %6808 = vmatprep.mubr.msk.f32.mxu0 %vm8474_vm2, %v8475_v52  ;;  %v7773_v5 = vpack.c.bf16 %v2443_v1, %v2442_v0  ;;  %v5906_v1 = vld [vmem:[%s8550_s30 + $0xb0] sm:$0xff] }
 0x336   : > { %6846 = vmatprep.subr.mxu0 %v8475_v52  ;;  %7723 = vmatpush3.bf16.msra.mxu1 %v7722_v41  ;;  %v2454_v41 = vld [vmem:[%s8550_s30 + $0x60] sm:$0xff]  ;;  %v7758_v3 = vpack.c.bf16 %v5907_v2, %v5906_v1  ;;  %v3104_v2 = vld [vmem:[%s9628_s15 + $0x8] sm:$0xff] }
 0x337   : > { %6886 = vmatprep.subr.mxu1 %v8475_v52  ;;  %v3103_v1 = vld [vmem:[%s9628_s15] sm:$0xff] }
 0x338   : > { %6809 = vmatmul.mubr.msk.f32.vlgmr.msra.gmra.mrb[10].mxu0 %vm1017_vm0, %v5877_v16  ;;  %v2290_v16 = vld [vmem:[%s9613_s19 + $0x50] sm:$0xff]  ;;  %s8289_s19 = sshll.u32 %s8476_s17, 4  ;;  %s8290_s19 = int_to_ptr.vmem [resolvable:$false] %s8289_s19 }
 0x339   : > { %6848 = vmatprep.mubr.msk.f32.mxu0 %vm8474_vm2, %v8475_v52  ;;  %v7740_v18 = vpack.c.bf16 %v2291_v17, %v2290_v16  ;;  %v5916_v16 = vld [vmem:[%s8545_s24 + $0x8] sm:$0xf]  ;;  %v5918_v17 = vld [vmem:[%s8550_s30 + $0x100] sm:$0xff]  ;;  %s8291_s21 = scalar_lea.vmem %s8290_s19, 128  ;;  %p8292_p0 = scmp.lt.s32.totalorder %s5602_s13, %s8290_s19 }
 0x3e7   : > { %v1706_v42 = vpop.f32.mrb[6].mxu0 }
 0x3e8   : > { %1710 = vst.msk [vmem:[%s8886_s16] sm:$0xff] %vm1200_vm1, %v1706_v42  ;;  %v6719_v43 = vpop.f32.mrb[7].mxu0  ;;  %v2455_v42 = vld [vmem:[%s8550_s30 + $0x68] sm:$0xff] }
 0x3e9   : > { %v7791_v43 = vpack.c.bf16 %v2455_v42, %v2454_v41 }
 0x3eb   : > { %v2029_v44 = vpop.f32.mrb[8].mxu1 }
 0x3ec   : > { %v6803_v45 = vpop.f32.mrb[9].mxu1 }
 0x3ed   : > { %v2457_v45 = vld [vmem:[%s8550_s30 + $0x78] sm:$0xff] }
 0x407   : > { %v1959_v46 = vpop.f32.mrb[8].mxu0 }
 0x408   : > { %v2030_v47 = vadd.f32 %v2029_v44, %v1959_v46  ;;  %v6768_v48 = vpop.f32.mrb[9].mxu0  ;;  %v2456_v44 = vld [vmem:[%s8550_s30 + $0x70] sm:$0xff] }
 0x409   : > { %v7794_v46 = vpack.c.bf16 %v2457_v45, %v2456_v44  ;;  %v5901_v48 = vld [vmem:[%s8550_s30 + $0x88] sm:$0xff] }
 0x40b   : > { %v2104_v49 = vpop.f32.mrb[10].mxu0 }
 0x40c   : > { %v6810_v50 = vpop.f32.mrb[11].mxu0  ;;  %6844 = vmatmul.mubr.f32.vlgmr.msra.gmra.mrb[10].mxu1 %v2104_v49 }
 0x40d   : > { %6888 = vmatprep.mubr.msk.f32.mxu1 %vm8474_vm2, %v8475_v52  ;;  %v5902_v50 = vld [vmem:[%s8550_s30 + $0x90] sm:$0xff] }
 0x4df   : > { %v2191_v53 = vpop.f32.mrb[10].mxu1 }
 0x4e0   : > { %v2195_v55 = vadd.f32 %v2191_v53, %v2030_v47  ;;  %v6845_v56 = vpop.f32.mrb[11].mxu1  ;;  %v5900_v47 = vld [vmem:[%s8550_s30 + $0x80] sm:$0xff]  ;;  %v5903_v53 = vld [vmem:[%s8550_s30 + $0x98] sm:$0xff] }
 0x4e1   : > { %v7749_v49 = vpack.c.bf16 %v5901_v48, %v5900_v47 }
 0x4e2   : > { %v2203_v57 = vadd.f32 %v5895_v54, %v2195_v55 }
 0x4e4   : > { %v8895_v60 = vmax.f32 %v2203_v57, 0.0  ;;  %v7752_v57 = vpack.c.bf16 %v5903_v53, %v5902_v50 }
 0x4e6   : > { %6847 = vmatpush3.msra.mxu0 %v8895_v60  ;;  %6887 = vmatpush3.msra.mxu1 %v8895_v60 }
 0x4e7   : > { %6849 = vmatmul.mubr.msk.f32.vlgmr.msra.gmra.mrb[12].mxu0 %vm2206_vm3, %v2205_v61  ;;  %6891 = vmatprep.subr.mxu1 %v8475_v52  ;;  %v5905_v61 = vld [vmem:[%s8550_s30 + $0xa8] sm:$0xff] }
 0x4e8   : > { %6889 = vmatmul.mubr.msk.f32.vlgmr.msra.gmra.mrb[12].mxu1 %vm2206_vm3, %v2368_v62  ;;  %7724 = vmatprep.subr.bf16.mxu0 %v8473_v51 }
 0x4e9   : > { %6892 = vmatpush3.msra.mxu1 %v8895_v60  ;;  %6893 = vmatprep.mubr.msk.f32.mxu1 %vm8474_vm2, %v8475_v52 }
 0x4ea   : > { %7726 = vmatpush3.bf16.msra.mxu0 %v7725_v63  ;;  %7772 = vmatprep.subr.bf16.mxu1 %v8473_v51  ;;  %v7755_v63 = vpack.c.bf16 %v5905_v61, %v5904_v59  ;;  %v2942_v59 = vld [vmem:[%s9625_s3 + $0x8] sm:$0xff] }
 0x4eb   : > { %7727 = vmatprep.subr.bf16.mxu0 %v8473_v51  ;;  %6883 = vmatprep.mubr.msk.f32.mxu0 %vm8474_vm2, %v8475_v52 }
 0x4ec   : > { %6894 = vmatmul.mubr.msk.f32.vlgmr.msra.gmra.mrb[14].mxu1 %vm2206_vm3, %v5898_v4  ;;  %v5908_v4 = vld [vmem:[%s8550_s30 + $0xc0] sm:$0xff] }
 0x4ed   : > { %7774 = vmatpush3.bf16.msra.mxu1 %v7773_v5  ;;  %6963 = vmatprep.mubr.msk.f32.mxu1 %vm8474_vm2, %v8475_v52  ;;  %v5909_v5 = vld [vmem:[%s8550_s30 + $0xc8] sm:$0xff] }
 0x4ee   : > { %7729 = vmatpush3.bf16.msra.mxu0 %v7728_v6  ;;  %7775 = vmatprep.subr.bf16.mxu1 %v8473_v51  ;;  %v7761_v6 = vpack.c.bf16 %v5909_v5, %v5908_v4  ;;  %v2944_v4 = vld [vmem:[%s9625_s3 + $0x18] sm:$0xff]  ;;  %v5939_v5 = vld [vmem:[%s9627_s8 + $0x4] sm:$0xf] }
 0x4ef   : > { %7730 = vmatprep.subr.bf16.mxu0 %v8473_v51 }
 0x4f1   : > { %7777 = vmatpush3.bf16.msra.mxu1 %v7776_v28  ;;  %v5925_v28 = vld [vmem:[%s8550_s30 + $0x138] sm:$0xff] }
 0x4f2   : > { %7732 = vmatpush3.bf16.msra.mxu0 %v7731_v9  ;;  %7778 = vmatprep.subr.bf16.mxu1 %v8473_v51  ;;  %v7764_v9 = vpack.c.bf16 %v5911_v8, %v5910_v7  ;;  %v7806_v29 = vpack.c.bf16 %v5925_v28, %v5924_v27  ;;  %v2945_v8 = vld [vmem:[%s9625_s3 + $0x20] sm:$0xff]  ;;  %v3105_v27 = vld [vmem:[%s9628_s15 + $0x10] sm:$0xff]  ;;  %v3106_v28 = vld [vmem:[%s9628_s15 + $0x18] sm:$0xff] }
 0x4f3   : > { %7733 = vmatprep.subr.bf16.mxu0 %v8473_v51 }
 0x4f5   : > { %7780 = vmatpush3.bf16.msra.mxu1 %v7779_v31  ;;  %v5927_v31 = vld [vmem:[%s8550_s30 + $0x148] sm:$0xff] }
 0x4f6   : > { %7735 = vmatpush3.bf16.msra.mxu0 %v7734_v12  ;;  %7781 = vmatprep.subr.bf16.mxu1 %v8473_v51  ;;  %v7767_v12 = vpack.c.bf16 %v5913_v11, %v5912_v10  ;;  %v7809_v32 = vpack.c.bf16 %v5927_v31, %v5926_v30  ;;  %v2947_v11 = vld [vmem:[%s9625_s3 + $0x30] sm:$0xff]  ;;  %v3107_v30 = vld [vmem:[%s9628_s15 + $0x20] sm:$0xff]  ;;  %v3108_v31 = vld [vmem:[%s9628_s15 + $0x28] sm:$0xff] }
 0x4f7   : > { %7736 = vmatprep.subr.bf16.mxu0 %v8473_v51 }
 0x4f9   : > { %7783 = vmatpush3.bf16.msra.mxu1 %v7782_v34  ;;  %v5929_v34 = vld [vmem:[%s8550_s30 + $0x158] sm:$0xff] }
 0x4fa   : > { %7738 = vmatpush3.bf16.msra.mxu0 %v7737_v15  ;;  %7784 = vmatprep.subr.bf16.mxu1 %v8473_v51  ;;  %v7770_v15 = vpack.c.bf16 %v5915_v14, %v5914_v13  ;;  %v7812_v35 = vpack.c.bf16 %v5929_v34, %v5928_v33  ;;  %v2949_v14 = vld [vmem:[%s9625_s3 + $0x40] sm:$0xff]  ;;  %v3109_v33 = vld [vmem:[%s9628_s15 + $0x30] sm:$0xff]  ;;  %v3110_v34 = vld [vmem:[%s9628_s15 + $0x38] sm:$0xff] }
 0x4fb   : > { %7739 = vmatprep.subr.bf16.mxu0 %v8473_v51 }
 0x4fd   : > { %7786 = vmatpush3.bf16.msra.mxu1 %v7785_v37  ;;  %v5931_v37 = vld [vmem:[%s8550_s30 + $0x168] sm:$0xff] }
 0x4fe   : > { %7741 = vmatpush3.bf16.msra.mxu0 %v7740_v18  ;;  %7787 = vmatprep.subr.bf16.mxu1 %v8473_v51  ;;  %v5919_v18 = vld [vmem:[%s8550_s30 + $0x108] sm:$0xff]  ;;  %v7815_v38 = vpack.c.bf16 %v5931_v37, %v5930_v36  ;;  %v3111_v36 = vld [vmem:[%s9628_s15 + $0x40] sm:$0xff] }
 0x4ff   : > { %7742 = vmatprep.subr.bf16.mxu0 %v8473_v51  ;;  %v7797_v21 = vpack.c.bf16 %v5919_v18, %v5918_v17  ;;  %v2951_v17 = vld [vmem:[%s9625_s3 + $0x50] sm:$0xff]  ;;  %v2952_v18 = vld [vmem:[%s9625_s3 + $0x58] sm:$0xff]  ;;  %v3112_v37 = vld [vmem:[%s9628_s15 + $0x48] sm:$0xff] }
 0x501   : > { %7789 = vmatpush3.bf16.msra.mxu1 %v7788_v40  ;;  %v5933_v40 = vld [vmem:[%s8550_s30 + $0x178] sm:$0xff] }
 0x502   : > { %7744 = vmatpush3.bf16.msra.mxu0 %v7743_v22  ;;  %7790 = vmatprep.subr.bf16.mxu1 %v8473_v51  ;;  %v5921_v22 = vld [vmem:[%s8550_s30 + $0x118] sm:$0xff]  ;;  %v7818_v41 = vpack.c.bf16 %v5933_v40, %v5932_v39  ;;  %v3113_v39 = vld [vmem:[%s9628_s15 + $0x50] sm:$0xff] }
 0x503   : > { %7745 = vmatprep.subr.bf16.mxu0 %v8473_v51  ;;  %v7800_v23 = vpack.c.bf16 %v5921_v22, %v5920_v19  ;;  %v7836_v19 = vpack.c.bf16 %v2952_v18, %v2951_v17  ;;  %v2954_v22 = vld [vmem:[%s9625_s3 + $0x68] sm:$0xff]  ;;  %v3114_v40 = vld [vmem:[%s9628_s15 + $0x58] sm:$0xff] }
 0x504   : > { %v5958_v18 = vld [vmem:[%s9627_s8 + $0x8] sm:$0xf] }
 0x505   : > { %7792 = vmatpush3.bf16.msra.mxu1 %v7791_v43 }
 0x506   : > { %7747 = vmatpush3.bf16.msra.mxu0 %v7746_v25  ;;  %7793 = vmatprep.subr.bf16.mxu1 %v8473_v51  ;;  %v5923_v25 = vld [vmem:[%s8550_s30 + $0x128] sm:$0xff] }
 0x507   : > { %7748 = vmatprep.subr.bf16.mxu0 %v8473_v51  ;;  %v7803_v26 = vpack.c.bf16 %v5923_v25, %v5922_v24  ;;  %v2955_v24 = vld [vmem:[%s9625_s3 + $0x70] sm:$0xff]  ;;  %v2956_v25 = vld [vmem:[%s9625_s3 + $0x78] sm:$0xff] }
 0x509   : > { %7795 = vmatpush3.bf16.msra.mxu1 %v7794_v46 }
 0x50a   : > { %7796 = vmatprep.subr.bf16.mxu1 %v8473_v51 }
 0x5ba   : > { %v2276_v54 = vpop.f32.mrb[12].mxu0 }
 0x5bb   : > { %v6850_v55 = vpop.f32.mrb[13].mxu0  ;;  %6884 = vmatmul.mubr.f32.vlgmr.msra.gmra.mrb[14].mxu0 %v2276_v54  ;;  %v2438_v56 = vpop.f32.mrb[12].mxu1  ;;  %v5934_v54 = vld [vmem:[%s9624_s6] ss:$0 sm:$0xff] }
 0x5bc   : > { %7750 = vmatpush3.bf16.msra.mxu0 %v7749_v49  ;;  %v6890_v58 = vpop.f32.mrb[13].mxu1  ;;  %6964 = vmatmul.mubr.f32.vlgmr.msra.gmra.mrb[16].mxu1 %v2438_v56 }
 0x5bd   : > { %7751 = vmatprep.subr.bf16.mxu0 %v8473_v51  ;;  %6928 = vmatprep.mubr.msk.f32.mxu0 %vm8474_vm2, %v8475_v52  ;;  %v2941_v58 = vld [vmem:[%s9625_s3] sm:$0xff] }
 0x5be   : > { %7003 = vmatprep.mubr.msk.f32.mxu1 %vm8474_vm2, %v8475_v52  ;;  %7798 = vmatpush3.bf16.msra.mxu1 %v7797_v21  ;;  %v2953_v21 = vld [vmem:[%s9625_s3 + $0x60] sm:$0xff] }
 0x5bf   : > { %v2529_v62 = vpop.f32.mrb[14].mxu1  ;;  %7799 = vmatprep.subr.bf16.mxu1 %v8473_v51 }
 0x5c0   : > { %7753 = vmatpush3.bf16.msra.mxu0 %v7752_v57  ;;  %v6895_v0 = vpop.f32.mrb[15].mxu1 }
 0x5c1   : > { %7754 = vmatprep.subr.bf16.mxu0 %v8473_v51  ;;  %v7821_v0 = vpack.c.bf16 %v2942_v59, %v2941_v58 }
 0x5c2   : > { %7801 = vmatpush3.bf16.msra.mxu1 %v7800_v23  ;;  %v7839_v23 = vpack.c.bf16 %v2954_v22, %v2953_v21  ;;  %v5962_v21 = vld [vmem:[%s9628_s15 + $0x108] sm:$0xff]  ;;  %v5963_v22 = vld [vmem:[%s9628_s15 + $0x110] sm:$0xff] }
 0x5c3   : > { %7802 = vmatprep.subr.bf16.mxu1 %v8473_v51 }
 0x5c4   : > { %7756 = vmatpush3.bf16.msra.mxu0 %v7755_v63  ;;  %v3029_v63 = vld [vmem:[%s9627_s8] sm:$0xf]  ;;  %s9630_s8 = sld [smem:[#allocation27_spill]] }
 0x5c5   : > { %7757 = vmatprep.subr.bf16.mxu0 %v8473_v51 }
 0x5c6   : > { %7804 = vmatpush3.bf16.msra.mxu1 %v7803_v26  ;;  %v7842_v26 = vpack.c.bf16 %v2956_v25, %v2955_v24  ;;  %v5965_v25 = vld [vmem:[%s9628_s15 + $0x120] sm:$0xff] }
 0x5c7   : > { %7805 = vmatprep.subr.bf16.mxu1 %v8473_v51 }
 0x5c8   : > { %7759 = vmatpush3.bf16.msra.mxu0 %v7758_v3  ;;  %v2943_v3 = vld [vmem:[%s9625_s3 + $0x10] sm:$0xff] }
 0x5c9   : > { %7760 = vmatprep.subr.bf16.mxu0 %v8473_v51  ;;  %v7824_v7 = vpack.c.bf16 %v2944_v4, %v2943_v3  ;;  %v5948_v3 = vld [vmem:[%s9628_s15 + $0xb0] sm:$0xff]  ;;  %v5949_v4 = vld [vmem:[%s9628_s15 + $0xb8] sm:$0xff] }
 0x5ca   : > { %7807 = vmatpush3.bf16.msra.mxu1 %v7806_v29  ;;  %v7872_v29 = vpack.c.bf16 %v3106_v28, %v3105_v27  ;;  %v5967_v28 = vld [vmem:[%s9628_s15 + $0x130] sm:$0xff] }
 0x5cb   : > { %7808 = vmatprep.subr.bf16.mxu1 %v8473_v51 }
 0x5cc   : > { %7762 = vmatpush3.bf16.msra.mxu0 %v7761_v6  ;;  %v7869_v6 = vpack.c.bf16 %v3104_v2, %v3103_v1 }
 0x5cd   : > { %7763 = vmatprep.subr.bf16.mxu0 %v8473_v51 }
 0x5ce   : > { %7810 = vmatpush3.bf16.msra.mxu1 %v7809_v32  ;;  %v7875_v32 = vpack.c.bf16 %v3108_v31, %v3107_v30  ;;  %v5969_v31 = vld [vmem:[%s9628_s15 + $0x140] sm:$0xff] }
 0x5cf   : > { %7811 = vmatprep.subr.bf16.mxu1 %v8473_v51 }
 0x5d0   : > { %7765 = vmatpush3.bf16.msra.mxu0 %v7764_v9  ;;  %v2946_v9 = vld [vmem:[%s9625_s3 + $0x28] sm:$0xff] }
 0x5d1   : > { %7766 = vmatprep.subr.bf16.mxu0 %v8473_v51  ;;  %v7827_v10 = vpack.c.bf16 %v2946_v9, %v2945_v8  ;;  %v5952_v9 = vld [vmem:[%s9628_s15 + $0xd0] sm:$0xff] }
 0x5d2   : > { %7813 = vmatpush3.bf16.msra.mxu1 %v7812_v35  ;;  %v7878_v35 = vpack.c.bf16 %v3110_v34, %v3109_v33  ;;  %v5971_v34 = vld [vmem:[%s9628_s15 + $0x150] sm:$0xff] }
 0x5d3   : > { %7814 = vmatprep.subr.bf16.mxu1 %v8473_v51 }
 0x5d4   : > { %7768 = vmatpush3.bf16.msra.mxu0 %v7767_v12  ;;  %v2948_v12 = vld [vmem:[%s9625_s3 + $0x38] sm:$0xff] }
 0x5d5   : > { %7769 = vmatprep.subr.bf16.mxu0 %v8473_v51  ;;  %v7830_v13 = vpack.c.bf16 %v2948_v12, %v2947_v11  ;;  %v5954_v12 = vld [vmem:[%s9628_s15 + $0xe0] sm:$0xff] }
 0x5d6   : > { %7816 = vmatpush3.bf16.msra.mxu1 %v7815_v38  ;;  %v7881_v38 = vpack.c.bf16 %v3112_v37, %v3111_v36  ;;  %v5973_v37 = vld [vmem:[%s9628_s15 + $0x160] sm:$0xff] }
 0x5d7   : > { %7817 = vmatprep.subr.bf16.mxu1 %v8473_v51 }
 0x5d8   : > { %7771 = vmatpush3.bf16.msra.mxu0 %v7770_v15  ;;  %v2950_v15 = vld [vmem:[%s9625_s3 + $0x48] sm:$0xff]  ;;  %s9629_s3 = sld [smem:[#allocation26_spill]] }
 0x5d9   : > { %6966 = vmatprep.subr.mxu0 %v8475_v52 }
 0x5da   : > { %7819 = vmatpush3.bf16.msra.mxu1 %v7818_v41  ;;  %v7884_v41 = vpack.c.bf16 %v3114_v40, %v3113_v39  ;;  %v5975_v40 = vld [vmem:[%s9628_s15 + $0x170] sm:$0xff] }
 0x5db   : > { %6929 = vmatmul.mubr.f32.vlgmr.msra.gmra.mrb[16].mxu0 %v2529_v62  ;;  %7046 = vmatprep.subr.mxu1 %v8475_v52  ;;  %v2862_v62 = vld [vmem:[%s9626_s5] sm:$0x3]  ;;  %s5820_s5 = sshll.u32 %s8883_s26, 1 }
 0x5dc   : > { %6967 = vmatpush3.msra.mxu0 %v8895_v60  ;;  %6968 = vmatprep.mubr.msk.f32.mxu0 %vm8474_vm2, %v8475_v52  ;;  %s9161_s6 = scalar_lea.vmem [#allocation6], %s5820_s5  ;;  %s9633_s5 = sld [smem:[#allocation30_spill]] }
 0x5dd   : > { %7006 = vmatprep.subr.mxu0 %v8475_v52 }
 0x5df   : > { %6969 = vmatmul.mubr.msk.f32.vlgmr.msra.gmra.mrb[18].mxu0 %vm2206_vm3, %v5916_v16  ;;  %v7833_v16 = vpack.c.bf16 %v2950_v15, %v2949_v14  ;;  %v5956_v15 = vld [vmem:[%s9628_s15 + $0xf0] sm:$0xff] }
 0x5e0   : > { %7008 = vmatprep.mubr.msk.f32.mxu0 %vm8474_vm2, %v8475_v52 }
 0x68e   : > { %v2362_v42 = vpop.f32.mrb[14].mxu0 }
 0x68f   : > { %2367 = vst.msk [vmem:[%s9022_s10] sm:$0xf] %vm2366_vm4, %v2362_v42  ;;  %v6885_v43 = vpop.f32.mrb[15].mxu0  ;;  %v2686_v44 = vpop.f32.mrb[16].mxu1  ;;  %v3115_v42 = vld [vmem:[%s9628_s15 + $0x60] sm:$0xff] }
 0x690   : > { %v6965_v45 = vpop.f32.mrb[17].mxu1  ;;  %v3116_v43 = vld [vmem:[%s9628_s15 + $0x68] sm:$0xff] }
 0x691   : > { %v3117_v45 = vld [vmem:[%s9628_s15 + $0x70] sm:$0xff] }
 0x6ae   : > { %v2616_v46 = vpop.f32.mrb[16].mxu0 }
 0x6af   : > { %v2687_v47 = vadd.f32 %v2686_v44, %v2616_v46  ;;  %v6930_v48 = vpop.f32.mrb[17].mxu0  ;;  %v7887_v44 = vpack.c.bf16 %v3116_v43, %v3115_v42  ;;  %v3118_v46 = vld [vmem:[%s9628_s15 + $0x78] sm:$0xff] }
 0x6b0   : > { %v5942_v48 = vld [vmem:[%s9628_s15 + $0x80] sm:$0xff] }
 0x6b2   : > { %v2761_v49 = vpop.f32.mrb[18].mxu0 }
 0x6b3   : > { %v6970_v50 = vpop.f32.mrb[19].mxu0  ;;  %7004 = vmatmul.mubr.f32.vlgmr.msra.gmra.mrb[18].mxu1 %v2761_v49  ;;  %v5943_v49 = vld [vmem:[%s9628_s15 + $0x88] sm:$0xff] }
 0x6b4   : > { %7048 = vmatprep.mubr.msk.f32.mxu1 %vm8474_vm2, %v8475_v52  ;;  %v7845_v50 = vpack.c.bf16 %v5943_v49, %v5942_v48 }
 0x786   : > { %v2848_v53 = vpop.f32.mrb[18].mxu1 }
 0x787   : > { %v2852_v55 = vadd.f32 %v2848_v53, %v2687_v47  ;;  %v7005_v56 = vpop.f32.mrb[19].mxu1  ;;  %v7890_v47 = vpack.c.bf16 %v3118_v46, %v3117_v45  ;;  %v5944_v53 = vld [vmem:[%s9628_s15 + $0x90] sm:$0xff] }
 0x789   : > { %v2860_v57 = vadd.f32 %v5934_v54, %v2852_v55  ;;  %v5945_v54 = vld [vmem:[%s9628_s15 + $0x98] sm:$0xff] }
 0x78a   : > { %v7848_v58 = vpack.c.bf16 %v5945_v54, %v5944_v53 }
 0x78b   : > { %v9030_v61 = vmax.f32 %v2860_v57, 0.0 }
 0x78d   : > { %7007 = vmatpush3.msk.msra.mxu0 %vm2867_vm5, %v9030_v61  ;;  %7047 = vmatpush3.msk.msra.mxu1 %vm2867_vm5, %v9030_v61 }
 0x78e   : > { %7009 = vmatmul.mubr.msk.f32.vlgmr.msra.gmra.mrb[20].mxu0 %vm2863_vm6, %v2862_v62  ;;  %7051 = vmatprep.subr.mxu1 %v8475_v52  ;;  %v5946_v62 = vld [vmem:[%s9628_s15 + $0xa0] sm:$0xff] }
 0x78f   : > { %7049 = vmatmul.mubr.msk.f32.vlgmr.msra.gmra.mrb[20].mxu1 %vm2863_vm6, %v3029_v63  ;;  %7820 = vmatprep.subr.bf16.mxu0 %v8473_v51  ;;  %v5947_v63 = vld [vmem:[%s9628_s15 + $0xa8] sm:$0xff] }
 0x790   : > { %7052 = vmatpush3.msk.msra.mxu1 %vm2867_vm5, %v9030_v61  ;;  %7053 = vmatprep.mubr.msk.f32.mxu1 %vm8474_vm2, %v8475_v52  ;;  %v7851_v1 = vpack.c.bf16 %v5947_v63, %v5946_v62  ;;  %v3523_v62 = vld [vmem:[%s9630_s8] sm:$0xff] }
 0x791   : > { %7822 = vmatpush3.bf16.msra.mxu0 %v7821_v0  ;;  %7868 = vmatprep.subr.bf16.mxu1 %v8473_v51  ;;  %v5983_v63 = vld [vmem:[%s9631_s9 + $0x40] sm:$0xff] }
 0x792   : > { %7823 = vmatprep.subr.bf16.mxu0 %v8473_v51  ;;  %7043 = vmatprep.mubr.msk.f32.mxu0 %vm8474_vm2, %v8475_v52 }
 0x793   : > { %7054 = vmatmul.mubr.msk.f32.vlgmr.msra.gmra.mrb[22].mxu1 %vm2863_vm6, %v5939_v5  ;;  %v7854_v5 = vpack.c.bf16 %v5949_v4, %v5948_v3  ;;  %v5985_v4 = vld [vmem:[%s9631_s9 + $0x50] sm:$0xff] }
 0x794   : > { %7870 = vmatpush3.bf16.msra.mxu1 %v7869_v6  ;;  %7123 = vmatprep.mubr.msk.f32.mxu1 %vm8474_vm2, %v8475_v52  ;;  %v5950_v6 = vld [vmem:[%s9628_s15 + $0xc0] sm:$0xff] }
 0x795   : > { %7825 = vmatpush3.bf16.msra.mxu0 %v7824_v7  ;;  %7871 = vmatprep.subr.bf16.mxu1 %v8473_v51  ;;  %v5951_v7 = vld [vmem:[%s9628_s15 + $0xc8] sm:$0xff] }
 0x796   : > { %7826 = vmatprep.subr.bf16.mxu0 %v8473_v51  ;;  %v7857_v8 = vpack.c.bf16 %v5951_v7, %v5950_v6  ;;  %v5987_v7 = vld [vmem:[%s9631_s9 + $0x60] sm:$0xff] }
 0x798   : > { %7873 = vmatpush3.bf16.msra.mxu1 %v7872_v29  ;;  %v5968_v29 = vld [vmem:[%s9628_s15 + $0x138] sm:$0xff] }
 0x799   : > { %7828 = vmatpush3.bf16.msra.mxu0 %v7827_v10  ;;  %7874 = vmatprep.subr.bf16.mxu1 %v8473_v51  ;;  %v5953_v10 = vld [vmem:[%s9628_s15 + $0xd8] sm:$0xff]  ;;  %v7902_v30 = vpack.c.bf16 %v5968_v29, %v5967_v28  ;;  %v3606_v29 = vld [vmem:[%s9631_s9 + $0x30] sm:$0xff] }
 0x79a   : > { %7829 = vmatprep.subr.bf16.mxu0 %v8473_v51  ;;  %v7860_v11 = vpack.c.bf16 %v5953_v10, %v5952_v9  ;;  %v5989_v10 = vld [vmem:[%s9631_s9 + $0x70] sm:$0xff] }
 0x79c   : > { %7876 = vmatpush3.bf16.msra.mxu1 %v7875_v32  ;;  %v5970_v32 = vld [vmem:[%s9628_s15 + $0x148] sm:$0xff] }
 0x79d   : > { %7831 = vmatpush3.bf16.msra.mxu0 %v7830_v13  ;;  %7877 = vmatprep.subr.bf16.mxu1 %v8473_v51  ;;  %v5955_v13 = vld [vmem:[%s9628_s15 + $0xe8] sm:$0xff]  ;;  %v7905_v33 = vpack.c.bf16 %v5970_v32, %v5969_v31  ;;  %v5996_v32 = vld [vmem:[%s9631_s9 + $0x80] sm:$0xff] }
 0x79e   : > { %7832 = vmatprep.subr.bf16.mxu0 %v8473_v51  ;;  %v7863_v14 = vpack.c.bf16 %v5955_v13, %v5954_v12 }
 0x7a0   : > { %7879 = vmatpush3.bf16.msra.mxu1 %v7878_v35  ;;  %v5972_v35 = vld [vmem:[%s9628_s15 + $0x158] sm:$0xff] }
 0x7a1   : > { %7834 = vmatpush3.bf16.msra.mxu0 %v7833_v16  ;;  %7880 = vmatprep.subr.bf16.mxu1 %v8473_v51  ;;  %v5957_v16 = vld [vmem:[%s9628_s15 + $0xf8] sm:$0xff]  ;;  %v7908_v36 = vpack.c.bf16 %v5972_v35, %v5971_v34  ;;  %v5998_v35 = vld [vmem:[%s9631_s9 + $0x90] sm:$0xff] }
 0x7a2   : > { %7835 = vmatprep.subr.bf16.mxu0 %v8473_v51  ;;  %v7866_v17 = vpack.c.bf16 %v5957_v16, %v5956_v15  ;;  %v3601_v15 = vld [vmem:[%s9631_s9 + $0x8] sm:$0xff] }
 0x7a4   : > { %7882 = vmatpush3.bf16.msra.mxu1 %v7881_v38  ;;  %v5974_v38 = vld [vmem:[%s9628_s15 + $0x168] sm:$0xff] }
 0x7a5   : > { %7837 = vmatpush3.bf16.msra.mxu0 %v7836_v19  ;;  %7883 = vmatprep.subr.bf16.mxu1 %v8473_v51  ;;  %v5961_v19 = vld [vmem:[%s9628_s15 + $0x100] sm:$0xff]  ;;  %v7911_v39 = vpack.c.bf16 %v5974_v38, %v5973_v37 }
 0x7a6   : > { %7838 = vmatprep.subr.bf16.mxu0 %v8473_v51  ;;  %v6000_v38 = vld [vmem:[%s9631_s9 + $0xa0] sm:$0xff] }
 0x7a8   : > { %7885 = vmatpush3.bf16.msra.mxu1 %v7884_v41  ;;  %v5976_v41 = vld [vmem:[%s9628_s15 + $0x178] sm:$0xff] }
 0x7a9   : > { %7840 = vmatpush3.bf16.msra.mxu0 %v7839_v23  ;;  %7886 = vmatprep.subr.bf16.mxu1 %v8473_v51  ;;  %v7893_v23 = vpack.c.bf16 %v5962_v21, %v5961_v19  ;;  %v7914_v42 = vpack.c.bf16 %v5976_v41, %v5975_v40  ;;  %v3602_v21 = vld [vmem:[%s9631_s9 + $0x10] sm:$0xff] }
 0x7aa   : > { %7841 = vmatprep.subr.bf16.mxu0 %v8473_v51  ;;  %v6002_v41 = vld [vmem:[%s9631_s9 + $0xb0] sm:$0xff] }
 0x7ac   : > { %7888 = vmatpush3.bf16.msra.mxu1 %v7887_v44 }
 0x7ad   : > { %7843 = vmatpush3.bf16.msra.mxu0 %v7842_v26  ;;  %7889 = vmatprep.subr.bf16.mxu1 %v8473_v51  ;;  %v5966_v26 = vld [vmem:[%s9628_s15 + $0x128] sm:$0xff] }
 0x7ae   : > { %7844 = vmatprep.subr.bf16.mxu0 %v8473_v51  ;;  %v7899_v27 = vpack.c.bf16 %v5966_v26, %v5965_v25  ;;  %v3604_v26 = vld [vmem:[%s9631_s9 + $0x20] sm:$0xff] }
 0x7b0   : > { %7891 = vmatpush3.bf16.msra.mxu1 %v7890_v47 }
 0x7b1   : > { %7892 = vmatprep.subr.bf16.mxu1 %v8473_v51 }
 0x861   : > { %v2937_v55 = vpop.f32.mrb[20].mxu0 }
 0x862   : > { %v7010_v56 = vpop.f32.mrb[21].mxu0  ;;  %7044 = vmatmul.mubr.f32.vlgmr.msra.gmra.mrb[22].mxu0 %v2937_v55  ;;  %v3099_v57 = vpop.f32.mrb[20].mxu1  ;;  %v5977_v55 = vld [vmem:[%s9629_s3] ss:$0 sm:$0xff]  ;;  %s9632_s3 = sld [smem:[#allocation29_spill]] }
 0x863   : > { %7846 = vmatpush3.bf16.msra.mxu0 %v7845_v50  ;;  %v7050_v59 = vpop.f32.mrb[21].mxu1  ;;  %7124 = vmatmul.mubr.f32.vlgmr.msra.gmra.mrb[24].mxu1 %v3099_v57 }
 0x864   : > { %7847 = vmatprep.subr.bf16.mxu0 %v8473_v51  ;;  %7088 = vmatprep.mubr.msk.f32.mxu0 %vm8474_vm2, %v8475_v52 }
 0x865   : > { %7163 = vmatprep.mubr.msk.f32.mxu1 %vm8474_vm2, %v8475_v52  ;;  %7894 = vmatpush3.bf16.msra.mxu1 %v7893_v23 }
 0x866   : > { %v3190_v0 = vpop.f32.mrb[22].mxu1  ;;  %7895 = vmatprep.subr.bf16.mxu1 %v8473_v51 }
 0x867   : > { %7849 = vmatpush3.bf16.msra.mxu0 %v7848_v58  ;;  %v7055_v2 = vpop.f32.mrb[23].mxu1 }
 0x868   : > { %7850 = vmatprep.subr.bf16.mxu0 %v8473_v51  ;;  %v5980_v2 = vld [vmem:[%s9630_s8 + $0x8] sm:$0xff] }
 0x869   : > { %v6006_v13 = vld [vmem:[%s9632_s3 + $0x8] sm:$0xff] }
 0x86b   : > { %7852 = vmatpush3.bf16.msra.mxu0 %v7851_v1  ;;  %v5993_v1 = vld [vmem:[%s9630_s8 + $0x10] sm:$0xff]  ;;  %s9635_s8 = sld [smem:[#allocation31_spill]] }
 0x86c   : > { %7853 = vmatprep.subr.bf16.mxu0 %v8473_v51 }
 0x86f   : > { %7855 = vmatpush3.bf16.msra.mxu0 %v7854_v5  ;;  %v5986_v5 = vld [vmem:[%s9631_s9 + $0x58] sm:$0xff] }
 0x870   : > { %7856 = vmatprep.subr.bf16.mxu0 %v8473_v51  ;;  %v7920_v6 = vpack.c.bf16 %v5986_v5, %v5985_v4  ;;  %v4077_v4 = vld [vmem:[%s9633_s5 + $0x38] sm:$0xff] }
 0x873   : > { %7858 = vmatpush3.bf16.msra.mxu0 %v7857_v8  ;;  %v5988_v8 = vld [vmem:[%s9631_s9 + $0x68] sm:$0xff] }
 0x874   : > { %7859 = vmatprep.subr.bf16.mxu0 %v8473_v51  ;;  %v7923_v9 = vpack.c.bf16 %v5988_v8, %v5987_v7  ;;  %v6015_v7 = vld [vmem:[%s9633_s5 + $0xb8] sm:$0xff]  ;;  %v4078_v8 = vld [vmem:[%s9633_s5 + $0x40] sm:$0xff] }
 0x877   : > { %7861 = vmatpush3.bf16.msra.mxu0 %v7860_v11  ;;  %v5990_v11 = vld [vmem:[%s9631_s9 + $0x78] sm:$0xff] }
 0x878   : > { %7862 = vmatprep.subr.bf16.mxu0 %v8473_v51  ;;  %v7926_v12 = vpack.c.bf16 %v5990_v11, %v5989_v10  ;;  %v4079_v10 = vld [vmem:[%s9633_s5 + $0x48] sm:$0xff]  ;;  %v6016_v11 = vld [vmem:[%s9633_s5 + $0xc0] sm:$0xff] }
 0x87b   : > { %7864 = vmatpush3.bf16.msra.mxu0 %v7863_v14  ;;  %v3600_v14 = vld [vmem:[%s9631_s9] sm:$0xff] }
 0x87c   : > { %7865 = vmatprep.subr.bf16.mxu0 %v8473_v51 }
 0x87f   : > { %7867 = vmatpush3.bf16.msra.mxu0 %v7866_v17 }
 0x880   : > { %7126 = vmatprep.subr.mxu0 %v8475_v52 }
 0x882   : > { %7089 = vmatmul.mubr.f32.vlgmr.msra.gmra.mrb[24].mxu0 %v3190_v0  ;;  %v5984_v0 = vld [vmem:[%s9631_s9 + $0x48] sm:$0xff] }
 0x883   : > { %7127 = vmatpush3.msk.msra.mxu0 %vm2867_vm5, %v9030_v61  ;;  %7128 = vmatprep.mubr.msk.f32.mxu0 %vm8474_vm2, %v8475_v52  ;;  %v5964_v61 = vld [vmem:[%s9628_s15 + $0x118] sm:$0xff]  ;;  %v7917_v3 = vpack.c.bf16 %v5984_v0, %v5983_v63  ;;  %v6012_v0 = vld [vmem:[%s9633_s5 + $0xa0] sm:$0xff] }
 0x884   : > { %7166 = vmatprep.subr.mxu0 %v8475_v52  ;;  %v7896_v24 = vpack.c.bf16 %v5964_v61, %v5963_v22  ;;  %v3603_v22 = vld [vmem:[%s9631_s9 + $0x18] sm:$0xff] }
 0x885   : > { %v7932_v25 = vpack.c.bf16 %v3603_v22, %v3602_v21  ;;  %v4082_v21 = vld [vmem:[%s9633_s5 + $0x60] sm:$0xff]  ;;  %v4083_v22 = vld [vmem:[%s9633_s5 + $0x68] sm:$0xff] }
 0x886   : > { %7129 = vmatmul.mubr.msk.f32.vlgmr.msra.gmra.mrb[26].mxu0 %vm2863_vm6, %v5958_v18  ;;  %7897 = vmatpush3.bf16.msra.mxu1 %v7896_v24  ;;  %v7929_v18 = vpack.c.bf16 %v3601_v15, %v3600_v14  ;;  %v4080_v14 = vld [vmem:[%s9633_s5 + $0x50] sm:$0xff]  ;;  %v4081_v15 = vld [vmem:[%s9633_s5 + $0x58] sm:$0xff] }
 0x887   : > { %7168 = vmatprep.mubr.msk.f32.mxu0 %vm8474_vm2, %v8475_v52  ;;  %7898 = vmatprep.subr.bf16.mxu1 %v8473_v51 }
 0x88a   : > { %7900 = vmatpush3.bf16.msra.mxu1 %v7899_v27  ;;  %v3605_v27 = vld [vmem:[%s9631_s9 + $0x28] sm:$0xff] }
 0x88b   : > { %7901 = vmatprep.subr.bf16.mxu1 %v8473_v51  ;;  %v7935_v28 = vpack.c.bf16 %v3605_v27, %v3604_v26  ;;  %v4084_v27 = vld [vmem:[%s9633_s5 + $0x70] sm:$0xff] }
 0x88e   : > { %7903 = vmatpush3.bf16.msra.mxu1 %v7902_v30  ;;  %v3607_v30 = vld [vmem:[%s9631_s9 + $0x38] sm:$0xff] }
 0x88f   : > { %7904 = vmatprep.subr.bf16.mxu1 %v8473_v51  ;;  %v7938_v31 = vpack.c.bf16 %v3607_v30, %v3606_v29  ;;  %v6022_v30 = vld [vmem:[%s9633_s5 + $0xf0] sm:$0xff] }
 0x892   : > { %7906 = vmatpush3.bf16.msra.mxu1 %v7905_v33  ;;  %v5997_v33 = vld [vmem:[%s9631_s9 + $0x88] sm:$0xff] }
 0x893   : > { %7907 = vmatprep.subr.bf16.mxu1 %v8473_v51  ;;  %v7941_v34 = vpack.c.bf16 %v5997_v33, %v5996_v32 }
 0x896   : > { %7909 = vmatpush3.bf16.msra.mxu1 %v7908_v36  ;;  %v5999_v36 = vld [vmem:[%s9631_s9 + $0x98] sm:$0xff] }
 0x897   : > { %7910 = vmatprep.subr.bf16.mxu1 %v8473_v51  ;;  %v7944_v37 = vpack.c.bf16 %v5999_v36, %v5998_v35 }
 0x89a   : > { %7912 = vmatpush3.bf16.msra.mxu1 %v7911_v39  ;;  %v6001_v39 = vld [vmem:[%s9631_s9 + $0xa8] sm:$0xff] }
 0x89b   : > { %7913 = vmatprep.subr.bf16.mxu1 %v8473_v51  ;;  %v7947_v40 = vpack.c.bf16 %v6001_v39, %v6000_v38 }
 0x89e   : > { %7915 = vmatpush3.bf16.msra.mxu1 %v7914_v42  ;;  %v6003_v42 = vld [vmem:[%s9631_s9 + $0xb8] sm:$0xff]  ;;  %s9636_s9 = sld [smem:[#allocation33_spill]] }
 0x89f   : > { %7214 = vmatprep.subr.mxu1 %v8475_v52 }
 0x935   : > { %v3023_v43 = vpop.f32.mrb[22].mxu0 }
 0x936   : > { %3028 = vst.msk [vmem:[%s9161_s6] sm:$0x3] %vm3027_vm7, %v3023_v43  ;;  %v7045_v44 = vpop.f32.mrb[23].mxu0  ;;  %v3347_v45 = vpop.f32.mrb[24].mxu1  ;;  %v7950_v43 = vpack.c.bf16 %v6003_v42, %v6002_v41 }
 0x937   : > { %v7125_v46 = vpop.f32.mrb[25].mxu1  ;;  %v3996_v44 = vld [vmem:[%s9632_s3] sm:$0xff] }
 0x938   : > { %v4071_v46 = vld [vmem:[%s9633_s5 + $0x8] sm:$0xff] }
 0x955   : > { %v3277_v47 = vpop.f32.mrb[24].mxu0 }
 0x956   : > { %v3348_v48 = vadd.f32 %v3347_v45, %v3277_v47  ;;  %v7090_v49 = vpop.f32.mrb[25].mxu0  ;;  %v4070_v45 = vld [vmem:[%s9633_s5] sm:$0xff] }
 0x957   : > { %v6008_v47 = vld [vmem:[%s9633_s5 + $0x80] sm:$0xff]  ;;  %v6009_v49 = vld [vmem:[%s9633_s5 + $0x88] sm:$0xff] }
 0x959   : > { %v3422_v50 = vpop.f32.mrb[26].mxu0 }
 0x95a   : > { %v7130_v53 = vpop.f32.mrb[27].mxu0  ;;  %7164 = vmatmul.mubr.f32.vlgmr.msra.gmra.mrb[26].mxu1 %v3422_v50  ;;  %v4072_v50 = vld [vmem:[%s9633_s5 + $0x10] sm:$0xff] }
 0x95b   : > { %7216 = vmatprep.mubr.msk.f32.mxu1 %vm8474_vm2, %v8475_v52  ;;  %v4073_v53 = vld [vmem:[%s9633_s5 + $0x18] sm:$0xff] }
 0xa2d   : > { %v3509_v54 = vpop.f32.mrb[26].mxu1 }
 0xa2e   : > { %v3513_v56 = vadd.f32 %v3509_v54, %v3348_v48  ;;  %v7165_v57 = vpop.f32.mrb[27].mxu1  ;;  %v7953_v48 = vpack.c.bf16 %v4071_v46, %v4070_v45  ;;  %v7977_v54 = vpack.c.bf16 %v6009_v49, %v6008_v47  ;;  %v6024_v47 = vld [vmem:[%s9632_s3 + $0x10] sm:$0xff]  ;;  %s9634_s3 = sld [smem:[#allocation32_spill]] }
 0xa2f   : > { %v7956_v57 = vpack.c.bf16 %v4073_v53, %v4072_v50  ;;  %v6028_v49 = vld [vmem:[%s9633_s5 + $0x110] sm:$0xff]  ;;  %v6029_v50 = vld [vmem:[%s9633_s5 + $0x118] sm:$0xff] }
 0xa30   : > { %v3521_v58 = vadd.f32 %v5977_v55, %v3513_v56  ;;  %v6010_v55 = vld [vmem:[%s9633_s5 + $0x90] sm:$0xff]  ;;  %v6011_v56 = vld [vmem:[%s9633_s5 + $0x98] sm:$0xff]  ;;  %v8004_v53 = vpack.c.bf16 %v6029_v50, %v6028_v49 }
 0xa31   : > { %v4577_v49 = vld [vmem:[%s9636_s9 + $0x10] sm:$0xff]  ;;  %v4578_v50 = vld [vmem:[%s9636_s9 + $0x18] sm:$0xff] }
 0xa32   : > { %v3522_v59 = vmax.f32 %v3521_v58, 0.0  ;;  %v7980_v58 = vpack.c.bf16 %v6011_v56, %v6010_v55  ;;  %v6032_v56 = vld [vmem:[%s9633_s5 + $0x130] sm:$0xff] }
 0xa34   : > { %7167 = vmatpush3.msk.msra.mxu0 %vm2867_vm5, %v3522_v59  ;;  %7215 = vmatpush3.msk.msra.mxu1 %vm2867_vm5, %v3522_v59 }
 0xa35   : > { %7169 = vmatmul.mubr.msk.f32.vlgmr.msra.gmra.mrb[28].mxu0 %vm2863_vm6, %v3523_v62  ;;  %7171 = vmatprep.subr.mxu0 %v8475_v52  ;;  %v4075_v62 = vld [vmem:[%s9633_s5 + $0x28] sm:$0xff] }
 0xa36   : > { %7278 = vmatprep.subr.mxu1 %v8475_v52  ;;  %7172 = vmatpush3.msk.msra.mxu0 %vm2867_vm5, %v3522_v59  ;;  %v4074_v59 = vld [vmem:[%s9633_s5 + $0x20] sm:$0xff] }
 0xa37   : > { %7217 = vmatmul.mubr.msk.f32.vlgmr.msra.gmra.mrb[28].mxu1 %vm2863_vm6, %v5993_v1  ;;  %7173 = vmatprep.mubr.msk.f32.mxu0 %vm8474_vm2, %v8475_v52  ;;  %v7959_v63 = vpack.c.bf16 %v4075_v62, %v4074_v59  ;;  %v6013_v1 = vld [vmem:[%s9633_s5 + $0xa8] sm:$0xff]  ;;  %v6034_v59 = vld [vmem:[%s9633_s5 + $0x140] sm:$0xff] }
 0xa38   : > { %7279 = vmatpush3.msra.mxu1 %v8895_v60  ;;  %7916 = vmatprep.subr.bf16.mxu0 %v8473_v51 }
 0xa39   : > { %7174 = vmatmul.mubr.msk.f32.vlgmr.msra.gmra.mrb[30].mxu0 %vm2863_vm6, %v5980_v2  ;;  %7280 = vmatprep.mubr.msk.f32.mxu1 %vm8474_vm2, %v8475_v52  ;;  %v7983_v2 = vpack.c.bf16 %v6013_v1, %v6012_v0  ;;  %v6037_v0 = vld [vmem:[%s9633_s5 + $0x158] sm:$0xff] }
 0xa3a   : > { %7918 = vmatpush3.bf16.msra.mxu0 %v7917_v3  ;;  %7192 = vmatprep.mubr.msk.f32.mxu0 %vm8474_vm2, %v8475_v52  ;;  %v4076_v3 = vld [vmem:[%s9633_s5 + $0x30] sm:$0xff] }
 0xa3b   : > { %7919 = vmatprep.subr.bf16.mxu0 %v8473_v51  ;;  %7976 = vmatprep.subr.bf16.mxu1 %v8473_v51  ;;  %v7962_v5 = vpack.c.bf16 %v4077_v4, %v4076_v3  ;;  %v6039_v3 = vld [vmem:[%s9633_s5 + $0x168] sm:$0xff] }
 0xa3c   : > { %7281 = vmatmul.mubr.msk.f32.vlgmr.msra.gmra.mrb[30].mxu1 %vm2206_vm3, %v6006_v13  ;;  %v7965_v13 = vpack.c.bf16 %v4079_v10, %v4078_v8 }
 0xa3d   : > { %7315 = vmatprep.mubr.msk.f32.mxu1 %vm8474_vm2, %v8475_v52  ;;  %7978 = vmatpush3.bf16.msra.mxu1 %v7977_v54  ;;  %v6031_v54 = vld [vmem:[%s9633_s5 + $0x128] sm:$0xff] }
 0xa3e   : > { %7921 = vmatpush3.bf16.msra.mxu0 %v7920_v6  ;;  %7979 = vmatprep.subr.bf16.mxu1 %v8473_v51  ;;  %v6014_v6 = vld [vmem:[%s9633_s5 + $0xb0] sm:$0xff] }
 0xa3f   : > { %7922 = vmatprep.subr.bf16.mxu0 %v8473_v51 }
 0xa41   : > { %7981 = vmatpush3.bf16.msra.mxu1 %v7980_v58 }
 0xa42   : > { %7924 = vmatpush3.bf16.msra.mxu0 %v7923_v9  ;;  %7982 = vmatprep.subr.bf16.mxu1 %v8473_v51  ;;  %v7986_v9 = vpack.c.bf16 %v6015_v7, %v6014_v6  ;;  %v6041_v6 = vld [vmem:[%s9633_s5 + $0x178] sm:$0xff] }
 0xa43   : > { %7925 = vmatprep.subr.bf16.mxu0 %v8473_v51 }
 0xa45   : > { %7984 = vmatpush3.bf16.msra.mxu1 %v7983_v2  ;;  %v6038_v2 = vld [vmem:[%s9633_s5 + $0x160] sm:$0xff] }
 0xa46   : > { %7927 = vmatpush3.bf16.msra.mxu0 %v7926_v12  ;;  %7985 = vmatprep.subr.bf16.mxu1 %v8473_v51  ;;  %v6017_v12 = vld [vmem:[%s9633_s5 + $0xc8] sm:$0xff]  ;;  %v8019_v4 = vpack.c.bf16 %v6039_v3, %v6038_v2 }
 0xa47   : > { %7928 = vmatprep.subr.bf16.mxu0 %v8473_v51 }
 0xa49   : > { %7987 = vmatpush3.bf16.msra.mxu1 %v7986_v9 }
 0xa4a   : > { %7988 = vmatprep.subr.bf16.mxu1 %v8473_v51 }
 0xb08   : > { %v3596_v16 = vpop.f32.mrb[28].mxu0 }
 0xb09   : > { %v7170_v17 = vpop.f32.mrb[29].mxu0 }
 0xb0a   : > { %v3909_v19 = vpop.f32.mrb[28].mxu1  ;;  %v7968_v17 = vpack.c.bf16 %v4081_v15, %v4080_v14 }
 0xb0b   : > { %v7218_v23 = vpop.f32.mrb[29].mxu1 }
 0xb0c   : > { %v3679_v61 = vpop.f32.mrb[30].mxu0 }
 0xb0d   : > { %v7175_v24 = vpop.f32.mrb[31].mxu0  ;;  %7193 = vmatmul.mubr.msk.f32.vlgmr.msra.gmra.mrb[32].mxu0 %vm1200_vm1, %v3679_v61  ;;  %v7971_v61 = vpack.c.bf16 %v4083_v22, %v4082_v21 }
 0xb0e   : > { %7930 = vmatpush3.bf16.msra.mxu0 %v7929_v18  ;;  %7211 = vmatprep.mubr.msk.f32.mxu0 %vm8474_vm2, %v8475_v52  ;;  %v6018_v18 = vld [vmem:[%s9633_s5 + $0xd0] sm:$0xff]  ;;  %v6020_v24 = vld [vmem:[%s9633_s5 + $0xe0] sm:$0xff] }
 0xb0f   : > { %7931 = vmatprep.subr.bf16.mxu0 %v8473_v51  ;;  %v4228_v33 = vpop.f32.mrb[30].mxu1 }
 0xb12   : > { %7933 = vmatpush3.bf16.msra.mxu0 %v7932_v25  ;;  %v6021_v25 = vld [vmem:[%s9633_s5 + $0xe8] sm:$0xff] }
 0xb13   : > { %7934 = vmatprep.subr.bf16.mxu0 %v8473_v51  ;;  %v7995_v26 = vpack.c.bf16 %v6021_v25, %v6020_v24  ;;  %v6049_v24 = vld [vmem:[%s9636_s9 + $0x40] sm:$0xff]  ;;  %v6050_v25 = vld [vmem:[%s9636_s9 + $0x48] sm:$0xff] }
 0xb16   : > { %7936 = vmatpush3.bf16.msra.mxu0 %v7935_v28  ;;  %v4085_v28 = vld [vmem:[%s9633_s5 + $0x78] sm:$0xff] }
 0xb17   : > { %7937 = vmatprep.subr.bf16.mxu0 %v8473_v51  ;;  %v7974_v29 = vpack.c.bf16 %v4085_v28, %v4084_v27  ;;  %v6045_v27 = vld [vmem:[%s9634_s3 + $0x10] sm:$0xff] }
 0xb1a   : > { %7939 = vmatpush3.bf16.msra.mxu0 %v7938_v31  ;;  %v6023_v31 = vld [vmem:[%s9633_s5 + $0xf8] sm:$0xff] }
 0xb1b   : > { %7940 = vmatprep.subr.bf16.mxu0 %v8473_v51  ;;  %v7998_v32 = vpack.c.bf16 %v6023_v31, %v6022_v30  ;;  %v8024_v30 = vpack.c.bf16 %v6050_v25, %v6049_v24  ;;  %v6051_v31 = vld [vmem:[%s9636_s9 + $0x50] sm:$0xff] }
 0xb1d   : > { %7212 = vmatmul.mubr.msk.f32.vlgmr.msra.gmra.mrb[34].mxu0 %vm1200_vm1, %v3596_v16  ;;  %v7989_v16 = vpack.c.bf16 %v6017_v12, %v6016_v11 }
 0xb1e   : > { %7942 = vmatpush3.bf16.msra.mxu0 %v7941_v34  ;;  %7235 = vmatprep.mubr.msk.f32.mxu0 %vm8474_vm2, %v8475_v52  ;;  %v7282_v34 = vpop.f32.mrb[31].mxu1 }
 0xb1f   : > { %7943 = vmatprep.subr.bf16.mxu0 %v8473_v51  ;;  %7990 = vmatpush3.bf16.msra.mxu1 %v7989_v16  ;;  %v4492_v16 = vld [vmem:[%s9634_s3] sm:$0xff] }
 0xb20   : > { %7991 = vmatprep.subr.bf16.mxu1 %v8473_v51 }
 0xb22   : > { %7945 = vmatpush3.bf16.msra.mxu0 %v7944_v37 }
 0xb23   : > { %7946 = vmatprep.subr.bf16.mxu0 %v8473_v51 }
 0xb26   : > { %7948 = vmatpush3.bf16.msra.mxu0 %v7947_v40 }
 0xb27   : > { %7949 = vmatprep.subr.bf16.mxu0 %v8473_v51 }
 0xb2a   : > { %7951 = vmatpush3.bf16.msra.mxu0 %v7950_v43  ;;  %v6026_v43 = vld [vmem:[%s9633_s5 + $0x100] sm:$0xff] }
 0xb2b   : > { %7238 = vmatprep.subr.mxu0 %v8475_v52 }
 0xb2d   : > { %7236 = vmatmul.mubr.msk.f32.vlgmr.msra.gmra.mrb[36].mxu0 %vm1200_vm1, %v3909_v19  ;;  %v6019_v19 = vld [vmem:[%s9633_s5 + $0xd8] sm:$0xff] }
 0xb2e   : > { %7239 = vmatpush3.msra.mxu0 %v8895_v60  ;;  %7240 = vmatprep.mubr.msk.f32.mxu0 %vm8474_vm2, %v8475_v52  ;;  %v7992_v23 = vpack.c.bf16 %v6019_v19, %v6018_v18  ;;  %v6042_v18 = vld [vmem:[%s9635_s8] ss:$0 sm:$0xff]  ;;  %s9638_s8 = sld [smem:[#allocation35_spill]] }
 0xb2f   : > { %7952 = vmatprep.subr.bf16.mxu0 %v8473_v51 }
 0xb30   : > { %7993 = vmatpush3.bf16.msra.mxu1 %v7992_v23 }
 0xb31   : > { %7241 = vmatmul.mubr.msk.f32.vlgmr.msra.gmra.mrb[38].mxu0 %vm2206_vm3, %v3996_v44  ;;  %7994 = vmatprep.subr.bf16.mxu1 %v8473_v51  ;;  %v6027_v44 = vld [vmem:[%s9633_s5 + $0x108] sm:$0xff] }
 0xb32   : > { %7275 = vmatprep.mubr.msk.f32.mxu0 %vm8474_vm2, %v8475_v52  ;;  %7954 = vmatpush3.bf16.msra.mxu0 %v7953_v48  ;;  %v8001_v48 = vpack.c.bf16 %v6027_v44, %v6026_v43  ;;  %v6056_v43 = vld [vmem:[%s9636_s9 + $0x78] sm:$0xff] }
 0xb33   : > { %7955 = vmatprep.subr.bf16.mxu0 %v8473_v51 }
 0xb34   : > { %7996 = vmatpush3.bf16.msra.mxu1 %v7995_v26  ;;  %v6062_v26 = vld [vmem:[%s9634_s3 + $0x28] sm:$0xff] }
 0xb35   : > { %7997 = vmatprep.subr.bf16.mxu1 %v8473_v51  ;;  %v5102_v24 = vld [vmem:[%s9638_s8 + $0x28] sm:$0xff] }
 0xb36   : > { %7957 = vmatpush3.bf16.msra.mxu0 %v7956_v57  ;;  %v6033_v57 = vld [vmem:[%s9633_s5 + $0x138] sm:$0xff] }
 0xb37   : > { %7958 = vmatprep.subr.bf16.mxu0 %v8473_v51  ;;  %v8010_v58 = vpack.c.bf16 %v6033_v57, %v6032_v56  ;;  %v8044_v56 = vpack.c.bf16 %v4578_v50, %v4577_v49  ;;  %v4579_v57 = vld [vmem:[%s9636_s9 + $0x20] sm:$0xff]  ;;  %v6087_v49 = vld [vmem:[%s9638_s8 + $0xb0] sm:$0xff]  ;;  %v6088_v50 = vld [vmem:[%s9638_s8 + $0xb8] sm:$0xff] }
 0xb38   : > { %7999 = vmatpush3.bf16.msra.mxu1 %v7998_v32  ;;  %v6052_v32 = vld [vmem:[%s9636_s9 + $0x58] sm:$0xff] }
 0xb3a   : > { %7960 = vmatpush3.bf16.msra.mxu0 %v7959_v63  ;;  %v6036_v63 = vld [vmem:[%s9633_s5 + $0x150] sm:$0xff] }
 0xb3b   : > { %7961 = vmatprep.subr.bf16.mxu0 %v8473_v51  ;;  %7316 = vmatmul.mubr.f32.vlgmr.msra.gmra.mrb[32].mxu1 %v4228_v33  ;;  %v8016_v1 = vpack.c.bf16 %v6037_v0, %v6036_v63  ;;  %v4581_v63 = vld [vmem:[%s9636_s9 + $0x30] sm:$0xff]  ;;  %v4582_v0 = vld [vmem:[%s9636_s9 + $0x38] sm:$0xff] }
 0xb3c   : > { %7360 = vmatprep.mubr.msk.f32.mxu1 %vm2206_vm3, %v4492_v16  ;;  %v8052_v3 = vpack.c.bf16 %v4582_v0, %v4581_v63  ;;  %v6072_v16 = vld [vmem:[%s9636_s9 + $0xb8] sm:$0xff]  ;;  %v6095_v63 = vld [vmem:[%s9638_s8 + $0xf0] sm:$0xff] }
 0xb3d   : > { %v6096_v0 = vld [vmem:[%s9638_s8 + $0xf8] sm:$0xff] }
 0xb3e   : > { %7963 = vmatpush3.bf16.msra.mxu0 %v7962_v5  ;;  %v6040_v5 = vld [vmem:[%s9633_s5 + $0x170] sm:$0xff] }
 0xb3f   : > { %7964 = vmatprep.subr.bf16.mxu0 %v8473_v51  ;;  %v8022_v7 = vpack.c.bf16 %v6041_v6, %v6040_v5  ;;  %v6066_v5 = vld [vmem:[%s9636_s9 + $0x88] sm:$0xff] }
 0xb42   : > { %7966 = vmatpush3.bf16.msra.mxu0 %v7965_v13 }
 0xb43   : > { %7967 = vmatprep.subr.bf16.mxu0 %v8473_v51 }
 0xb46   : > { %7969 = vmatpush3.bf16.msra.mxu0 %v7968_v17 }
 0xb47   : > { %7970 = vmatprep.subr.bf16.mxu0 %v8473_v51 }
 0xb4a   : > { %7972 = vmatpush3.bf16.msra.mxu0 %v7971_v61  ;;  %v4493_v61 = vld [vmem:[%s9634_s3 + $0x8] sm:$0xff] }
 0xb4b   : > { %7973 = vmatprep.subr.bf16.mxu0 %v8473_v51 }
 0xb4e   : > { %7975 = vmatpush3.bf16.msra.mxu0 %v7974_v29  ;;  %v6046_v29 = vld [vmem:[%s9634_s3 + $0x18] sm:$0xff] }
 0xb4f   : > { %7318 = vmatprep.subr.mxu0 %v8475_v52 }
 0xbe0   : > { %v3761_v35 = vpop.f32.mrb[32].mxu0 }
 0xbe1   : > { %v7194_v36 = vpop.f32.mrb[33].mxu0 }
 0xbe2   : > { %v6053_v36 = vld [vmem:[%s9636_s9 + $0x60] sm:$0xff] }
 0xbf0   : > { %v3834_v37 = vpop.f32.mrb[34].mxu0 }
 0xbf1   : > { %v3835_v38 = vadd.f32 %v3834_v37, %v3761_v35  ;;  %v7213_v39 = vpop.f32.mrb[35].mxu0  ;;  %v8028_v35 = vpack.c.bf16 %v6052_v32, %v6051_v31  ;;  %v6054_v37 = vld [vmem:[%s9636_s9 + $0x68] sm:$0xff]  ;;  %v5107_v32 = vld [vmem:[%s9638_s8 + $0x50] sm:$0xff] }
 0xc00   : > { %v3991_v40 = vpop.f32.mrb[36].mxu0 }
 0xc01   : > { %v3995_v41 = vadd.f32 %v3991_v40, %v3835_v38  ;;  %v7237_v42 = vpop.f32.mrb[37].mxu0  ;;  %v8032_v40 = vpack.c.bf16 %v6054_v37, %v6053_v36  ;;  %v5110_v36 = vld [vmem:[%s9638_s8 + $0x68] sm:$0xff] }
 0xc02   : > { %v6055_v42 = vld [vmem:[%s9636_s9 + $0x70] sm:$0xff] }
 0xc03   : > { %v8036_v44 = vpack.c.bf16 %v6056_v43, %v6055_v42  ;;  %v6082_v42 = vld [vmem:[%s9638_s8 + $0x88] sm:$0xff] }
 0xc04   : > { %v4066_v45 = vpop.f32.mrb[38].mxu0 }
 0xc05   : > { %v7242_v46 = vpop.f32.mrb[39].mxu0  ;;  %7276 = vmatmul.mubr.f32.vlgmr.msra.gmra.mrb[40].mxu0 %v4066_v45  ;;  %v4575_v45 = vld [vmem:[%s9636_s9] sm:$0xff] }
 0xc06   : > { %7319 = vmatpush3.msra.mxu0 %v8895_v60  ;;  %7320 = vmatprep.mubr.msk.f32.mxu0 %vm8474_vm2, %v8475_v52  ;;  %v6030_v60 = vld [vmem:[%s9633_s5 + $0x120] sm:$0xff]  ;;  %v4576_v46 = vld [vmem:[%s9636_s9 + $0x8] sm:$0xff] }
 0xc07   : > { %8000 = vmatprep.subr.bf16.mxu0 %v8473_v51  ;;  %v8007_v55 = vpack.c.bf16 %v6031_v54, %v6030_v60 }
 0xc09   : > { %7321 = vmatmul.mubr.msk.f32.vlgmr.msra.gmra.mrb[42].mxu0 %vm2206_vm3, %v6024_v47  ;;  %v8040_v47 = vpack.c.bf16 %v4576_v46, %v4575_v45  ;;  %v6084_v45 = vld [vmem:[%s9638_s8 + $0x98] sm:$0xff] }
 0xc0a   : > { %8002 = vmatpush3.bf16.msra.mxu0 %v8001_v48  ;;  %7355 = vmatprep.mubr.msk.f32.mxu0 %vm8474_vm2, %v8475_v52  ;;  %v6035_v52 = vld [vmem:[%s9633_s5 + $0x148] sm:$0xff]  ;;  %s9637_s5 = sld [smem:[#allocation34_spill]] }
 0xc0b   : > { %8003 = vmatprep.subr.bf16.mxu0 %v8473_v51  ;;  %v8013_v62 = vpack.c.bf16 %v6035_v52, %v6034_v59 }
 0xc0e   : > { %8005 = vmatpush3.bf16.msra.mxu0 %v8004_v53  ;;  %v4315_v8 = vpop.f32.mrb[32].mxu1 }
 0xc0f   : > { %8006 = vmatprep.subr.bf16.mxu0 %v8473_v51  ;;  %v7317_v9 = vpop.f32.mrb[33].mxu1 }
 0xc10   : > { %v5014_v28 = vld [vmem:[%s9637_s5] sm:$0xff]  ;;  %v5015_v33 = vld [vmem:[%s9637_s5 + $0x8] sm:$0xff]  ;;  %v6077_v34 = vld [vmem:[%s9637_s5 + $0x10] sm:$0xff] }
 0xc11   : > { %v6078_v38 = vld [vmem:[%s9637_s5 + $0x18] sm:$0xff]  ;;  %v6097_v39 = vld [vmem:[%s9637_s5 + $0x20] sm:$0xff]  ;;  %v6067_v9 = vld [vmem:[%s9636_s9 + $0x90] sm:$0xff] }
 0xc12   : > { %8008 = vmatpush3.bf16.msra.mxu0 %v8007_v55 }
 0xc13   : > { %8009 = vmatprep.subr.bf16.mxu0 %v8473_v51 }
 0xc16   : > { %8011 = vmatpush3.bf16.msra.mxu0 %v8010_v58  ;;  %v4580_v58 = vld [vmem:[%s9636_s9 + $0x28] sm:$0xff] }
 0xc17   : > { %8012 = vmatprep.subr.bf16.mxu0 %v8473_v51 }
 0xc1a   : > { %8014 = vmatpush3.bf16.msra.mxu0 %v8013_v62  ;;  %v8048_v62 = vpack.c.bf16 %v4580_v58, %v4579_v57  ;;  %v6092_v57 = vld [vmem:[%s9638_s8 + $0xd8] sm:$0xff] }
 0xc1b   : > { %8015 = vmatprep.subr.bf16.mxu0 %v8473_v51 }
 0xc1e   : > { %8017 = vmatpush3.bf16.msra.mxu0 %v8016_v1 }
 0xc1f   : > { %8018 = vmatprep.subr.bf16.mxu0 %v8473_v51 }
 0xc22   : > { %8020 = vmatpush3.bf16.msra.mxu0 %v8019_v4  ;;  %v6065_v4 = vld [vmem:[%s9636_s9 + $0x80] sm:$0xff] }
 0xc23   : > { %8021 = vmatprep.subr.bf16.mxu0 %v8473_v51  ;;  %v6061_v51 = vld [vmem:[%s9634_s3 + $0x20] sm:$0xff]  ;;  %s5614_s3 = sshll.u32 %s9161_s6, 4  ;;  %s9446_s3 = int_to_ptr.vmem [resolvable:$true] %s5614_s3 }
 0xc26   : > { %8023 = vmatpush3.bf16.msra.mxu0 %v8022_v7 }
 0xcd8   : > { %v4152_v10 = vpop.f32.mrb[40].mxu0 }
 0xcd9   : > { %v4156_v11 = vadd.f32 %v4152_v10, %v3995_v41  ;;  %v7277_v12 = vpop.f32.mrb[41].mxu0  ;;  %v6098_v41 = vld [vmem:[%s9637_s5 + $0x28] sm:$0xff]  ;;  %v6068_v10 = vld [vmem:[%s9636_s9 + $0x98] sm:$0xff]  ;;  %s5564_s5 = sand.u32 1, %s8673_s0  }
 0xcda   : > { %v6069_v12 = vld [vmem:[%s9636_s9 + $0xa0] sm:$0xff]  ;;  %s9453_s15 = scalar_lea.sflag [#allocation5], %s5564_s5 }
 0xcdb   : > { %v4319_v13 = vadd.f32 %v4315_v8, %v4156_v11  ;;  %v8056_v8 = vpack.c.bf16 %v6066_v5, %v6065_v4  ;;  %v8060_v11 = vpack.c.bf16 %v6068_v10, %v6067_v9  ;;  %v6102_v4 = vld [vmem:[%s9638_s8 + $0x108] sm:$0xff]  ;;  %v6104_v9 = vld [vmem:[%s9638_s8 + $0x118] sm:$0xff] }
 0xcdc   : > { %v4391_v14 = vpop.f32.mrb[42].mxu0 }
 0xcdd   : > { %v7322_v15 = vpop.f32.mrb[43].mxu0  ;;  %7356 = vmatmul.mubr.f32.vlgmr.msra.gmra.mrb[44].mxu0 %v4391_v14 }
 0xcde   : > { %7408 = vmatprep.mubr.msk.f32.mxu0 %vm2206_vm3, %v6061_v51  ;;  %v6071_v15 = vld [vmem:[%s9636_s9 + $0xb0] sm:$0xff] }
 0xcdf   : > { %v8068_v51 = vpack.c.bf16 %v6072_v16, %v6071_v15  ;;  %v6108_v15 = vld [vmem:[%s9638_s8 + $0x138] sm:$0xff] }
 0xdb0   : > { %v4478_v17 = vpop.f32.mrb[44].mxu0 }
 0xdb1   : > { %v4482_v19 = vadd.f32 %v4478_v17, %v4319_v13  ;;  %v7357_v21 = vpop.f32.mrb[45].mxu0  ;;  %v6070_v13 = vld [vmem:[%s9636_s9 + $0xa8] sm:$0xff]  ;;  %v5097_v17 = vld [vmem:[%s9638_s8] sm:$0xff]  ;;  %s6123_s9 = sshll.u32 %s8673_s0, 6 }
 0xdb2   : > { %v8064_v14 = vpack.c.bf16 %v6070_v13, %v6069_v12  ;;  %v5099_v21 = vld [vmem:[%s9638_s8 + $0x10] sm:$0xff]  ;;  %v6106_v12 = vld [vmem:[%s9638_s8 + $0x128] sm:$0xff]  ;;  %s9451_s14 = scalar_lea.hbm %s8640_s12, %s6123_s9 }
 0xdb3   : > { %v4490_v22 = vadd.f32 %v6042_v18, %v4482_v19  ;;  %v5098_v18 = vld [vmem:[%s9638_s8 + $0x8] sm:$0xff] }
 0xdb4   : > { %v8076_v19 = vpack.c.bf16 %v5098_v18, %v5097_v17  ;;  %v6110_v17 = vld [vmem:[%s9638_s8 + $0x148] sm:$0xff]  ;;  %v6111_v18 = vld [vmem:[%s9638_s8 + $0x150] sm:$0xff] }
 0xdb5   : > { %v4491_v23 = vmax.f32 %v4490_v22, 0.0  ;;  %v5100_v22 = vld [vmem:[%s9638_s8 + $0x18] sm:$0xff] }
 0xdb7   : > { %7358 = vmatprep.subr.mxu1 %v4491_v23  ;;  %7406 = vmatprep.subr.mxu0 %v4491_v23 }
 0xdb8   : > { %7359 = vmatpush3.msra.mxu1 %v4491_v23  ;;  %7407 = vmatpush3.msra.mxu0 %v4491_v23 }
 0xdb9   : > { %7361 = vmatmul.mubr.msk.f32.vlgmr.msra.gmra.mrb[34].mxu1 %vm2206_vm3, %v4493_v61  ;;  %7363 = vmatprep.subr.mxu1 %v4491_v23  ;;  %v5101_v61 = vld [vmem:[%s9638_s8 + $0x20] sm:$0xff] }
 0xdba   : > { %8073 = vmatprep.subr.bf16.mxu0 %v8778_v20  ;;  %7364 = vmatpush3.msra.mxu1 %v4491_v23  ;;  %v8080_v23 = vpack.c.bf16 %v5100_v22, %v5099_v21  ;;  %v8084_v25 = vpack.c.bf16 %v5102_v24, %v5101_v61  ;;  %v6113_v21 = vld [vmem:[%s9638_s8 + $0x160] sm:$0xff]  ;;  %v6114_v22 = vld [vmem:[%s9638_s8 + $0x168] sm:$0xff]  ;;  %v6115_v61 = vld [vmem:[%s9638_s8 + $0x170] sm:$0xff] }
 0xdbb   : > { %7409 = vmatmul.mubr.msk.f32.vlgmr.msra.gmra.mrb[46].mxu0 %vm2206_vm3, %v6062_v26  ;;  %7365 = vmatprep.mubr.msk.f32.mxu1 %vm2206_vm3, %v6045_v27  ;;  %v5103_v26 = vld [vmem:[%s9638_s8 + $0x30] sm:$0xff]  ;;  %v5104_v27 = vld [vmem:[%s9638_s8 + $0x38] sm:$0xff] }
 0xdbc   : > { %8075 = vmatpush3.bf16.msra.mxu0 %v8778_v20  ;;  %7434 = vmatprep.mubr.msk.f32.mxu0 %vm1017_vm0, %v5014_v28  ;;  %v8088_v28 = vpack.c.bf16 %v5104_v27, %v5103_v26  ;;  %v6116_v24 = vld [vmem:[%s9638_s8 + $0x178] sm:$0xff] }
 0xdbd   : > { %8109 = vmatprep.subr.bf16.mxu0 %v8778_v20  ;;  %7366 = vmatmul.mubr.msk.f32.vlgmr.msra.gmra.mrb[36].mxu1 %vm2206_vm3, %v6046_v29  ;;  %v5105_v29 = vld [vmem:[%s9638_s8 + $0x40] sm:$0xff] }
 0xdbe   : > { %8025 = vmatprep.subr.bf16.mxu1 %v8024_v30 }
 0xdbf   : > { %7435 = vmatmul.mubr.msk.f32.vlgmr.msra.gmra.mrb[48].mxu0 %vm1017_vm0, %v5015_v33  ;;  %8027 = vmatpush3.bf16.msra.mxu1 %v8024_v30  ;;  %v5106_v30 = vld [vmem:[%s9638_s8 + $0x48] sm:$0xff]  ;;  %v5108_v33 = vld [vmem:[%s9638_s8 + $0x58] sm:$0xff] }
 0xdc0   : > { %8111 = vmatpush3.bf16.msra.mxu0 %v8778_v20  ;;  %7476 = vmatprep.mubr.msk.f32.mxu0 %vm1017_vm0, %v6077_v34  ;;  %v8092_v31 = vpack.c.bf16 %v5106_v30, %v5105_v29  ;;  %v8096_v34 = vpack.c.bf16 %v5108_v33, %v5107_v32 }
 0xdc1   : > { %8145 = vmatprep.subr.bf16.mxu0 %v8778_v20  ;;  %8029 = vmatprep.subr.bf16.mxu1 %v8028_v35 }
 0xdc3   : > { %7477 = vmatmul.mubr.msk.f32.vlgmr.msra.gmra.mrb[50].mxu0 %vm1017_vm0, %v6078_v38  ;;  %8031 = vmatpush3.bf16.msra.mxu1 %v8028_v35  ;;  %v5109_v35 = vld [vmem:[%s9638_s8 + $0x60] sm:$0xff]  ;;  %v5111_v38 = vld [vmem:[%s9638_s8 + $0x70] sm:$0xff] }
 0xdc4   : > { %8147 = vmatpush3.bf16.msra.mxu0 %v8778_v20  ;;  %7518 = vmatprep.mubr.msk.f32.mxu0 %vm1017_vm0, %v6097_v39  ;;  %v8100_v37 = vpack.c.bf16 %v5110_v36, %v5109_v35  ;;  %v5112_v39 = vld [vmem:[%s9638_s8 + $0x78] sm:$0xff] }
 0xdc5   : > { %8033 = vmatprep.subr.bf16.mxu1 %v8032_v40 }
 0xdc7   : > { %7519 = vmatmul.mubr.msk.f32.vlgmr.msra.gmra.mrb[52].mxu0 %vm1017_vm0, %v6098_v41  ;;  %8035 = vmatpush3.bf16.msra.mxu1 %v8032_v40  ;;  %v8104_v40 = vpack.c.bf16 %v5112_v39, %v5111_v38  ;;  %v6081_v41 = vld [vmem:[%s9638_s8 + $0x80] sm:$0xff] }
 0xdc8   : > { %8037 = vmatprep.subr.bf16.mxu1 %v8036_v44  ;;  %v8112_v43 = vpack.c.bf16 %v6082_v42, %v6081_v41 }
 0xdcb   : > { %8039 = vmatpush3.bf16.msra.mxu1 %v8036_v44  ;;  %v6083_v44 = vld [vmem:[%s9638_s8 + $0x90] sm:$0xff] }
 0xdcc   : > { %8041 = vmatprep.subr.bf16.mxu1 %v8040_v47  ;;  %v8116_v46 = vpack.c.bf16 %v6084_v45, %v6083_v44 }
 0xe8c   : > { %v7362_v20 = vpop.f32.mrb[34].mxu1 }
 0xe8d   : > { %v4566_v48 = vpop.f32.mrb[35].mxu1 }
 0xe8e   : > { %v7410_v53 = vpop.f32.mrb[46].mxu0 }
 0xe8f   : > { %v4913_v60 = vpop.f32.mrb[47].mxu0 }
 0xe90   : > { %v7367_v54 = vpop.f32.mrb[36].mxu1 }
 0xe91   : > { %v4658_v55 = vpop.f32.mrb[37].mxu1 }
 0xe92   : > { %7384 = vmatprep.mubr.msk.f32.mxu1 %vm1200_vm1, %v4658_v55  ;;  %v9366_v59 = vpop.f32.mrb[48].mxu0 }
 0xe93   : > { %7385 = vmatmul.mubr.msk.f32.vlgmr.msra.gmra.mrb[38].mxu1 %vm1200_vm1, %v7367_v54  ;;  %v5088_v52 = vpop.f32.mrb[49].mxu0  ;;  %v6090_v54 = vld [vmem:[%s9638_s8 + $0xc8] sm:$0xff] }
 0xe94   : > { %8043 = vmatpush3.bf16.msra.mxu1 %v8040_v47  ;;  %7403 = vmatprep.mubr.msk.f32.mxu1 %vm1200_vm1, %v4566_v48  ;;  %v6085_v47 = vld [vmem:[%s9638_s8 + $0xa0] sm:$0xff] }
 0xe95   : > { %8045 = vmatprep.subr.bf16.mxu1 %v8044_v56 }
 0xe96   : > { %v9372_v1 = vpop.f32.mrb[50].mxu0 }
 0xe97   : > { %v9374_v2 = vpop.f32.mrb[51].mxu0 }
 0xe98   : > { %8047 = vmatpush3.bf16.msra.mxu1 %v8044_v56  ;;  %v6091_v56 = vld [vmem:[%s9638_s8 + $0xd0] sm:$0xff] }
 0xe99   : > { %8049 = vmatprep.subr.bf16.mxu1 %v8048_v62  ;;  %v8132_v58 = vpack.c.bf16 %v6092_v57, %v6091_v56 }
 0xe9a   : > { %v9378_v6 = vpop.f32.mrb[52].mxu0 }
 0xe9b   : > { %v9380_v7 = vpop.f32.mrb[53].mxu0 }
 0xe9c   : > { %8051 = vmatpush3.bf16.msra.mxu1 %v8048_v62 }
 0xe9d   : > { %8053 = vmatprep.subr.bf16.mxu1 %v8052_v3 }
 0xea0   : > { %8055 = vmatpush3.bf16.msra.mxu1 %v8052_v3  ;;  %v6101_v3 = vld [vmem:[%s9638_s8 + $0x100] sm:$0xff] }
 0xea1   : > { %8057 = vmatprep.subr.bf16.mxu1 %v8056_v8  ;;  %v8148_v5 = vpack.c.bf16 %v6102_v4, %v6101_v3 }
 0xea3   : > { %7404 = vmatmul.mubr.msk.f32.vlgmr.msra.gmra.mrb[38].mxu1 %vm1200_vm1, %v7362_v20  ;;  %v6086_v20 = vld [vmem:[%s9638_s8 + $0xa8] sm:$0xff] }
 0xea4   : > { %8059 = vmatpush3.bf16.msra.mxu1 %v8056_v8  ;;  %7427 = vmatprep.mubr.msk.f32.mxu1 %vm1200_vm1, %v4913_v60  ;;  %v8120_v48 = vpack.c.bf16 %v6086_v20, %v6085_v47  ;;  %v6089_v60 = vld [vmem:[%s9638_s8 + $0xc0] sm:$0xff]  ;;  %v6103_v8 = vld [vmem:[%s9638_s8 + $0x110] sm:$0xff] }
 0xea5   : > { %8061 = vmatprep.subr.bf16.mxu1 %v8060_v11  ;;  %v8128_v55 = vpack.c.bf16 %v6090_v54, %v6089_v60  ;;  %v8152_v10 = vpack.c.bf16 %v6104_v9, %v6103_v8 }
 0xea8   : > { %8063 = vmatpush3.bf16.msra.mxu1 %v8060_v11  ;;  %v6105_v11 = vld [vmem:[%s9638_s8 + $0x120] sm:$0xff] }
 0xea9   : > { %8065 = vmatprep.subr.bf16.mxu1 %v8064_v14  ;;  %v8156_v13 = vpack.c.bf16 %v6106_v12, %v6105_v11 }
 0xeac   : > { %8067 = vmatpush3.bf16.msra.mxu1 %v8064_v14  ;;  %v6107_v14 = vld [vmem:[%s9638_s8 + $0x130] sm:$0xff] }
 0xead   : > { %8069 = vmatprep.subr.bf16.mxu1 %v8068_v51  ;;  %v8160_v16 = vpack.c.bf16 %v6108_v15, %v6107_v14 }
 0xeb0   : > { %8071 = vmatpush3.bf16.msra.mxu1 %v8068_v51  ;;  %v6109_v51 = vld [vmem:[%s9638_s8 + $0x140] sm:$0xff] }
 0xeb1   : > { %8077 = vmatprep.subr.bf16.mxu1 %v8076_v19 }
 0xeb3   : > { %7428 = vmatmul.mubr.msk.f32.vlgmr.msra.gmra.mrb[38].mxu1 %vm1200_vm1, %v7410_v53  ;;  %v8124_v53 = vpack.c.bf16 %v6088_v50, %v6087_v49 }
 0xeb4   : > { %8079 = vmatpush3.bf16.msra.mxu1 %v8076_v19  ;;  %7469 = vmatprep.mubr.f32.mxu1 %v5088_v52  ;;  %v6094_v52 = vld [vmem:[%s9638_s8 + $0xe8] sm:$0xff]  ;;  %v6112_v19 = vld [vmem:[%s9638_s8 + $0x158] sm:$0xff] }
 0xeb5   : > { %8081 = vmatprep.subr.bf16.mxu1 %v8080_v23 }
 0xeb8   : > { %8083 = vmatpush3.bf16.msra.mxu1 %v8080_v23  ;;  %v8172_v23 = vpack.c.bf16 %v6114_v22, %v6113_v21 }
 0xeb9   : > { %8085 = vmatprep.subr.bf16.mxu1 %v8084_v25 }
 0xebc   : > { %8087 = vmatpush3.bf16.msra.mxu1 %v8084_v25  ;;  %v8176_v25 = vpack.c.bf16 %v6116_v24, %v6115_v61 }
 0xebd   : > { %8089 = vmatprep.subr.bf16.mxu1 %v8088_v28 }
 0xec0   : > { %8091 = vmatpush3.bf16.msra.mxu1 %v8088_v28 }
 0xec1   : > { %8093 = vmatprep.subr.bf16.mxu1 %v8092_v31 }
 0xec4   : > { %8095 = vmatpush3.bf16.msra.mxu1 %v8092_v31 }
 0xec5   : > { %8097 = vmatprep.subr.bf16.mxu1 %v8096_v34 }
 0xec8   : > { %8099 = vmatpush3.bf16.msra.mxu1 %v8096_v34 }
 0xec9   : > { %8101 = vmatprep.subr.bf16.mxu1 %v8100_v37 }
 0xecc   : > { %8103 = vmatpush3.bf16.msra.mxu1 %v8100_v37 }
 0xecd   : > { %8105 = vmatprep.subr.bf16.mxu1 %v8104_v40 }
 0xed0   : > { %8107 = vmatpush3.bf16.msra.mxu1 %v8104_v40 }
 0xed1   : > { %8113 = vmatprep.subr.bf16.mxu1 %v8112_v43 }
 0xed3   : > { %7470 = vmatmul.mubr.f32.vlgmr.msra.gmra.mrb[38].mxu1 %v9366_v59  ;;  %v6093_v59 = vld [vmem:[%s9638_s8 + $0xe0] sm:$0xff]  ;;  %s8285_s8 = scalar_lea.vmem %s5602_s13, 64 }
 0xed4   : > { %8115 = vmatpush3.bf16.msra.mxu1 %v8112_v43  ;;  %7511 = vmatprep.mubr.f32.mxu1 %v9374_v2  ;;  %v8136_v62 = vpack.c.bf16 %v6094_v52, %v6093_v59  ;;  %v8140_v2 = vpack.c.bf16 %v6096_v0, %v6095_v63  ;;  %p8286_p11 = scmp.ne.s32.totalorder %s5602_s13, %s8285_s8  ;;  %p8293_p1 = scmp.lt.s32.totalorder %s8291_s21, %s8285_s8 }
 0xed5   : > { %8117 = vmatprep.subr.bf16.mxu1 %v8116_v46 }
 0xed6   : > { %p8287_p12 = pnand %p8286_p11, %p8692_p5  ;;  %p8294_p2 = por %p8293_p1, %p8292_p0 }
 0xed8   : > { %8119 = vmatpush3.bf16.msra.mxu1 %v8116_v46  ;;  %p8288_p13 = pneg %p8287_p12 }
 0xed9   : > { %8121 = vmatprep.subr.bf16.mxu1 %v8120_v48 }
 0xeda   : > { %p8295_p3 = pnand %p8294_p2, %p8288_p13 }
 0xedc   : > { %8123 = vmatpush3.bf16.msra.mxu1 %v8120_v48 }
 0xedd   : > { %8125 = vmatprep.subr.bf16.mxu1 %v8124_v53 }
 0xee0   : > { %8127 = vmatpush3.bf16.msra.mxu1 %v8124_v53 }
 0xee1   : > { %8129 = vmatprep.subr.bf16.mxu1 %v8128_v55 }
 0xee4   : > { %8131 = vmatpush3.bf16.msra.mxu1 %v8128_v55 }
 0xee5   : > { %8133 = vmatprep.subr.bf16.mxu1 %v8132_v58 }
 0xee8   : > { %8135 = vmatpush3.bf16.msra.mxu1 %v8132_v58 }
 0xee9   : > { %8137 = vmatprep.subr.bf16.mxu1 %v8136_v62 }
 0xeec   : > { %8139 = vmatpush3.bf16.msra.mxu1 %v8136_v62 }
 0xeed   : > { %8141 = vmatprep.subr.bf16.mxu1 %v8140_v2 }
 0xef0   : > { %8143 = vmatpush3.bf16.msra.mxu1 %v8140_v2 }
 0xef1   : > { %8149 = vmatprep.subr.bf16.mxu1 %v8148_v5 }
 0xef3   : > { %7512 = vmatmul.mubr.f32.vlgmr.msra.gmra.mrb[38].mxu1 %v9372_v1  ;;  %v8164_v1 = vpack.c.bf16 %v6110_v17, %v6109_v51 }
 0xef4   : > { %8151 = vmatpush3.bf16.msra.mxu1 %v8148_v5  ;;  %7553 = vmatprep.mubr.f32.mxu1 %v9380_v7  ;;  %v8168_v7 = vpack.c.bf16 %v6112_v19, %v6111_v18 }
 0xef5   : > { %8153 = vmatprep.subr.bf16.mxu1 %v8152_v10 }
 0xef8   : > { %8155 = vmatpush3.bf16.msra.mxu1 %v8152_v10 }
 0xef9   : > { %8157 = vmatprep.subr.bf16.mxu1 %v8156_v13 }
 0xefc   : > { %8159 = vmatpush3.bf16.msra.mxu1 %v8156_v13 }
 0xefd   : > { %8161 = vmatprep.subr.bf16.mxu1 %v8160_v16 }
 0xf00   : > { %8163 = vmatpush3.bf16.msra.mxu1 %v8160_v16 }
 0xf01   : > { %8165 = vmatprep.subr.bf16.mxu1 %v8164_v1 }
 0xf04   : > { %8167 = vmatpush3.bf16.msra.mxu1 %v8164_v1 }
 0xf05   : > { %8169 = vmatprep.subr.bf16.mxu1 %v8168_v7 }
 0xf08   : > { %8171 = vmatpush3.bf16.msra.mxu1 %v8168_v7 }
 0xf09   : > { %8173 = vmatprep.subr.bf16.mxu1 %v8172_v23 }
 0xf0c   : > { %8175 = vmatpush3.bf16.msra.mxu1 %v8172_v23 }
 0xf0d   : > { %8177 = vmatprep.subr.bf16.mxu1 %v8176_v25 }
 0xf10   : > { %8179 = vmatpush3.bf16.msra.mxu1 %v8176_v25 }
 0xf13   : > { %7554 = vmatmul.mubr.f32.vlgmr.msra.gmra.mrb[38].mxu1 %v9378_v6 }
 0xf14   : > { %8298 = shalt.err (!%p8295_p3)
}
 0xf15   : > { %s8299_s9 = scalar_lea.hbm %s9451_s14, 64  ;;  %s8303_s17 = scalar_lea.hbm %s8640_s12, 128 }
 0xf16   : > { %p8300_p4 = scmp.ne.s32.totalorder %s9451_s14, %s8299_s9  ;;  %p8304_p9 = scmp.lt.u32.totalorder %s9451_s14, %s8640_s12 }
 0xf17   : > { %p8305_p10 = scmp.lt.u32.totalorder %s8303_s17, %s8299_s9  ;;  %p8307_p12 = scmp.lt.u32.totalorder %s8299_s9, %s9451_s14 }
 0xf18   : > { %p8301_p7 = pnand %p8300_p4, %p8692_p5 }
 0xf19   : > { %p8306_p11 = por %p8305_p10, %p8304_p9 }
 0xf1a   : > { %p8302_p8 = pneg %p8301_p7 }
 0xf1b   : > { %p8308_p0 = por %p8307_p12, %p8306_p11 }
 0xf1d   : > { %p8309_p13 = pnand %p8308_p0, %p8302_p8 }
 0xf1f   : > { %8312 = shalt.err (!%p8309_p13)
}
 0xf20   : > { %8195 = dma.vmem_to_hbm [thread:$0]  (%p8692_p5), %s5602_s13, 64, %s9451_s14, %s9453_s15  }
 0xf21   : > { %s6122_s21 = sshll.u32 %s8673_s0, 7  ;;  %s5588_s6 = sshll.u32 %s8886_s16, 4  ;;  %s9474_s6 = int_to_ptr.vmem [resolvable:$true] %s5588_s6 }
 0xf22   : > { %s9471_s19 = scalar_lea.hbm %s8635_s4, %s6122_s21  ;;  %s6124_s10 = sshll.u32 %s8673_s0, 5 }
 0xf23   : > { %s5560_s5 = scalar_lea.sflag [#allocation3], %s8883_s26  ;;  %s8313_s8 = scalar_lea.vmem %s9474_s6, 128 }
 0xf24   : > { %p8314_p1 = scmp.ne.s32.totalorder %s9474_s6, %s8313_s8  ;;  %s8477_s9 = smov [#allocation2]  }
 0xf25   : > { %s8317_s17 = sshll.u32 %s8477_s9, 4  ;;  %s8318_s17 = int_to_ptr.vmem [resolvable:$false] %s8317_s17 }
 0xf26   : > { %p8315_p2 = pnand %p8314_p1, %p8692_p5  ;;  %s8319_s13 = scalar_lea.vmem %s8318_s17, 256 }
 0xf27   : > { %p8320_p4 = scmp.lt.s32.totalorder %s9474_s6, %s8318_s17  ;;  %p8321_p7 = scmp.lt.s32.totalorder %s8319_s13, %s8313_s8 }
 0xf28   : > { %p8316_p3 = pneg %p8315_p2 }
 0xf29   : > { %p8322_p8 = por %p8321_p7, %p8320_p4 }
 0xf2b   : > { %p8323_p9 = pnand %p8322_p8, %p8316_p3 }
 0xf2d   : > { %8326 = shalt.err (!%p8323_p9)
}
 0xf2e   : > { %s8327_s14 = scalar_lea.hbm %s9471_s19, 128  ;;  %s8331_s16 = scalar_lea.hbm %s8635_s4, 256 }
 0xf2f   : > { %p8328_p10 = scmp.ne.s32.totalorder %s9471_s19, %s8327_s14  ;;  %p8332_p0 = scmp.lt.u32.totalorder %s9471_s19, %s8635_s4 }
 0xf30   : > { %p8333_p13 = scmp.lt.u32.totalorder %s8331_s16, %s8327_s14  ;;  %p8335_p2 = scmp.lt.u32.totalorder %s8327_s14, %s9471_s19 }
 0xf31   : > { %p8329_p11 = pnand %p8328_p10, %p8692_p5 }
 0xf32   : > { %p8334_p1 = por %p8333_p13, %p8332_p0 }
 0xf33   : > { %p8330_p12 = pneg %p8329_p11 }
 0xf34   : > { %p8336_p4 = por %p8335_p2, %p8334_p1 }
 0xf36   : > { %p8337_p3 = pnand %p8336_p4, %p8330_p12 }
 0xf38   : > { %8340 = shalt.err (!%p8337_p3)
}
 0xf39   : > { %8194 = dma.vmem_to_hbm [thread:$0]  (%p8692_p5), %s9474_s6, 128, %s9471_s19, %s5560_s5  }
 0xf3a   : > { %s5612_s21 = scalar_lea.hbm %s8645_s20, %s6124_s10  ;;  %s8341_s8 = scalar_lea.vmem %s9446_s3, 32 }
 0xf3b   : > { %p8342_p7 = scmp.ne.s32.totalorder %s9446_s3, %s8341_s8  ;;  %s8478_s9 = smov [#allocation6]  }
 0xf3c   : > { %s8345_s17 = sshll.u32 %s8478_s9, 4  ;;  %s8346_s17 = int_to_ptr.vmem [resolvable:$false] %s8345_s17 }
 0xf3d   : > { %p8343_p8 = pnand %p8342_p7, %p8692_p5  ;;  %s8347_s13 = scalar_lea.vmem %s8346_s17, 64 }
 0xf3e   : > { %p8348_p10 = scmp.lt.s32.totalorder %s9446_s3, %s8346_s17  ;;  %p8349_p11 = scmp.lt.s32.totalorder %s8347_s13, %s8341_s8 }
 0xf3f   : > { %p8344_p9 = pneg %p8343_p8 }
 0xf40   : > { %p8350_p12 = por %p8349_p11, %p8348_p10 }
 0xf42   : > { %p8351_p0 = pnand %p8350_p12, %p8344_p9 }
 0xf44   : > { %8354 = shalt.err (!%p8351_p0)
}
 0xf45   : > { %s8355_s14 = scalar_lea.hbm %s5612_s21, 32  ;;  %s8359_s19 = scalar_lea.hbm %s8645_s20, 64 }
 0xf46   : > { %p8356_p13 = scmp.ne.s32.totalorder %s5612_s21, %s8355_s14  ;;  %p8360_p4 = scmp.lt.u32.totalorder %s5612_s21, %s8645_s20 }
 0xf47   : > { %p8361_p3 = scmp.lt.u32.totalorder %s8359_s19, %s8355_s14  ;;  %p8363_p8 = scmp.lt.u32.totalorder %s8355_s14, %s5612_s21 }
 0xf48   : > { %p8357_p1 = pnand %p8356_p13, %p8692_p5 }
 0xf49   : > { %p8362_p7 = por %p8361_p3, %p8360_p4 }
 0xf4a   : > { %p8358_p2 = pneg %p8357_p1 }
 0xf4b   : > { %p8364_p6 = por %p8363_p8, %p8362_p7 }
 0xf4d   : > { %p8365_p10 = pnand %p8364_p6, %p8358_p2 }
 0xf4f   : > { %8368 = shalt.err (!%p8365_p10)
}
 0xf50   : > { %s9639_s6 = sld [smem:[#allocation36_spill]]  ;;  %s5821_s10 = sshll.u32 %s8883_s26, 4 }
 0xf51   : > { %8196 = dma.vmem_to_hbm [thread:$0]  (%p8692_p5), %s9446_s3, 32, %s5612_s21, %s9453_s15  }
 0xf52   : > { %s1007_s5 = scalar_lea.vmem [#allocation7], %s5821_s10  ;;  %s6130_s8 = sshll.u32 %s8673_s0, 8 }
 0xf53   : > { %s5627_s16 = sshll.u32 %s1007_s5, 4  ;;  %s9517_s9 = scalar_lea.hbm %s8650_s27, %s6130_s8  ;;  %s9514_s16 = int_to_ptr.vmem [resolvable:$true] %s5627_s16 }
 0xf54   : > { %s5575_s15 = scalar_lea.sflag [#allocation8], %s8883_s26  ;;  %s8369_s3 = scalar_lea.vmem %s9514_s16, 256 }
 0xf55   : > { %p8370_p6 = scmp.ne.s32.totalorder %s9514_s16, %s8369_s3  ;;  %s8479_s0 = smov [#allocation7]  }
 0xf56   : > { %v6117_v6 = vld [vmem:[%s9639_s6] ss:$0 sm:$0xff]  ;;  %s8373_s21 = sshll.u32 %s8479_s0, 4  ;;  %s8374_s21 = int_to_ptr.vmem [resolvable:$false] %s8373_s21 }
 0xf57   : > { %p8371_p9 = pnand %p8370_p6, %p8692_p5  ;;  %s8375_s17 = scalar_lea.vmem %s8374_s21, 512 }
 0xf58   : > { %p8376_p12 = scmp.lt.s32.totalorder %s9514_s16, %s8374_s21  ;;  %p8377_p0 = scmp.lt.s32.totalorder %s8375_s17, %s8369_s3 }
 0xf59   : > { %p8372_p11 = pneg %p8371_p9 }
 0xf5a   : > { %p8378_p13 = por %p8377_p0, %p8376_p12 }
 0xf5c   : > { %p8379_p1 = pnand %p8378_p13, %p8372_p11 }
 0xfe6   : > { %v7555_v26 = vpop.f32.mrb[38].mxu1 }
 0xfe7   : > { %v5554_v27 = vadd.f32 %v7555_v26, %v6117_v6  ;;  %v5535_v28 = vpop.f32.mrb[39].mxu1 }
 0xfe8   : > { %v5553_v29 = vadd.f32 %v6117_v6, %v5535_v28 }
 0xfe9   : > { %v5556_v30 = vmax.f32 %v5554_v27, 0.0 }
 0xfea   : > { %v5555_v31 = vmax.f32 %v5553_v29, 0.0 }
 0xfeb   : > { %5558 = vst.msk [vmem:[%s1007_s5 + $0x8] sm:$0xff] %vm1200_vm1, %v5556_v30 }
 0xfec   : > { %5557 = vst.msk [vmem:[%s1007_s5] sm:$0xff] %vm1200_vm1, %v5555_v31 }
 0xfed   : > { %8382 = shalt.err (!%p8379_p1)
}
 0xfee   : > { %s8383_s13 = scalar_lea.hbm %s9517_s9, 256  ;;  %s8387_s14 = scalar_lea.hbm %s8650_s27, 512 }
 0xfef   : > { %p8384_p2 = scmp.ne.s32.totalorder %s9517_s9, %s8383_s13  ;;  %p8388_p7 = scmp.lt.u32.totalorder %s9517_s9, %s8650_s27 }
 0xff0   : > { %p8389_p8 = scmp.lt.u32.totalorder %s8387_s14, %s8383_s13  ;;  %p8391_p6 = scmp.lt.u32.totalorder %s8383_s13, %s9517_s9 }
 0xff1   : > { %p8385_p4 = pnand %p8384_p2, %p8692_p5 }
 0xff2   : > { %p8390_p10 = por %p8389_p8, %p8388_p7 }
 0xff3   : > { %p8386_p3 = pneg %p8385_p4 }
 0xff4   : > { %p8392_p9 = por %p8391_p6, %p8390_p10 }
 0xff6   : > { %p8393_p11 = pnand %p8392_p9, %p8386_p3 }
 0xff8   : > { %8396 = shalt.err (!%p8393_p11)
}
 0xff9   : > { %s8480_s19 = smov 128   ;;  %s8481_s6 = smov 8  }
 0xffa   : > { %8197 = dma.vmem_to_hbm [thread:$0]  (%p8692_p5), %s9514_s16, 256, %s9517_s9, %s5575_s15, %s8480_s19, %s8480_s19, %s8481_s6  }
 0xffb PF: > { %p8215_p12 = scmp.ge.s32.totalorder %s8439_s7, 2  ;;  %s5642_s10 = sand.u32 1, %s8427_s28  }
 0xffc   : > { %p9640_p0 = scmp.ne.s32.totalorder %s9618_s23, 0  ;;  %s5643_s5 = scalar_lea.sflag [#allocation3], %s5642_s10 }
 0xffe   : > { %p8203_p13 = pnand %p8215_p12, %p9640_p0 }
0x1000   : > { %8414 = dma.done.wait (!%p8203_p13), %s5643_s5, 128  }
0x1001   : > { %8416 = vsyncadd (!%p8203_p13), %s5643_s5, 4294967168  ;;  %s9641_s8 = sadd.s32 4294967294, %s8439_s7  }
0x1002   : > { %s5651_s3 = sand.u32 1, %s9641_s8  }
0x1003   : > { %s5652_s0 = scalar_lea.sflag [#allocation5], %s5651_s3 }
0x1004   : > { %8418 = dma.done.wait (!%p8203_p13), %s5652_s0, 96  }
0x1005   : > { %8420 = vsyncadd (!%p8203_p13), %s5652_s0, 4294967200  ;;  %s5670_s22 = scalar_lea.sflag [#allocation8], %s5642_s10 }
0x1006   : > { %8422 = dma.done.wait (!%p8203_p13), %s5670_s22, 256  }
0x1007   : > { %8424 = vsyncadd (!%p8203_p13), %s5670_s22, 4294967040  ;;  %p82_p5 = scmp.ge.s32.totalorder %s8677_s11, 4   ;;  %s9642_s28 = smov %s8431_s1 }
0x1008   : > { %s9643_s1 = smov %s8435_s2  ;;  %s9644_s2 = smov %s8690_s18 }
0x1009   : > { %s9645_s7 = smov %s8677_s11  ;;  %84 = sbr.rel (!%p82_p5) target bundleno = 73 (0x49), region = 284 }
0x1010   :  { %5675 = vsyncpa [#allocation3], 1 }
0x1011   :  { %5677 = vsyncpa [#allocation3 + $0x1], 1 }
0x1012   :  { %5678 = vsyncpa [#allocation5], 1 }
0x1013   :  { %5680 = vsyncpa [#allocation5 + $0x1], 1 }
0x1014   :  { %5681 = vsyncpa [#allocation8], 1 }
0x1015   :  { %5683 = vsyncpa [#allocation8 + $0x1], 1 }

</bundles_post_ra>
